<compile_context>
chip_gen: v5e
topology: v5e:2x2
jax: 0.10.0
libtpu: 0.0.40
codegen_flags: <defaults>
</compile_context>

<pallas_src>
import jax
import jax.numpy as jnp
import numpy as np
from jax.experimental import pallas as pl
from jax.experimental.pallas import tpu as pltpu

SELU_ALPHA = 1.6732632423543772
SELU_SCALE = 1.0507009873554805
KSIZE = 9  # conv kernel size along the time axis


def _selu(x):
    # SELU with the exp clamped so the unselected branch never overflows.
    return SELU_SCALE * jnp.where(
        x > 0, x, SELU_ALPHA * (jnp.exp(jnp.minimum(x, 0.0)) - 1.0))


# -----------------------------------------------------------------------------
# Single fused kernel: conv1+conv2+conv3 (+SELU +AvgPool) + fc1 + SELU +
# MinibatchDiscrimination1d + fc2.  No grid -- the whole (tiny) network runs in
# one invocation with every operand resident in VMEM.
# -----------------------------------------------------------------------------
def disc_kernel(x1e_ref, x1o_ref,          # (N*60, 27) im2col windows, even/odd conv rows
                w1_ref, b1_ref,            # (27, 64), (1, 64)
                w2_ref, b2_ref, ps2_ref,   # (9, 64, 128), (1, 128), (N*26, N*60-8)
                w3_ref, b3_ref, ps3_ref,   # (9, 128, 256), (1, 256), (9*N, N*26-8)
                wf1_ref, bf1_ref,          # (9, 256, 64), (1, 64)
                t_ref, s_ref,              # (64, 512) MBD tensor T, (512, 32) block-sum
                pd_ref, psum_ref,          # (N*N, N) pair-difference, (N, N*N) sum-over-j
                w2h_ref, w2o_ref, bfc2_ref,  # (64, 1), (32, 1), (1, 1)
                o_ref):                    # (N, 1)
    n = o_ref.shape[0]

    # ---- Layer 1: im2col conv (one matmul per even/odd half) + SELU, then the
    #      2:1 avg-pool is a plain VPU add of the two halves.
    ze = _selu(jnp.dot(x1e_ref[...], w1_ref[...],
                       preferred_element_type=jnp.float32) + b1_ref[...])
    zo = _selu(jnp.dot(x1o_ref[...], w1_ref[...],
                       preferred_element_type=jnp.float32) + b1_ref[...])
    z1 = 0.5 * (ze + zo)                         # (N*60, 64), batch-contiguous rows

    # ---- Layer 2: 9-tap conv over the batch-stacked rows (windows that cross a
    #      batch boundary produce garbage rows that ps2 discards), SELU, then
    #      pool + valid-row selection fused into one 0.5-valued matmul.
    l2 = z1.shape[0] - KSIZE + 1                 # N*60 - 8
    acc2 = jnp.zeros((l2, w2_ref.shape[2]), jnp.float32)
    for k in range(KSIZE):
        acc2 = acc2 + jnp.dot(z1[k:k + l2, :], w2_ref[k],
                              preferred_element_type=jnp.float32)
    z2 = _selu(acc2 + b2_ref[...])
    z2p = jnp.dot(ps2_ref[...], z2, preferred_element_type=jnp.float32)   # (N*26, 128)

    # ---- Layer 3: same structure; ps3 emits rows in h-major order (u*N + b) so
    #      fc1 below can consume contiguous N-row slabs per pooled position.
    l3 = z2p.shape[0] - KSIZE + 1                # N*26 - 8
    acc3 = jnp.zeros((l3, w3_ref.shape[2]), jnp.float32)
    for k in range(KSIZE):
        acc3 = acc3 + jnp.dot(z2p[k:k + l3, :], w3_ref[k],
                              preferred_element_type=jnp.float32)
    z3 = _selu(acc3 + b3_ref[...])
    z3p = jnp.dot(ps3_ref[...], z3, preferred_element_type=jnp.float32)   # (9*N, 256)

    # ---- fc1 (Linear(2304, 64)) with the C-major flatten folded into the
    #      weight: h[b] = sum_u z3p[u*N+b] @ Wf1[u]   (9 matmuls, contraction 256).
    h = jnp.zeros((n, wf1_ref.shape[2]), jnp.float32)
    for u in range(wf1_ref.shape[0]):
        h = h + jnp.dot(z3p[u * n:(u + 1) * n, :], wf1_ref[u],
                        preferred_element_type=jnp.float32)
    h = _selu(h + bf1_ref[...])                  # (N, 64)

    # ---- Minibatch discrimination, fully vectorized:
    #      M = h @ T; |M_i - M_j| for all pairs via one pair-difference matmul;
    #      L1 over the 16 intermediate features via one block-sum matmul;
    #      sum over j via one matmul; exp(0)=1 self term removed by the -1.
    m = jnp.dot(h, t_ref[...], preferred_element_type=jnp.float32)          # (N, 512)
    d = jnp.abs(jnp.dot(pd_ref[...], m, preferred_element_type=jnp.float32))  # (N*N, 512)
    l1 = jnp.dot(d, s_ref[...], preferred_element_type=jnp.float32)         # (N*N, 32)
    e = jnp.exp(-l1)
    o_mbd = jnp.dot(psum_ref[...], e, preferred_element_type=jnp.float32) - 1.0  # (N, 32)

    # ---- fc2 (Linear(96, 1)) on concat([h, o]) split into two matmuls.
    logit = (jnp.dot(h, w2h_ref[...], preferred_element_type=jnp.float32)
             + jnp.dot(o_mbd, w2o_ref[...], preferred_element_type=jnp.float32)
             + bfc2_ref[...])
    o_ref[...] = logit.astype(o_ref.dtype)


# -----------------------------------------------------------------------------
# Small host-side constant builders (tiny, depend only on N / layer sizes).
# -----------------------------------------------------------------------------
def _pool_select_matrix(n, h_in, h_major=False):
    """0.5-valued matrix that simultaneously (a) keeps only conv windows that do
    not cross a batch boundary in the stacked (n*h_in)-row layout and (b)
    applies the 2:1 average pool.  Output rows are batch-major (b*h_pool + q)
    or h-major (q*n + b)."""
    h_conv = h_in - KSIZE + 1
    h_pool = h_conv // 2
    total_conv_rows = n * h_in - KSIZE + 1
    mat = np.zeros((n * h_pool, total_conv_rows), np.float32)
    for b in range(n):
        for q in range(h_pool):
            r = (q * n + b) if h_major else (b * h_pool + q)
            mat[r, b * h_in + 2 * q] = 0.5
            mat[r, b * h_in + 2 * q + 1] = 0.5
    return jnp.asarray(mat)


def _pair_matrices(n):
    """pd:  (n*n, n)  with +1 at [i*n+j, i] and -1 at [i*n+j, j]  (M_i - M_j)
       psum:(n, n*n)  summing over j for each i."""
    pd = np.zeros((n * n, n), np.float32)
    psum = np.zeros((n, n * n), np.float32)
    for i in range(n):
        for j in range(n):
            pd[i * n + j, i] += 1.0
            pd[i * n + j, j] -= 1.0
            psum[i, i * n + j] = 1.0
    return jnp.asarray(pd), jnp.asarray(psum)


# -----------------------------------------------------------------------------
# Parameter setup (plain-JAX glue): deterministic init + spectral normalization.
# -----------------------------------------------------------------------------
def spectral_normalize(w, n_iters=20, eps=1e-12):
    # TODO(synk): PyTorch spectral_norm does one power iteration per forward with
    # persistent random buffers; a fixed 20-step iteration at init is used here.
    mat = w.reshape(w.shape[0], -1)
    u = jnp.ones((mat.shape[0],), jnp.float32)
    u = u / (jnp.linalg.norm(u) + eps)
    for _ in range(n_iters):
        v = mat.T @ u
        v = v / (jnp.linalg.norm(v) + eps)
        u = mat @ v
        u = u / (jnp.linalg.norm(u) + eps)
    sigma = u @ (mat @ v)
    return w / sigma


def init_params(key, n_channels=3):
    # TODO(synk): original `weight_init` source not provided; deterministic
    # normal init is used here (synthetic weights, no checkpoint load).
    ks = jax.random.split(key, 10)

    def normal(k, shape, std):
        return std * jax.random.normal(k, shape, jnp.float32)

    params = {}
    conv_defs = [(n_channels, 64), (64, 128), (128, 256)]
    for i, (cin, cout) in enumerate(conv_defs, start=1):
        w = normal(ks[2 * (i - 1)], (cout, cin, KSIZE, 1), 0.05)  # PyTorch layout
        w = spectral_normalize(w)
        w_kio = jnp.transpose(w[:, :, :, 0], (2, 1, 0))           # (K, Cin, Cout)
        if i == 1:
            params["conv1_w"] = w_kio.reshape(KSIZE * cin, cout)  # im2col layout
        else:
            params[f"conv{i}_w"] = w_kio
        params[f"conv{i}_b"] = normal(ks[2 * (i - 1) + 1], (1, cout), 0.02)

    w_fc1 = normal(ks[6], (64, 256 * 9 * 1), 0.02)   # PyTorch Linear (out, in)
    # Fold the NCHW C-major flatten (index = c*9 + h) into the weight layout
    # (h, c, out) consumed by the kernel -- removes the runtime transpose.
    params["fc1_w"] = w_fc1.reshape(64, 256, 9).transpose(2, 1, 0)   # (9, 256, 64)
    params["fc1_b"] = normal(ks[7], (1, 64), 0.02)

    t = normal(ks[8], (64, 32, 16), 0.1)             # MinibatchDiscrimination1d T
    params["mbd_T"] = t.reshape(64, 32 * 16)         # columns = out*16 + inter
    params["mbd_S"] = jnp.repeat(jnp.eye(32, dtype=jnp.float32), 16, axis=0)

    w_fc2 = normal(ks[9], (1, 96), 0.02)             # Linear(96, 1)
    params["fc2_wh"] = w_fc2[:, :64].T               # (64, 1) -> acts on h
    params["fc2_wo"] = w_fc2[:, 64:].T               # (32, 1) -> acts on o
    params["fc2_b"] = jnp.zeros((1, 1), jnp.float32)
    return params


# -----------------------------------------------------------------------------
# Forward wrapper: tiny input prep (NCHW -> channels-last, layer-1 im2col split
# into even/odd conv positions) + one fused pallas_call.
# -----------------------------------------------------------------------------
def discriminator_forward(x_nchw, params):
    n, c_in, h_in, _ = x_nchw.shape
    x_t = jnp.transpose(x_nchw[:, :, :, 0], (0, 2, 1))            # (N, H, Cin)
    h_conv1 = h_in - KSIZE + 1                                    # 120
    h_pool1 = h_conv1 // 2                                        # 60
    # im2col columns ordered (k, c) -> k*Cin + c, matching conv1_w.
    cols = jnp.concatenate([x_t[:, k:k + h_conv1, :] for k in range(KSIZE)],
                           axis=2)                                # (N, 120, 9*Cin)
    x1e = cols[:, 0::2, :].reshape(n * h_pool1, KSIZE * c_in)     # even conv rows
    x1o = cols[:, 1::2, :].reshape(n * h_pool1, KSIZE * c_in)     # odd conv rows

    h2_in = h_pool1                                               # 60
    h3_in = (h2_in - KSIZE + 1) // 2                              # 26
    ps2 = _pool_select_matrix(n, h2_in)                           # (N*26, N*60-8)
    ps3 = _pool_select_matrix(n, h3_in, h_major=True)             # (9*N, N*26-8)
    pd, psum = _pair_matrices(n)

    return pl.pallas_call(
        disc_kernel,
        out_shape=jax.ShapeDtypeStruct((n, 1), jnp.float32),
        compiler_params=pltpu.CompilerParams(vmem_limit_bytes=32 * 1024 * 1024),
    )(x1e, x1o,
      params["conv1_w"], params["conv1_b"],
      params["conv2_w"], params["conv2_b"], ps2,
      params["conv3_w"], params["conv3_b"], ps3,
      params["fc1_w"], params["fc1_b"],
      params["mbd_T"], params["mbd_S"], pd, psum,
      params["fc2_wh"], params["fc2_wo"], params["fc2_b"])


if __name__ == "__main__":
    key = jax.random.PRNGKey(0)
    k_params, k_x = jax.random.split(key)
    params = init_params(k_params)
    # (N, n_channels=3, time=128, width=1): 128 steps -> 120 -> 60 -> 52 -> 26
    # -> 18 -> 9, matching Linear(256*9*1, 64).
    x = jax.random.normal(k_x, (2, 3, 128, 1), jnp.float32)
    fwd = jax.jit(discriminator_forward)
    out = jax.block_until_ready(fwd(x, params))
    assert out.shape == (2, 1) and out.dtype == jnp.float32
    print("KERNEL_OK")
</pallas_src>

<mosaic_0001>
module attributes {stable_mosaic.version = 11 : i64} {
  func.func @disc_kernel(%arg0: memref<120x27xf32, #tpu.memory_space<vmem>>, %arg1: memref<120x27xf32, #tpu.memory_space<vmem>>, %arg2: memref<27x64xf32, #tpu.memory_space<vmem>>, %arg3: memref<1x64xf32, #tpu.memory_space<vmem>>, %arg4: memref<9x64x128xf32, #tpu.memory_space<vmem>>, %arg5: memref<1x128xf32, #tpu.memory_space<vmem>>, %arg6: memref<52x112xf32, #tpu.memory_space<vmem>>, %arg7: memref<9x128x256xf32, #tpu.memory_space<vmem>>, %arg8: memref<1x256xf32, #tpu.memory_space<vmem>>, %arg9: memref<18x44xf32, #tpu.memory_space<vmem>>, %arg10: memref<9x256x64xf32, #tpu.memory_space<vmem>>, %arg11: memref<1x64xf32, #tpu.memory_space<vmem>>, %arg12: memref<64x512xf32, #tpu.memory_space<vmem>>, %arg13: memref<512x32xf32, #tpu.memory_space<vmem>>, %arg14: memref<4x2xf32, #tpu.memory_space<vmem>>, %arg15: memref<2x4xf32, #tpu.memory_space<vmem>>, %arg16: memref<64x1xf32, #tpu.memory_space<vmem>>, %arg17: memref<32x1xf32, #tpu.memory_space<vmem>>, %arg18: memref<1x1xf32, #tpu.memory_space<vmem>>, %arg19: memref<2x1xf32, #tpu.memory_space<vmem>>) attributes {dimension_semantics = [], scalar_prefetch = 0 : i64, scratch_operands = 0 : i64, tpu.core_type = #tpu.core_type<tc>} {
    %c0 = arith.constant 0 : index
    %c0_0 = arith.constant 0 : index
    %0 = vector.load %arg0[%c0, %c0_0] : memref<120x27xf32, #tpu.memory_space<vmem>>, vector<120x27xf32>
    %c0_1 = arith.constant 0 : index
    %c0_2 = arith.constant 0 : index
    %1 = vector.load %arg2[%c0_1, %c0_2] : memref<27x64xf32, #tpu.memory_space<vmem>>, vector<27x64xf32>
    %cst = arith.constant dense<0.000000e+00> : vector<120x64xf32>
    %2 = tpu.matmul %0, %1, %cst {dimension_numbers = #tpu.dot_dimension_numbers<[1], [0], [0], [1], [0, 0, 1, 1], [], []>} : vector<120x27xf32>, vector<27x64xf32>, vector<120x64xf32> -> vector<120x64xf32>
    %c0_3 = arith.constant 0 : index
    %c0_4 = arith.constant 0 : index
    %3 = vector.load %arg3[%c0_3, %c0_4] : memref<1x64xf32, #tpu.memory_space<vmem>>, vector<1x64xf32>
    %4 = vector.broadcast %3 : vector<1x64xf32> to vector<120x64xf32>
    %5 = arith.addf %2, %4 : vector<120x64xf32>
    %cst_5 = arith.constant 0.000000e+00 : f32
    %6 = vector.broadcast %cst_5 : f32 to vector<120x64xf32>
    %7 = arith.cmpf ogt, %5, %6 : vector<120x64xf32>
    %cst_6 = arith.constant 0.000000e+00 : f32
    %8 = vector.broadcast %cst_6 : f32 to vector<120x64xf32>
    %9 = arith.minimumf %5, %8 : vector<120x64xf32>
    %10 = math.exp %9 : vector<120x64xf32>
    %cst_7 = arith.constant 1.000000e+00 : f32
    %11 = vector.broadcast %cst_7 : f32 to vector<120x64xf32>
    %12 = arith.subf %10, %11 : vector<120x64xf32>
    %cst_8 = arith.constant 1.67326319 : f32
    %13 = vector.broadcast %cst_8 : f32 to vector<120x64xf32>
    %14 = arith.mulf %13, %12 : vector<120x64xf32>
    %15 = arith.select %7, %5, %14 : vector<120x64xi1>, vector<120x64xf32>
    %cst_9 = arith.constant 1.05070102 : f32
    %16 = vector.broadcast %cst_9 : f32 to vector<120x64xf32>
    %17 = arith.mulf %16, %15 : vector<120x64xf32>
    %c0_10 = arith.constant 0 : index
    %c0_11 = arith.constant 0 : index
    %18 = vector.load %arg1[%c0_10, %c0_11] : memref<120x27xf32, #tpu.memory_space<vmem>>, vector<120x27xf32>
    %c0_12 = arith.constant 0 : index
    %c0_13 = arith.constant 0 : index
    %19 = vector.load %arg2[%c0_12, %c0_13] : memref<27x64xf32, #tpu.memory_space<vmem>>, vector<27x64xf32>
    %cst_14 = arith.constant dense<0.000000e+00> : vector<120x64xf32>
    %20 = tpu.matmul %18, %19, %cst_14 {dimension_numbers = #tpu.dot_dimension_numbers<[1], [0], [0], [1], [0, 0, 1, 1], [], []>} : vector<120x27xf32>, vector<27x64xf32>, vector<120x64xf32> -> vector<120x64xf32>
    %c0_15 = arith.constant 0 : index
    %c0_16 = arith.constant 0 : index
    %21 = vector.load %arg3[%c0_15, %c0_16] : memref<1x64xf32, #tpu.memory_space<vmem>>, vector<1x64xf32>
    %22 = vector.broadcast %21 : vector<1x64xf32> to vector<120x64xf32>
    %23 = arith.addf %20, %22 : vector<120x64xf32>
    %cst_17 = arith.constant 0.000000e+00 : f32
    %24 = vector.broadcast %cst_17 : f32 to vector<120x64xf32>
    %25 = arith.cmpf ogt, %23, %24 : vector<120x64xf32>
    %cst_18 = arith.constant 0.000000e+00 : f32
    %26 = vector.broadcast %cst_18 : f32 to vector<120x64xf32>
    %27 = arith.minimumf %23, %26 : vector<120x64xf32>
    %28 = math.exp %27 : vector<120x64xf32>
    %cst_19 = arith.constant 1.000000e+00 : f32
    %29 = vector.broadcast %cst_19 : f32 to vector<120x64xf32>
    %30 = arith.subf %28, %29 : vector<120x64xf32>
    %cst_20 = arith.constant 1.67326319 : f32
    %31 = vector.broadcast %cst_20 : f32 to vector<120x64xf32>
    %32 = arith.mulf %31, %30 : vector<120x64xf32>
    %33 = arith.select %25, %23, %32 : vector<120x64xi1>, vector<120x64xf32>
    %cst_21 = arith.constant 1.05070102 : f32
    %34 = vector.broadcast %cst_21 : f32 to vector<120x64xf32>
    %35 = arith.mulf %34, %33 : vector<120x64xf32>
    %36 = arith.addf %17, %35 : vector<120x64xf32>
    %cst_22 = arith.constant 5.000000e-01 : f32
    %37 = vector.broadcast %cst_22 : f32 to vector<120x64xf32>
    %38 = arith.mulf %37, %36 : vector<120x64xf32>
    %cst_23 = arith.constant 0.000000e+00 : f32
    %39 = vector.broadcast %cst_23 : f32 to vector<112x128xf32>
    %40 = vector.extract_strided_slice %38 {offsets = [0, 0], sizes = [112, 64], strides = [1, 1]} : vector<120x64xf32> to vector<112x64xf32>
    %c0_24 = arith.constant 0 : index
    %c0_25 = arith.constant 0 : index
    %c0_26 = arith.constant 0 : index
    %41 = vector.load %arg4[%c0_24, %c0_25, %c0_26] : memref<9x64x128xf32, #tpu.memory_space<vmem>>, vector<1x64x128xf32>
    %42 = vector.shape_cast %41 : vector<1x64x128xf32> to vector<64x128xf32>
    %cst_27 = arith.constant dense<0.000000e+00> : vector<112x128xf32>
    %43 = tpu.matmul %40, %42, %cst_27 {dimension_numbers = #tpu.dot_dimension_numbers<[1], [0], [0], [1], [0, 0, 1, 1], [], []>} : vector<112x64xf32>, vector<64x128xf32>, vector<112x128xf32> -> vector<112x128xf32>
    %44 = arith.addf %39, %43 : vector<112x128xf32>
    %45 = vector.extract_strided_slice %38 {offsets = [1, 0], sizes = [112, 64], strides = [1, 1]} : vector<120x64xf32> to vector<112x64xf32>
    %c1 = arith.constant 1 : index
    %c0_28 = arith.constant 0 : index
    %c0_29 = arith.constant 0 : index
    %46 = vector.load %arg4[%c1, %c0_28, %c0_29] : memref<9x64x128xf32, #tpu.memory_space<vmem>>, vector<1x64x128xf32>
    %47 = vector.shape_cast %46 : vector<1x64x128xf32> to vector<64x128xf32>
    %cst_30 = arith.constant dense<0.000000e+00> : vector<112x128xf32>
    %48 = tpu.matmul %45, %47, %cst_30 {dimension_numbers = #tpu.dot_dimension_numbers<[1], [0], [0], [1], [0, 0, 1, 1], [], []>} : vector<112x64xf32>, vector<64x128xf32>, vector<112x128xf32> -> vector<112x128xf32>
    %49 = arith.addf %44, %48 : vector<112x128xf32>
    %50 = vector.extract_strided_slice %38 {offsets = [2, 0], sizes = [112, 64], strides = [1, 1]} : vector<120x64xf32> to vector<112x64xf32>
    %c2 = arith.constant 2 : index
    %c0_31 = arith.constant 0 : index
    %c0_32 = arith.constant 0 : index
    %51 = vector.load %arg4[%c2, %c0_31, %c0_32] : memref<9x64x128xf32, #tpu.memory_space<vmem>>, vector<1x64x128xf32>
    %52 = vector.shape_cast %51 : vector<1x64x128xf32> to vector<64x128xf32>
    %cst_33 = arith.constant dense<0.000000e+00> : vector<112x128xf32>
    %53 = tpu.matmul %50, %52, %cst_33 {dimension_numbers = #tpu.dot_dimension_numbers<[1], [0], [0], [1], [0, 0, 1, 1], [], []>} : vector<112x64xf32>, vector<64x128xf32>, vector<112x128xf32> -> vector<112x128xf32>
    %54 = arith.addf %49, %53 : vector<112x128xf32>
    %55 = vector.extract_strided_slice %38 {offsets = [3, 0], sizes = [112, 64], strides = [1, 1]} : vector<120x64xf32> to vector<112x64xf32>
    %c3 = arith.constant 3 : index
    %c0_34 = arith.constant 0 : index
    %c0_35 = arith.constant 0 : index
    %56 = vector.load %arg4[%c3, %c0_34, %c0_35] : memref<9x64x128xf32, #tpu.memory_space<vmem>>, vector<1x64x128xf32>
    %57 = vector.shape_cast %56 : vector<1x64x128xf32> to vector<64x128xf32>
    %cst_36 = arith.constant dense<0.000000e+00> : vector<112x128xf32>
    %58 = tpu.matmul %55, %57, %cst_36 {dimension_numbers = #tpu.dot_dimension_numbers<[1], [0], [0], [1], [0, 0, 1, 1], [], []>} : vector<112x64xf32>, vector<64x128xf32>, vector<112x128xf32> -> vector<112x128xf32>
    %59 = arith.addf %54, %58 : vector<112x128xf32>
    %60 = vector.extract_strided_slice %38 {offsets = [4, 0], sizes = [112, 64], strides = [1, 1]} : vector<120x64xf32> to vector<112x64xf32>
    %c4 = arith.constant 4 : index
    %c0_37 = arith.constant 0 : index
    %c0_38 = arith.constant 0 : index
    %61 = vector.load %arg4[%c4, %c0_37, %c0_38] : memref<9x64x128xf32, #tpu.memory_space<vmem>>, vector<1x64x128xf32>
    %62 = vector.shape_cast %61 : vector<1x64x128xf32> to vector<64x128xf32>
    %cst_39 = arith.constant dense<0.000000e+00> : vector<112x128xf32>
    %63 = tpu.matmul %60, %62, %cst_39 {dimension_numbers = #tpu.dot_dimension_numbers<[1], [0], [0], [1], [0, 0, 1, 1], [], []>} : vector<112x64xf32>, vector<64x128xf32>, vector<112x128xf32> -> vector<112x128xf32>
    %64 = arith.addf %59, %63 : vector<112x128xf32>
    %65 = vector.extract_strided_slice %38 {offsets = [5, 0], sizes = [112, 64], strides = [1, 1]} : vector<120x64xf32> to vector<112x64xf32>
    %c5 = arith.constant 5 : index
    %c0_40 = arith.constant 0 : index
    %c0_41 = arith.constant 0 : index
    %66 = vector.load %arg4[%c5, %c0_40, %c0_41] : memref<9x64x128xf32, #tpu.memory_space<vmem>>, vector<1x64x128xf32>
    %67 = vector.shape_cast %66 : vector<1x64x128xf32> to vector<64x128xf32>
    %cst_42 = arith.constant dense<0.000000e+00> : vector<112x128xf32>
    %68 = tpu.matmul %65, %67, %cst_42 {dimension_numbers = #tpu.dot_dimension_numbers<[1], [0], [0], [1], [0, 0, 1, 1], [], []>} : vector<112x64xf32>, vector<64x128xf32>, vector<112x128xf32> -> vector<112x128xf32>
    %69 = arith.addf %64, %68 : vector<112x128xf32>
    %70 = vector.extract_strided_slice %38 {offsets = [6, 0], sizes = [112, 64], strides = [1, 1]} : vector<120x64xf32> to vector<112x64xf32>
    %c6 = arith.constant 6 : index
    %c0_43 = arith.constant 0 : index
    %c0_44 = arith.constant 0 : index
    %71 = vector.load %arg4[%c6, %c0_43, %c0_44] : memref<9x64x128xf32, #tpu.memory_space<vmem>>, vector<1x64x128xf32>
    %72 = vector.shape_cast %71 : vector<1x64x128xf32> to vector<64x128xf32>
    %cst_45 = arith.constant dense<0.000000e+00> : vector<112x128xf32>
    %73 = tpu.matmul %70, %72, %cst_45 {dimension_numbers = #tpu.dot_dimension_numbers<[1], [0], [0], [1], [0, 0, 1, 1], [], []>} : vector<112x64xf32>, vector<64x128xf32>, vector<112x128xf32> -> vector<112x128xf32>
    %74 = arith.addf %69, %73 : vector<112x128xf32>
    %75 = vector.extract_strided_slice %38 {offsets = [7, 0], sizes = [112, 64], strides = [1, 1]} : vector<120x64xf32> to vector<112x64xf32>
    %c7 = arith.constant 7 : index
    %c0_46 = arith.constant 0 : index
    %c0_47 = arith.constant 0 : index
    %76 = vector.load %arg4[%c7, %c0_46, %c0_47] : memref<9x64x128xf32, #tpu.memory_space<vmem>>, vector<1x64x128xf32>
    %77 = vector.shape_cast %76 : vector<1x64x128xf32> to vector<64x128xf32>
    %cst_48 = arith.constant dense<0.000000e+00> : vector<112x128xf32>
    %78 = tpu.matmul %75, %77, %cst_48 {dimension_numbers = #tpu.dot_dimension_numbers<[1], [0], [0], [1], [0, 0, 1, 1], [], []>} : vector<112x64xf32>, vector<64x128xf32>, vector<112x128xf32> -> vector<112x128xf32>
    %79 = arith.addf %74, %78 : vector<112x128xf32>
    %80 = vector.extract_strided_slice %38 {offsets = [8, 0], sizes = [112, 64], strides = [1, 1]} : vector<120x64xf32> to vector<112x64xf32>
    %c8 = arith.constant 8 : index
    %c0_49 = arith.constant 0 : index
    %c0_50 = arith.constant 0 : index
    %81 = vector.load %arg4[%c8, %c0_49, %c0_50] : memref<9x64x128xf32, #tpu.memory_space<vmem>>, vector<1x64x128xf32>
    %82 = vector.shape_cast %81 : vector<1x64x128xf32> to vector<64x128xf32>
    %cst_51 = arith.constant dense<0.000000e+00> : vector<112x128xf32>
    %83 = tpu.matmul %80, %82, %cst_51 {dimension_numbers = #tpu.dot_dimension_numbers<[1], [0], [0], [1], [0, 0, 1, 1], [], []>} : vector<112x64xf32>, vector<64x128xf32>, vector<112x128xf32> -> vector<112x128xf32>
    %84 = arith.addf %79, %83 : vector<112x128xf32>
    %c0_52 = arith.constant 0 : index
    %c0_53 = arith.constant 0 : index
    %85 = vector.load %arg5[%c0_52, %c0_53] : memref<1x128xf32, #tpu.memory_space<vmem>>, vector<1x128xf32>
    %86 = vector.broadcast %85 : vector<1x128xf32> to vector<112x128xf32>
    %87 = arith.addf %84, %86 : vector<112x128xf32>
    %cst_54 = arith.constant 0.000000e+00 : f32
    %88 = vector.broadcast %cst_54 : f32 to vector<112x128xf32>
    %89 = arith.cmpf ogt, %87, %88 : vector<112x128xf32>
    %cst_55 = arith.constant 0.000000e+00 : f32
    %90 = vector.broadcast %cst_55 : f32 to vector<112x128xf32>
    %91 = arith.minimumf %87, %90 : vector<112x128xf32>
    %92 = math.exp %91 : vector<112x128xf32>
    %cst_56 = arith.constant 1.000000e+00 : f32
    %93 = vector.broadcast %cst_56 : f32 to vector<112x128xf32>
    %94 = arith.subf %92, %93 : vector<112x128xf32>
    %cst_57 = arith.constant 1.67326319 : f32
    %95 = vector.broadcast %cst_57 : f32 to vector<112x128xf32>
    %96 = arith.mulf %95, %94 : vector<112x128xf32>
    %97 = arith.select %89, %87, %96 : vector<112x128xi1>, vector<112x128xf32>
    %cst_58 = arith.constant 1.05070102 : f32
    %98 = vector.broadcast %cst_58 : f32 to vector<112x128xf32>
    %99 = arith.mulf %98, %97 : vector<112x128xf32>
    %c0_59 = arith.constant 0 : index
    %c0_60 = arith.constant 0 : index
    %100 = vector.load %arg6[%c0_59, %c0_60] : memref<52x112xf32, #tpu.memory_space<vmem>>, vector<52x112xf32>
    %cst_61 = arith.constant dense<0.000000e+00> : vector<52x128xf32>
    %101 = tpu.matmul %100, %99, %cst_61 {dimension_numbers = #tpu.dot_dimension_numbers<[1], [0], [0], [1], [0, 0, 1, 1], [], []>} : vector<52x112xf32>, vector<112x128xf32>, vector<52x128xf32> -> vector<52x128xf32>
    %cst_62 = arith.constant 0.000000e+00 : f32
    %102 = vector.broadcast %cst_62 : f32 to vector<44x256xf32>
    %103 = vector.extract_strided_slice %101 {offsets = [0, 0], sizes = [44, 128], strides = [1, 1]} : vector<52x128xf32> to vector<44x128xf32>
    %c0_63 = arith.constant 0 : index
    %c0_64 = arith.constant 0 : index
    %c0_65 = arith.constant 0 : index
    %104 = vector.load %arg7[%c0_63, %c0_64, %c0_65] : memref<9x128x256xf32, #tpu.memory_space<vmem>>, vector<1x128x256xf32>
    %105 = vector.shape_cast %104 : vector<1x128x256xf32> to vector<128x256xf32>
    %cst_66 = arith.constant dense<0.000000e+00> : vector<44x256xf32>
    %106 = tpu.matmul %103, %105, %cst_66 {dimension_numbers = #tpu.dot_dimension_numbers<[1], [0], [0], [1], [0, 0, 1, 1], [], []>} : vector<44x128xf32>, vector<128x256xf32>, vector<44x256xf32> -> vector<44x256xf32>
    %107 = arith.addf %102, %106 : vector<44x256xf32>
    %108 = vector.extract_strided_slice %101 {offsets = [1, 0], sizes = [44, 128], strides = [1, 1]} : vector<52x128xf32> to vector<44x128xf32>
    %c1_67 = arith.constant 1 : index
    %c0_68 = arith.constant 0 : index
    %c0_69 = arith.constant 0 : index
    %109 = vector.load %arg7[%c1_67, %c0_68, %c0_69] : memref<9x128x256xf32, #tpu.memory_space<vmem>>, vector<1x128x256xf32>
    %110 = vector.shape_cast %109 : vector<1x128x256xf32> to vector<128x256xf32>
    %cst_70 = arith.constant dense<0.000000e+00> : vector<44x256xf32>
    %111 = tpu.matmul %108, %110, %cst_70 {dimension_numbers = #tpu.dot_dimension_numbers<[1], [0], [0], [1], [0, 0, 1, 1], [], []>} : vector<44x128xf32>, vector<128x256xf32>, vector<44x256xf32> -> vector<44x256xf32>
    %112 = arith.addf %107, %111 : vector<44x256xf32>
    %113 = vector.extract_strided_slice %101 {offsets = [2, 0], sizes = [44, 128], strides = [1, 1]} : vector<52x128xf32> to vector<44x128xf32>
    %c2_71 = arith.constant 2 : index
    %c0_72 = arith.constant 0 : index
    %c0_73 = arith.constant 0 : index
    %114 = vector.load %arg7[%c2_71, %c0_72, %c0_73] : memref<9x128x256xf32, #tpu.memory_space<vmem>>, vector<1x128x256xf32>
    %115 = vector.shape_cast %114 : vector<1x128x256xf32> to vector<128x256xf32>
    %cst_74 = arith.constant dense<0.000000e+00> : vector<44x256xf32>
    %116 = tpu.matmul %113, %115, %cst_74 {dimension_numbers = #tpu.dot_dimension_numbers<[1], [0], [0], [1], [0, 0, 1, 1], [], []>} : vector<44x128xf32>, vector<128x256xf32>, vector<44x256xf32> -> vector<44x256xf32>
    %117 = arith.addf %112, %116 : vector<44x256xf32>
    %118 = vector.extract_strided_slice %101 {offsets = [3, 0], sizes = [44, 128], strides = [1, 1]} : vector<52x128xf32> to vector<44x128xf32>
    %c3_75 = arith.constant 3 : index
    %c0_76 = arith.constant 0 : index
    %c0_77 = arith.constant 0 : index
    %119 = vector.load %arg7[%c3_75, %c0_76, %c0_77] : memref<9x128x256xf32, #tpu.memory_space<vmem>>, vector<1x128x256xf32>
    %120 = vector.shape_cast %119 : vector<1x128x256xf32> to vector<128x256xf32>
    %cst_78 = arith.constant dense<0.000000e+00> : vector<44x256xf32>
    %121 = tpu.matmul %118, %120, %cst_78 {dimension_numbers = #tpu.dot_dimension_numbers<[1], [0], [0], [1], [0, 0, 1, 1], [], []>} : vector<44x128xf32>, vector<128x256xf32>, vector<44x256xf32> -> vector<44x256xf32>
    %122 = arith.addf %117, %121 : vector<44x256xf32>
    %123 = vector.extract_strided_slice %101 {offsets = [4, 0], sizes = [44, 128], strides = [1, 1]} : vector<52x128xf32> to vector<44x128xf32>
    %c4_79 = arith.constant 4 : index
    %c0_80 = arith.constant 0 : index
    %c0_81 = arith.constant 0 : index
    %124 = vector.load %arg7[%c4_79, %c0_80, %c0_81] : memref<9x128x256xf32, #tpu.memory_space<vmem>>, vector<1x128x256xf32>
    %125 = vector.shape_cast %124 : vector<1x128x256xf32> to vector<128x256xf32>
    %cst_82 = arith.constant dense<0.000000e+00> : vector<44x256xf32>
    %126 = tpu.matmul %123, %125, %cst_82 {dimension_numbers = #tpu.dot_dimension_numbers<[1], [0], [0], [1], [0, 0, 1, 1], [], []>} : vector<44x128xf32>, vector<128x256xf32>, vector<44x256xf32> -> vector<44x256xf32>
    %127 = arith.addf %122, %126 : vector<44x256xf32>
    %128 = vector.extract_strided_slice %101 {offsets = [5, 0], sizes = [44, 128], strides = [1, 1]} : vector<52x128xf32> to vector<44x128xf32>
    %c5_83 = arith.constant 5 : index
    %c0_84 = arith.constant 0 : index
    %c0_85 = arith.constant 0 : index
    %129 = vector.load %arg7[%c5_83, %c0_84, %c0_85] : memref<9x128x256xf32, #tpu.memory_space<vmem>>, vector<1x128x256xf32>
    %130 = vector.shape_cast %129 : vector<1x128x256xf32> to vector<128x256xf32>
    %cst_86 = arith.constant dense<0.000000e+00> : vector<44x256xf32>
    %131 = tpu.matmul %128, %130, %cst_86 {dimension_numbers = #tpu.dot_dimension_numbers<[1], [0], [0], [1], [0, 0, 1, 1], [], []>} : vector<44x128xf32>, vector<128x256xf32>, vector<44x256xf32> -> vector<44x256xf32>
    %132 = arith.addf %127, %131 : vector<44x256xf32>
    %133 = vector.extract_strided_slice %101 {offsets = [6, 0], sizes = [44, 128], strides = [1, 1]} : vector<52x128xf32> to vector<44x128xf32>
    %c6_87 = arith.constant 6 : index
    %c0_88 = arith.constant 0 : index
    %c0_89 = arith.constant 0 : index
    %134 = vector.load %arg7[%c6_87, %c0_88, %c0_89] : memref<9x128x256xf32, #tpu.memory_space<vmem>>, vector<1x128x256xf32>
    %135 = vector.shape_cast %134 : vector<1x128x256xf32> to vector<128x256xf32>
    %cst_90 = arith.constant dense<0.000000e+00> : vector<44x256xf32>
    %136 = tpu.matmul %133, %135, %cst_90 {dimension_numbers = #tpu.dot_dimension_numbers<[1], [0], [0], [1], [0, 0, 1, 1], [], []>} : vector<44x128xf32>, vector<128x256xf32>, vector<44x256xf32> -> vector<44x256xf32>
    %137 = arith.addf %132, %136 : vector<44x256xf32>
    %138 = vector.extract_strided_slice %101 {offsets = [7, 0], sizes = [44, 128], strides = [1, 1]} : vector<52x128xf32> to vector<44x128xf32>
    %c7_91 = arith.constant 7 : index
    %c0_92 = arith.constant 0 : index
    %c0_93 = arith.constant 0 : index
    %139 = vector.load %arg7[%c7_91, %c0_92, %c0_93] : memref<9x128x256xf32, #tpu.memory_space<vmem>>, vector<1x128x256xf32>
    %140 = vector.shape_cast %139 : vector<1x128x256xf32> to vector<128x256xf32>
    %cst_94 = arith.constant dense<0.000000e+00> : vector<44x256xf32>
    %141 = tpu.matmul %138, %140, %cst_94 {dimension_numbers = #tpu.dot_dimension_numbers<[1], [0], [0], [1], [0, 0, 1, 1], [], []>} : vector<44x128xf32>, vector<128x256xf32>, vector<44x256xf32> -> vector<44x256xf32>
    %142 = arith.addf %137, %141 : vector<44x256xf32>
    %143 = vector.extract_strided_slice %101 {offsets = [8, 0], sizes = [44, 128], strides = [1, 1]} : vector<52x128xf32> to vector<44x128xf32>
    %c8_95 = arith.constant 8 : index
    %c0_96 = arith.constant 0 : index
    %c0_97 = arith.constant 0 : index
    %144 = vector.load %arg7[%c8_95, %c0_96, %c0_97] : memref<9x128x256xf32, #tpu.memory_space<vmem>>, vector<1x128x256xf32>
    %145 = vector.shape_cast %144 : vector<1x128x256xf32> to vector<128x256xf32>
    %cst_98 = arith.constant dense<0.000000e+00> : vector<44x256xf32>
    %146 = tpu.matmul %143, %145, %cst_98 {dimension_numbers = #tpu.dot_dimension_numbers<[1], [0], [0], [1], [0, 0, 1, 1], [], []>} : vector<44x128xf32>, vector<128x256xf32>, vector<44x256xf32> -> vector<44x256xf32>
    %147 = arith.addf %142, %146 : vector<44x256xf32>
    %c0_99 = arith.constant 0 : index
    %c0_100 = arith.constant 0 : index
    %148 = vector.load %arg8[%c0_99, %c0_100] : memref<1x256xf32, #tpu.memory_space<vmem>>, vector<1x256xf32>
    %149 = vector.broadcast %148 : vector<1x256xf32> to vector<44x256xf32>
    %150 = arith.addf %147, %149 : vector<44x256xf32>
    %cst_101 = arith.constant 0.000000e+00 : f32
    %151 = vector.broadcast %cst_101 : f32 to vector<44x256xf32>
    %152 = arith.cmpf ogt, %150, %151 : vector<44x256xf32>
    %cst_102 = arith.constant 0.000000e+00 : f32
    %153 = vector.broadcast %cst_102 : f32 to vector<44x256xf32>
    %154 = arith.minimumf %150, %153 : vector<44x256xf32>
    %155 = math.exp %154 : vector<44x256xf32>
    %cst_103 = arith.constant 1.000000e+00 : f32
    %156 = vector.broadcast %cst_103 : f32 to vector<44x256xf32>
    %157 = arith.subf %155, %156 : vector<44x256xf32>
    %cst_104 = arith.constant 1.67326319 : f32
    %158 = vector.broadcast %cst_104 : f32 to vector<44x256xf32>
    %159 = arith.mulf %158, %157 : vector<44x256xf32>
    %160 = arith.select %152, %150, %159 : vector<44x256xi1>, vector<44x256xf32>
    %cst_105 = arith.constant 1.05070102 : f32
    %161 = vector.broadcast %cst_105 : f32 to vector<44x256xf32>
    %162 = arith.mulf %161, %160 : vector<44x256xf32>
    %c0_106 = arith.constant 0 : index
    %c0_107 = arith.constant 0 : index
    %163 = vector.load %arg9[%c0_106, %c0_107] : memref<18x44xf32, #tpu.memory_space<vmem>>, vector<18x44xf32>
    %cst_108 = arith.constant dense<0.000000e+00> : vector<18x256xf32>
    %164 = tpu.matmul %163, %162, %cst_108 {dimension_numbers = #tpu.dot_dimension_numbers<[1], [0], [0], [1], [0, 0, 1, 1], [], []>} : vector<18x44xf32>, vector<44x256xf32>, vector<18x256xf32> -> vector<18x256xf32>
    %cst_109 = arith.constant 0.000000e+00 : f32
    %165 = vector.broadcast %cst_109 : f32 to vector<2x64xf32>
    %166 = vector.extract_strided_slice %164 {offsets = [0, 0], sizes = [2, 256], strides = [1, 1]} : vector<18x256xf32> to vector<2x256xf32>
    %c0_110 = arith.constant 0 : index
    %c0_111 = arith.constant 0 : index
    %c0_112 = arith.constant 0 : index
    %167 = vector.load %arg10[%c0_110, %c0_111, %c0_112] : memref<9x256x64xf32, #tpu.memory_space<vmem>>, vector<1x256x64xf32>
    %168 = vector.shape_cast %167 : vector<1x256x64xf32> to vector<256x64xf32>
    %cst_113 = arith.constant dense<0.000000e+00> : vector<2x64xf32>
    %169 = tpu.matmul %166, %168, %cst_113 {dimension_numbers = #tpu.dot_dimension_numbers<[1], [0], [0], [1], [0, 0, 1, 1], [], []>} : vector<2x256xf32>, vector<256x64xf32>, vector<2x64xf32> -> vector<2x64xf32>
    %170 = arith.addf %165, %169 : vector<2x64xf32>
    %171 = vector.extract_strided_slice %164 {offsets = [2, 0], sizes = [2, 256], strides = [1, 1]} : vector<18x256xf32> to vector<2x256xf32>
    %c1_114 = arith.constant 1 : index
    %c0_115 = arith.constant 0 : index
    %c0_116 = arith.constant 0 : index
    %172 = vector.load %arg10[%c1_114, %c0_115, %c0_116] : memref<9x256x64xf32, #tpu.memory_space<vmem>>, vector<1x256x64xf32>
    %173 = vector.shape_cast %172 : vector<1x256x64xf32> to vector<256x64xf32>
    %cst_117 = arith.constant dense<0.000000e+00> : vector<2x64xf32>
    %174 = tpu.matmul %171, %173, %cst_117 {dimension_numbers = #tpu.dot_dimension_numbers<[1], [0], [0], [1], [0, 0, 1, 1], [], []>} : vector<2x256xf32>, vector<256x64xf32>, vector<2x64xf32> -> vector<2x64xf32>
    %175 = arith.addf %170, %174 : vector<2x64xf32>
    %176 = vector.extract_strided_slice %164 {offsets = [4, 0], sizes = [2, 256], strides = [1, 1]} : vector<18x256xf32> to vector<2x256xf32>
    %c2_118 = arith.constant 2 : index
    %c0_119 = arith.constant 0 : index
    %c0_120 = arith.constant 0 : index
    %177 = vector.load %arg10[%c2_118, %c0_119, %c0_120] : memref<9x256x64xf32, #tpu.memory_space<vmem>>, vector<1x256x64xf32>
    %178 = vector.shape_cast %177 : vector<1x256x64xf32> to vector<256x64xf32>
    %cst_121 = arith.constant dense<0.000000e+00> : vector<2x64xf32>
    %179 = tpu.matmul %176, %178, %cst_121 {dimension_numbers = #tpu.dot_dimension_numbers<[1], [0], [0], [1], [0, 0, 1, 1], [], []>} : vector<2x256xf32>, vector<256x64xf32>, vector<2x64xf32> -> vector<2x64xf32>
    %180 = arith.addf %175, %179 : vector<2x64xf32>
    %181 = vector.extract_strided_slice %164 {offsets = [6, 0], sizes = [2, 256], strides = [1, 1]} : vector<18x256xf32> to vector<2x256xf32>
    %c3_122 = arith.constant 3 : index
    %c0_123 = arith.constant 0 : index
    %c0_124 = arith.constant 0 : index
    %182 = vector.load %arg10[%c3_122, %c0_123, %c0_124] : memref<9x256x64xf32, #tpu.memory_space<vmem>>, vector<1x256x64xf32>
    %183 = vector.shape_cast %182 : vector<1x256x64xf32> to vector<256x64xf32>
    %cst_125 = arith.constant dense<0.000000e+00> : vector<2x64xf32>
    %184 = tpu.matmul %181, %183, %cst_125 {dimension_numbers = #tpu.dot_dimension_numbers<[1], [0], [0], [1], [0, 0, 1, 1], [], []>} : vector<2x256xf32>, vector<256x64xf32>, vector<2x64xf32> -> vector<2x64xf32>
    %185 = arith.addf %180, %184 : vector<2x64xf32>
    %186 = vector.extract_strided_slice %164 {offsets = [8, 0], sizes = [2, 256], strides = [1, 1]} : vector<18x256xf32> to vector<2x256xf32>
    %c4_126 = arith.constant 4 : index
    %c0_127 = arith.constant 0 : index
    %c0_128 = arith.constant 0 : index
    %187 = vector.load %arg10[%c4_126, %c0_127, %c0_128] : memref<9x256x64xf32, #tpu.memory_space<vmem>>, vector<1x256x64xf32>
    %188 = vector.shape_cast %187 : vector<1x256x64xf32> to vector<256x64xf32>
    %cst_129 = arith.constant dense<0.000000e+00> : vector<2x64xf32>
    %189 = tpu.matmul %186, %188, %cst_129 {dimension_numbers = #tpu.dot_dimension_numbers<[1], [0], [0], [1], [0, 0, 1, 1], [], []>} : vector<2x256xf32>, vector<256x64xf32>, vector<2x64xf32> -> vector<2x64xf32>
    %190 = arith.addf %185, %189 : vector<2x64xf32>
    %191 = vector.extract_strided_slice %164 {offsets = [10, 0], sizes = [2, 256], strides = [1, 1]} : vector<18x256xf32> to vector<2x256xf32>
    %c5_130 = arith.constant 5 : index
    %c0_131 = arith.constant 0 : index
    %c0_132 = arith.constant 0 : index
    %192 = vector.load %arg10[%c5_130, %c0_131, %c0_132] : memref<9x256x64xf32, #tpu.memory_space<vmem>>, vector<1x256x64xf32>
    %193 = vector.shape_cast %192 : vector<1x256x64xf32> to vector<256x64xf32>
    %cst_133 = arith.constant dense<0.000000e+00> : vector<2x64xf32>
    %194 = tpu.matmul %191, %193, %cst_133 {dimension_numbers = #tpu.dot_dimension_numbers<[1], [0], [0], [1], [0, 0, 1, 1], [], []>} : vector<2x256xf32>, vector<256x64xf32>, vector<2x64xf32> -> vector<2x64xf32>
    %195 = arith.addf %190, %194 : vector<2x64xf32>
    %196 = vector.extract_strided_slice %164 {offsets = [12, 0], sizes = [2, 256], strides = [1, 1]} : vector<18x256xf32> to vector<2x256xf32>
    %c6_134 = arith.constant 6 : index
    %c0_135 = arith.constant 0 : index
    %c0_136 = arith.constant 0 : index
    %197 = vector.load %arg10[%c6_134, %c0_135, %c0_136] : memref<9x256x64xf32, #tpu.memory_space<vmem>>, vector<1x256x64xf32>
    %198 = vector.shape_cast %197 : vector<1x256x64xf32> to vector<256x64xf32>
    %cst_137 = arith.constant dense<0.000000e+00> : vector<2x64xf32>
    %199 = tpu.matmul %196, %198, %cst_137 {dimension_numbers = #tpu.dot_dimension_numbers<[1], [0], [0], [1], [0, 0, 1, 1], [], []>} : vector<2x256xf32>, vector<256x64xf32>, vector<2x64xf32> -> vector<2x64xf32>
    %200 = arith.addf %195, %199 : vector<2x64xf32>
    %201 = vector.extract_strided_slice %164 {offsets = [14, 0], sizes = [2, 256], strides = [1, 1]} : vector<18x256xf32> to vector<2x256xf32>
    %c7_138 = arith.constant 7 : index
    %c0_139 = arith.constant 0 : index
    %c0_140 = arith.constant 0 : index
    %202 = vector.load %arg10[%c7_138, %c0_139, %c0_140] : memref<9x256x64xf32, #tpu.memory_space<vmem>>, vector<1x256x64xf32>
    %203 = vector.shape_cast %202 : vector<1x256x64xf32> to vector<256x64xf32>
    %cst_141 = arith.constant dense<0.000000e+00> : vector<2x64xf32>
    %204 = tpu.matmul %201, %203, %cst_141 {dimension_numbers = #tpu.dot_dimension_numbers<[1], [0], [0], [1], [0, 0, 1, 1], [], []>} : vector<2x256xf32>, vector<256x64xf32>, vector<2x64xf32> -> vector<2x64xf32>
    %205 = arith.addf %200, %204 : vector<2x64xf32>
    %206 = vector.extract_strided_slice %164 {offsets = [16, 0], sizes = [2, 256], strides = [1, 1]} : vector<18x256xf32> to vector<2x256xf32>
    %c8_142 = arith.constant 8 : index
    %c0_143 = arith.constant 0 : index
    %c0_144 = arith.constant 0 : index
    %207 = vector.load %arg10[%c8_142, %c0_143, %c0_144] : memref<9x256x64xf32, #tpu.memory_space<vmem>>, vector<1x256x64xf32>
    %208 = vector.shape_cast %207 : vector<1x256x64xf32> to vector<256x64xf32>
    %cst_145 = arith.constant dense<0.000000e+00> : vector<2x64xf32>
    %209 = tpu.matmul %206, %208, %cst_145 {dimension_numbers = #tpu.dot_dimension_numbers<[1], [0], [0], [1], [0, 0, 1, 1], [], []>} : vector<2x256xf32>, vector<256x64xf32>, vector<2x64xf32> -> vector<2x64xf32>
    %210 = arith.addf %205, %209 : vector<2x64xf32>
    %c0_146 = arith.constant 0 : index
    %c0_147 = arith.constant 0 : index
    %211 = vector.load %arg11[%c0_146, %c0_147] : memref<1x64xf32, #tpu.memory_space<vmem>>, vector<1x64xf32>
    %212 = vector.broadcast %211 : vector<1x64xf32> to vector<2x64xf32>
    %213 = arith.addf %210, %212 : vector<2x64xf32>
    %cst_148 = arith.constant 0.000000e+00 : f32
    %214 = vector.broadcast %cst_148 : f32 to vector<2x64xf32>
    %215 = arith.cmpf ogt, %213, %214 : vector<2x64xf32>
    %cst_149 = arith.constant 0.000000e+00 : f32
    %216 = vector.broadcast %cst_149 : f32 to vector<2x64xf32>
    %217 = arith.minimumf %213, %216 : vector<2x64xf32>
    %218 = math.exp %217 : vector<2x64xf32>
    %cst_150 = arith.constant 1.000000e+00 : f32
    %219 = vector.broadcast %cst_150 : f32 to vector<2x64xf32>
    %220 = arith.subf %218, %219 : vector<2x64xf32>
    %cst_151 = arith.constant 1.67326319 : f32
    %221 = vector.broadcast %cst_151 : f32 to vector<2x64xf32>
    %222 = arith.mulf %221, %220 : vector<2x64xf32>
    %223 = arith.select %215, %213, %222 : vector<2x64xi1>, vector<2x64xf32>
    %cst_152 = arith.constant 1.05070102 : f32
    %224 = vector.broadcast %cst_152 : f32 to vector<2x64xf32>
    %225 = arith.mulf %224, %223 : vector<2x64xf32>
    %c0_153 = arith.constant 0 : index
    %c0_154 = arith.constant 0 : index
    %226 = vector.load %arg12[%c0_153, %c0_154] : memref<64x512xf32, #tpu.memory_space<vmem>>, vector<64x512xf32>
    %cst_155 = arith.constant dense<0.000000e+00> : vector<2x512xf32>
    %227 = tpu.matmul %225, %226, %cst_155 {dimension_numbers = #tpu.dot_dimension_numbers<[1], [0], [0], [1], [0, 0, 1, 1], [], []>} : vector<2x64xf32>, vector<64x512xf32>, vector<2x512xf32> -> vector<2x512xf32>
    %c0_156 = arith.constant 0 : index
    %c0_157 = arith.constant 0 : index
    %228 = vector.load %arg14[%c0_156, %c0_157] : memref<4x2xf32, #tpu.memory_space<vmem>>, vector<4x2xf32>
    %cst_158 = arith.constant dense<0.000000e+00> : vector<4x512xf32>
    %229 = tpu.matmul %228, %227, %cst_158 {dimension_numbers = #tpu.dot_dimension_numbers<[1], [0], [0], [1], [0, 0, 1, 1], [], []>} : vector<4x2xf32>, vector<2x512xf32>, vector<4x512xf32> -> vector<4x512xf32>
    %230 = math.absf %229 : vector<4x512xf32>
    %c0_159 = arith.constant 0 : index
    %c0_160 = arith.constant 0 : index
    %231 = vector.load %arg13[%c0_159, %c0_160] : memref<512x32xf32, #tpu.memory_space<vmem>>, vector<512x32xf32>
    %cst_161 = arith.constant dense<0.000000e+00> : vector<4x32xf32>
    %232 = tpu.matmul %230, %231, %cst_161 {dimension_numbers = #tpu.dot_dimension_numbers<[1], [0], [0], [1], [0, 0, 1, 1], [], []>} : vector<4x512xf32>, vector<512x32xf32>, vector<4x32xf32> -> vector<4x32xf32>
    %cst_162 = arith.constant 0.000000e+00 : f32
    %233 = vector.broadcast %cst_162 : f32 to vector<4x32xf32>
    %234 = arith.subf %233, %232 : vector<4x32xf32>
    %235 = math.exp %234 : vector<4x32xf32>
    %c0_163 = arith.constant 0 : index
    %c0_164 = arith.constant 0 : index
    %236 = vector.load %arg15[%c0_163, %c0_164] : memref<2x4xf32, #tpu.memory_space<vmem>>, vector<2x4xf32>
    %cst_165 = arith.constant dense<0.000000e+00> : vector<2x32xf32>
    %237 = tpu.matmul %236, %235, %cst_165 {dimension_numbers = #tpu.dot_dimension_numbers<[1], [0], [0], [1], [0, 0, 1, 1], [], []>} : vector<2x4xf32>, vector<4x32xf32>, vector<2x32xf32> -> vector<2x32xf32>
    %cst_166 = arith.constant 1.000000e+00 : f32
    %238 = vector.broadcast %cst_166 : f32 to vector<2x32xf32>
    %239 = arith.subf %237, %238 : vector<2x32xf32>
    %c0_167 = arith.constant 0 : index
    %c0_168 = arith.constant 0 : index
    %240 = vector.load %arg16[%c0_167, %c0_168] : memref<64x1xf32, #tpu.memory_space<vmem>>, vector<64x1xf32>
    %cst_169 = arith.constant dense<0.000000e+00> : vector<2x1xf32>
    %241 = tpu.matmul %225, %240, %cst_169 {dimension_numbers = #tpu.dot_dimension_numbers<[1], [0], [0], [1], [0, 0, 1, 1], [], []>} : vector<2x64xf32>, vector<64x1xf32>, vector<2x1xf32> -> vector<2x1xf32>
    %c0_170 = arith.constant 0 : index
    %c0_171 = arith.constant 0 : index
    %242 = vector.load %arg17[%c0_170, %c0_171] : memref<32x1xf32, #tpu.memory_space<vmem>>, vector<32x1xf32>
    %cst_172 = arith.constant dense<0.000000e+00> : vector<2x1xf32>
    %243 = tpu.matmul %239, %242, %cst_172 {dimension_numbers = #tpu.dot_dimension_numbers<[1], [0], [0], [1], [0, 0, 1, 1], [], []>} : vector<2x32xf32>, vector<32x1xf32>, vector<2x1xf32> -> vector<2x1xf32>
    %244 = arith.addf %241, %243 : vector<2x1xf32>
    %c0_173 = arith.constant 0 : index
    %c0_174 = arith.constant 0 : index
    %245 = vector.load %arg18[%c0_173, %c0_174] : memref<1x1xf32, #tpu.memory_space<vmem>>, vector<1x1xf32>
    %246 = vector.broadcast %245 : vector<1x1xf32> to vector<2x1xf32>
    %247 = arith.addf %244, %246 : vector<2x1xf32>
    %c0_175 = arith.constant 0 : index
    %c0_176 = arith.constant 0 : index
    %248 = vector.load %arg19[%c0_175, %c0_176] : memref<2x1xf32, #tpu.memory_space<vmem>>, vector<2x1xf32>
    tpu.vector_store %arg19[%c0_175, %c0_176], %247 {strides = array<i32>} : memref<2x1xf32, #tpu.memory_space<vmem>>, vector<2x1xf32>,
    return
  }
}

</mosaic_0001>

<bundles_post_ra>
// kernel: discriminator_forward.1
= control target key start
LH: loop header
LB: loop body
LE: loop exit
PB: predicated region body
PF: predicated region fallthrough
CT: control target
= control target key end

     0   :  { %vm133_vm0 = vcmask 1042432   ;;  %vm87_vm1 = vcmask 220160   ;;  %vm653_vm4 = vcmask 523264   ;;  %vm623_vm7 = vcmask 1046528   ;;  %s9332_s2 = inlined_call_operand.vmem [shape: f32[27,64], index: 2, kind: input, shape index: {}]   ;;  %s9333_s0 = inlined_call_operand.vmem [shape: f32[120,27], index: 0, kind: input, shape index: {}]   ;;  %s9334_s1 = inlined_call_operand.vmem [shape: f32[120,27], index: 1, kind: input, shape index: {}]   ;;  %s9335_s3 = inlined_call_operand.vmem [shape: f32[1,64], index: 3, kind: input, shape index: {}]   ;;  %s9336_s4 = inlined_call_operand.vmem [shape: f32[9,64,128], index: 4, kind: input, shape index: {}]   ;;  %s9337_s5 = inlined_call_operand.vmem [shape: f32[1,128], index: 5, kind: input, shape index: {}]   ;;  %s9338_s6 = inlined_call_operand.vmem [shape: f32[52,112], index: 6, kind: input, shape index: {}]   ;;  %s9339_s7 = inlined_call_operand.vmem [shape: f32[9,128,256], index: 7, kind: input, shape index: {}]   ;;  %s9340_s8 = inlined_call_operand.vmem [shape: f32[1,256], index: 8, kind: input, shape index: {}]   ;;  %s9341_s9 = inlined_call_operand.vmem [shape: f32[18,44], index: 9, kind: input, shape index: {}]   ;;  %s9342_s10 = inlined_call_operand.vmem [shape: f32[9,256,64], index: 10, kind: input, shape index: {}]   ;;  %s9343_s11 = inlined_call_operand.vmem [shape: f32[1,64], index: 11, kind: input, shape index: {}]   ;;  %s9344_s12 = inlined_call_operand.vmem [shape: f32[64,512], index: 12, kind: input, shape index: {}]   ;;  %s9345_s13 = inlined_call_operand.vmem [shape: f32[512,32], index: 13, kind: input, shape index: {}]   ;;  %s9346_s14 = inlined_call_operand.vmem [shape: f32[4,2], index: 14, kind: input, shape index: {}]   ;;  %s9347_s16 = inlined_call_operand.vmem [shape: f32[64,1], index: 16, kind: input, shape index: {}]   ;;  %s9348_s17 = inlined_call_operand.vmem [shape: f32[32,1], index: 17, kind: input, shape index: {}]   ;;  %s9349_s15 = inlined_call_operand.vmem [shape: f32[2,4], index: 15, kind: input, shape index: {}]   ;;  %s9350_s18 = inlined_call_operand.<no memory space> [shape: f32[1,1], index: 18, kind: input, shape index: {}]   ;;  %s9351_s19 = inlined_call_operand.vmem [shape: f32[2,1], index: 19, kind: output, shape index: {}]  }
   0x1   :  { %9355 = sst [smem:[#allocation43_spill]] %s9332_s2  ;;  %v598_v32 = vld [vmem:[%s9336_s4 + $0x38] sm:$0xff]  ;;  %v597_v33 = vld [vmem:[%s9336_s4 + $0x30] sm:$0xff]  ;;  %v596_v34 = vld [vmem:[%s9336_s4 + $0x28] sm:$0xff]  ;;  %vm837_vm8 = vcmask 1045504   ;;  %vm977_vm9 = vcmask 1044480  }
   0x2   :  { %9356 = sst [smem:[#allocation44_spill]] %s9333_s0  ;;  %777 = vmatpush.msra.mxu3 %v598_v32  ;;  %v595_v37 = vld [vmem:[%s9336_s4 + $0x20] sm:$0xff]  ;;  %v594_v38 = vld [vmem:[%s9336_s4 + $0x18] sm:$0xff]  ;;  %v593_v39 = vld [vmem:[%s9336_s4 + $0x10] sm:$0xff] }
   0x3   :  { %9357 = sst [smem:[#allocation45_spill]] %s9334_s1  ;;  %v4507_v40 = vld [vmem:[%s9336_s4 + $0x78] sm:$0xff]  ;;  %v592_v43 = vld [vmem:[%s9336_s4 + $0x8] sm:$0xff]  ;;  %v4506_v44 = vld [vmem:[%s9336_s4 + $0x70] sm:$0xff] }
   0x4   :  { %9358 = sst [smem:[#allocation46_spill]] %s9335_s3  ;;  %778 = vmatpush.msra.mxu3 %v597_v33  ;;  %v4543_v41 = vld [vmem:[%s9336_s4 + $0xb8] sm:$0xff]  ;;  %690 = vmatpush.msra.mxu2 %v4507_v40  ;;  %v4542_v45 = vld [vmem:[%s9336_s4 + $0xb0] sm:$0xff]  ;;  %v591_v47 = vld [vmem:[%s9336_s4] sm:$0xff] }
   0x5   :  { %s9359_s20 = sld [smem:[#allocation43_spill]]  ;;  %v4565_v42 = vld [vmem:[%s9336_s4 + $0xf8] sm:$0xff]  ;;  %v4564_v46 = vld [vmem:[%s9336_s4 + $0xf0] sm:$0xff]  ;;  %v4505_v48 = vld [vmem:[%s9336_s4 + $0x68] sm:$0xff] }
   0x6   :  { %s9360_s26 = sld [smem:[#allocation44_spill]]  ;;  %779 = vmatpush.msra.mxu3 %v596_v34  ;;  %691 = vmatpush.msra.mxu2 %v4506_v44  ;;  %v4541_v49 = vld [vmem:[%s9336_s4 + $0xa8] sm:$0xff]  ;;  %v4504_v51 = vld [vmem:[%s9336_s4 + $0x60] sm:$0xff]  ;;  %v4503_v55 = vld [vmem:[%s9336_s4 + $0x58] sm:$0xff] }
   0x7   :  { %s9361_s29 = sld [smem:[#allocation45_spill]]  ;;  %v4563_v50 = vld [vmem:[%s9336_s4 + $0xe8] sm:$0xff]  ;;  %v4540_v52 = vld [vmem:[%s9336_s4 + $0xa0] sm:$0xff]  ;;  %v4539_v56 = vld [vmem:[%s9336_s4 + $0x98] sm:$0xff] }
   0x8   :  { %780 = vmatpush.msra.mxu3 %v595_v37  ;;  %692 = vmatpush.msra.mxu2 %v4505_v48  ;;  %v4562_v53 = vld [vmem:[%s9336_s4 + $0xe0] sm:$0xff]  ;;  %v4561_v57 = vld [vmem:[%s9336_s4 + $0xd8] sm:$0xff]  ;;  %v4502_v58 = vld [vmem:[%s9336_s4 + $0x50] sm:$0xff] }
   0x9   :  { %v4538_v59 = vld [vmem:[%s9336_s4 + $0x90] sm:$0xff] }
   0xa   :  { %781 = vmatpush.msra.mxu3 %v594_v38  ;;  %693 = vmatpush.msra.mxu2 %v4504_v51  ;;  %v4560_v60 = vld [vmem:[%s9336_s4 + $0xd0] sm:$0xff] }
   0xb   :  { %v82_v0 = vld [vmem:[%s9359_s20 + $0x18] sm:$0x7]  ;;  %v81_v1 = vld [vmem:[%s9359_s20 + $0x10] sm:$0xff]  ;;  %v80_v2 = vld [vmem:[%s9359_s20 + $0x8] sm:$0xff] }
   0xc   :  { %4438 = vmatpush.msk.msra.mxu0 %vm133_vm0, %v82_v0  ;;  %4469 = vmatpush.msk.msra.mxu1 %vm133_vm0, %v82_v0  ;;  %v79_v3 = vld [vmem:[%s9359_s20] sm:$0xff]  ;;  %v65_v6 = vld [vmem:[%s9360_s26 + $0x8] sm:$0xff]  ;;  %v66_v8 = vld [vmem:[%s9360_s26 + $0x10] sm:$0xff] }
   0xd   :  { %v64_v4 = vld [vmem:[%s9360_s26] sm:$0xff]  ;;  %v320_v7 = vld [vmem:[%s9361_s29 + $0x8] sm:$0xff]  ;;  %v321_v9 = vld [vmem:[%s9361_s29 + $0x10] sm:$0xff]  ;;  %782 = vmatpush.msra.mxu3 %v593_v39  ;;  %694 = vmatpush.msra.mxu2 %v4503_v55 }
   0xe   :  { %150 = vmatpush.msra.mxu0 %v81_v1  ;;  %392 = vmatpush.msra.mxu1 %v81_v1  ;;  %v319_v5 = vld [vmem:[%s9361_s29] sm:$0xff]  ;;  %v67_v10 = vld [vmem:[%s9360_s26 + $0x18] sm:$0xff]  ;;  %v69_v14 = vld [vmem:[%s9360_s26 + $0x28] sm:$0xff] }
   0xf   :  { %v322_v11 = vld [vmem:[%s9361_s29 + $0x18] sm:$0xff]  ;;  %v68_v12 = vld [vmem:[%s9360_s26 + $0x20] sm:$0xff]  ;;  %v324_v15 = vld [vmem:[%s9361_s29 + $0x28] sm:$0xff]  ;;  %783 = vmatpush.msra.mxu3 %v592_v43  ;;  %695 = vmatpush.msra.mxu2 %v4502_v58 }
  0x10   :  { %151 = vmatpush.msra.mxu0 %v80_v2  ;;  %393 = vmatpush.msra.mxu1 %v80_v2  ;;  %v323_v13 = vld [vmem:[%s9361_s29 + $0x20] sm:$0xff]  ;;  %v70_v16 = vld [vmem:[%s9360_s26 + $0x30] sm:$0xff]  ;;  %v71_v18 = vld [vmem:[%s9360_s26 + $0x38] sm:$0xff] }
  0x11   :  { %v325_v17 = vld [vmem:[%s9361_s29 + $0x30] sm:$0xff]  ;;  %v326_v19 = vld [vmem:[%s9361_s29 + $0x38] sm:$0xff]  ;;  %v72_v20 = vld [vmem:[%s9360_s26 + $0x40] sm:$0xff]  ;;  %784 = vmatpush.msra.mxu3 %v591_v47 }
  0x12   :  { %152 = vmatpush.msra.mxu0 %v79_v3  ;;  %394 = vmatpush.msra.mxu1 %v79_v3  ;;  %v327_v21 = vld [vmem:[%s9361_s29 + $0x40] sm:$0xff]  ;;  %v73_v22 = vld [vmem:[%s9360_s26 + $0x48] sm:$0xff]  ;;  %v74_v24 = vld [vmem:[%s9360_s26 + $0x50] sm:$0xff] }
  0x13   :  { %4439 = vmatmul.msk.f32.vlgmr.msra.gmra.mxu0 %vm87_vm1, %v64_v4  ;;  %4470 = vmatmul.msk.f32.vlgmr.msra.gmra.mxu1 %vm87_vm1, %v319_v5  ;;  %v328_v23 = vld [vmem:[%s9361_s29 + $0x48] sm:$0xff]  ;;  %v329_v25 = vld [vmem:[%s9361_s29 + $0x50] sm:$0xff]  ;;  %v75_v26 = vld [vmem:[%s9360_s26 + $0x58] sm:$0xff] }
  0x14   :  { %v330_v27 = vld [vmem:[%s9361_s29 + $0x58] sm:$0xff]  ;;  %v76_v28 = vld [vmem:[%s9360_s26 + $0x60] sm:$0xff]  ;;  %v77_v30 = vld [vmem:[%s9360_s26 + $0x68] sm:$0xff]  ;;  %903 = vmatpush.msrb.mxu0 %v4543_v41  ;;  %1043 = vmatpush.msrb.mxu1 %v4565_v42 }
  0x15   :  { %v331_v29 = vld [vmem:[%s9361_s29 + $0x60] sm:$0xff]  ;;  %v332_v31 = vld [vmem:[%s9361_s29 + $0x68] sm:$0xff]  ;;  %v78_v35 = vld [vmem:[%s9360_s26 + $0x70] sm:$0xff] }
  0x16   :  { %v333_v36 = vld [vmem:[%s9361_s29 + $0x70] sm:$0xff]  ;;  %904 = vmatpush.msrb.mxu0 %v4542_v45  ;;  %1044 = vmatpush.msrb.mxu1 %v4564_v46  ;;  %s9362_s29 = sld [smem:[#allocation46_spill]]  ;;  %v4501_v1 = vld [vmem:[%s9336_s4 + $0x48] sm:$0xff] }
  0x17   :  { %v4537_v2 = vld [vmem:[%s9336_s4 + $0x88] sm:$0xff]  ;;  %696 = vmatpush.msra.mxu2 %v4501_v1 }
  0x18   :  { %905 = vmatpush.msrb.mxu0 %v4541_v49  ;;  %1045 = vmatpush.msrb.mxu1 %v4563_v50  ;;  %v4559_v3 = vld [vmem:[%s9336_s4 + $0xc8] sm:$0xff] }
  0x1a   :  { %906 = vmatpush.msrb.mxu0 %v4540_v52  ;;  %1046 = vmatpush.msrb.mxu1 %v4562_v53 }
  0x1b   :  { %4440 = vmatmul.msk.f32.gmra.mxu0 %vm87_vm1, %v65_v6  ;;  %4471 = vmatmul.msk.f32.gmra.mxu1 %vm87_vm1, %v320_v7  ;;  %v4500_v6 = vld [vmem:[%s9336_s4 + $0x40] sm:$0xff] }
  0x1c   :  { %v5678_v54 = vld [vmem:[%s9362_s29] ss:$0 sm:$0xff]  ;;  %907 = vmatpush.msrb.mxu0 %v4539_v56  ;;  %1047 = vmatpush.msrb.mxu1 %v4561_v57 }
  0x1d   :  { %v4536_v7 = vld [vmem:[%s9336_s4 + $0x80] sm:$0xff]  ;;  %697 = vmatpush.msra.mxu2 %v4500_v6 }
  0x1e   :  { %908 = vmatpush.msrb.mxu0 %v4538_v59  ;;  %1048 = vmatpush.msrb.mxu1 %v4560_v60 }
  0x20   :  { %909 = vmatpush.msrb.mxu0 %v4537_v2  ;;  %1049 = vmatpush.msrb.mxu1 %v4559_v3 }
  0x22   :  { %910 = vmatpush.msrb.mxu0 %v4536_v7 }
  0x23   :  { %4441 = vmatmul.msk.f32.gmra.mxu0 %vm87_vm1, %v66_v8  ;;  %4472 = vmatmul.msk.f32.gmra.mxu1 %vm87_vm1, %v321_v9  ;;  %v4558_v8 = vld [vmem:[%s9336_s4 + $0xc0] sm:$0xff] }
  0x24   :  { %1050 = vmatpush.msrb.mxu1 %v4558_v8 }
  0x2b   :  { %4442 = vmatmul.msk.f32.gmra.mxu0 %vm87_vm1, %v67_v10  ;;  %4473 = vmatmul.msk.f32.gmra.mxu1 %vm87_vm1, %v322_v11 }
  0x33   :  { %4443 = vmatmul.msk.f32.gmra.mxu0 %vm87_vm1, %v68_v12  ;;  %4474 = vmatmul.msk.f32.gmra.mxu1 %vm87_vm1, %v323_v13 }
  0x3b   :  { %4444 = vmatmul.msk.f32.gmra.mxu0 %vm87_vm1, %v69_v14  ;;  %4475 = vmatmul.msk.f32.gmra.mxu1 %vm87_vm1, %v324_v15 }
  0x43   :  { %4445 = vmatmul.msk.f32.gmra.mxu0 %vm87_vm1, %v70_v16  ;;  %4476 = vmatmul.msk.f32.gmra.mxu1 %vm87_vm1, %v325_v17 }
  0x4b   :  { %4446 = vmatmul.msk.f32.gmra.mxu0 %vm87_vm1, %v71_v18  ;;  %4477 = vmatmul.msk.f32.gmra.mxu1 %vm87_vm1, %v326_v19 }
  0x53   :  { %4447 = vmatmul.msk.f32.gmra.mxu0 %vm87_vm1, %v72_v20  ;;  %4478 = vmatmul.msk.f32.gmra.mxu1 %vm87_vm1, %v327_v21 }
  0x5b   :  { %4448 = vmatmul.msk.f32.gmra.mxu0 %vm87_vm1, %v73_v22  ;;  %4479 = vmatmul.msk.f32.gmra.mxu1 %vm87_vm1, %v328_v23 }
  0x63   :  { %4449 = vmatmul.msk.f32.gmra.mxu0 %vm87_vm1, %v74_v24  ;;  %4480 = vmatmul.msk.f32.gmra.mxu1 %vm87_vm1, %v329_v25 }
  0x6b   :  { %4450 = vmatmul.msk.f32.gmra.mxu0 %vm87_vm1, %v75_v26  ;;  %4481 = vmatmul.msk.f32.gmra.mxu1 %vm87_vm1, %v330_v27 }
  0x73   :  { %4451 = vmatmul.msk.f32.gmra.mxu0 %vm87_vm1, %v76_v28  ;;  %4482 = vmatmul.msk.f32.gmra.mxu1 %vm87_vm1, %v331_v29 }
  0x7b   :  { %4452 = vmatmul.msk.f32.gmra.mxu0 %vm87_vm1, %v77_v30  ;;  %4483 = vmatmul.msk.f32.gmra.mxu1 %vm87_vm1, %v332_v31 }
  0x83   :  { %4453 = vmatmul.msk.f32.gmra.mxu0 %vm87_vm1, %v78_v35  ;;  %4484 = vmatmul.msk.f32.gmra.mxu1 %vm87_vm1, %v333_v36 }
  0x90   :  { %v154_v61 = vpop.f32.mrf.mxu0  ;;  %v396_v62 = vpop.f32.mrf.mxu1 }
  0x91   :  { %v155_v63 = vadd.f32 %v5678_v54, %v154_v61  ;;  %v397_v0 = vadd.f32 %v5678_v54, %v396_v62 }
  0x93   :  { %v214_v4 = vmin.f32 %v155_v63, 0.0  ;;  %v456_v5 = vmin.f32 %v397_v0, 0.0  ;;  %vm199_vm2 = vcmp.gt.f32.partialorder %v155_v63, 0.0  ;;  %vm441_vm3 = vcmp.gt.f32.partialorder %v397_v0, 0.0 }
  0x95   :  { %v229_v9 = vmul.f32 1.442695, %v214_v4  ;;  %v471_v10 = vmul.f32 1.442695, %v456_v5 }
  0x97   :  { %5265 = vpow2.f32 %v229_v9 }
  0x98   :  { %5267 = vpow2.f32 %v471_v10  ;;  %v157_v11 = vpop.f32.mrf.mxu0  ;;  %v399_v12 = vpop.f32.mrf.mxu1 }
  0x99   :  { %v158_v13 = vadd.f32 %v5678_v54, %v157_v11  ;;  %v400_v14 = vadd.f32 %v5678_v54, %v399_v12 }
  0x9b   :  { %v215_v15 = vmin.f32 %v158_v13, 0.0  ;;  %v457_v16 = vmin.f32 %v400_v14, 0.0  ;;  %vm200_vm5 = vcmp.gt.f32.partialorder %v158_v13, 0.0  ;;  %vm442_vm6 = vcmp.gt.f32.partialorder %v400_v14, 0.0 }
  0x9d   :  { %v5266_v17 = vpop.eup %5265  ;;  %v231_v18 = vmul.f32 1.442695, %v215_v15  ;;  %v473_v19 = vmul.f32 1.442695, %v457_v16 }
  0x9e   :  { %v5268_v20 = vpop.eup %5267  ;;  %v4454_v21 = vadd.f32 -1.0, %v5266_v17 }
  0x9f   :  { %v4485_v22 = vadd.f32 -1.0, %v5268_v20  ;;  %5269 = vpow2.f32 %v231_v18 }
  0xa0   :  { %v274_v23 = vmul.f32 1.6732632, %v4454_v21  ;;  %5271 = vpow2.f32 %v473_v19  ;;  %v160_v24 = vpop.f32.mrf.mxu0  ;;  %v402_v25 = vpop.f32.mrf.mxu1 }
  0xa1   :  { %v516_v26 = vmul.f32 1.6732632, %v4485_v22  ;;  %v161_v27 = vadd.f32 %v5678_v54, %v160_v24  ;;  %v5722_v28 = vadd.f32 %v5678_v54, %v402_v25 }
  0xa2   :  { %v289_v29 = vsel %vm199_vm2, %v155_v63, %v274_v23 }
  0xa3   :  { %v304_v30 = vmul.f32 1.050701, %v289_v29  ;;  %v531_v31 = vsel %vm441_vm3, %v397_v0, %v516_v26  ;;  %v216_v32 = vmin.f32 %v161_v27, 0.0  ;;  %v458_v34 = vmin.f32 %v5722_v28, 0.0 }
  0xa4   :  { %v546_v33 = vmul.f32 1.050701, %v531_v31  ;;  %vm201_vm10 = vcmp.gt.f32.partialorder %v161_v27, 0.0  ;;  %vm443_vm11 = vcmp.gt.f32.partialorder %v5722_v28, 0.0 }
  0xa5   :  { %v5270_v35 = vpop.eup %5269  ;;  %v233_v36 = vmul.f32 1.442695, %v216_v32  ;;  %v475_v40 = vmul.f32 1.442695, %v458_v34 }
  0xa6   :  { %v5272_v37 = vpop.eup %5271  ;;  %v561_v38 = vadd.f32 %v546_v33, %v304_v30  ;;  %v4455_v39 = vadd.f32 -1.0, %v5270_v35 }
  0xa7   :  { %v4486_v41 = vadd.f32 -1.0, %v5272_v37  ;;  %5273 = vpow2.f32 %v233_v36 }
  0xa8   :  { %v5725_v42 = vmul.f32 0.5, %v561_v38  ;;  %v275_v43 = vmul.f32 1.6732632, %v4455_v39  ;;  %5275 = vpow2.f32 %v475_v40  ;;  %v163_v44 = vpop.f32.mrf.mxu0  ;;  %v405_v45 = vpop.f32.mrf.mxu1 }
  0xa9   :  { %v517_v46 = vmul.f32 1.6732632, %v4486_v41  ;;  %v5728_v47 = vadd.f32 %v5678_v54, %v163_v44  ;;  %v5731_v48 = vadd.f32 %v5678_v54, %v405_v45 }
  0xaa   :  { %v290_v49 = vsel %vm200_vm5, %v158_v13, %v275_v43  ;;  %4522 = vmatmul.msk.f32.vlgmr.msra.gmra.mxu3 %vm653_vm4, %v5725_v42  ;;  %v624_v3 = vrot.slane %v5725_v42, 1  ;;  %v838_v7 = vrot.slane %v5725_v42, 2  ;;  %v978_v15 = vrot.slane %v5725_v42, 3 }
  0xab   :  { %v305_v50 = vmul.f32 1.050701, %v290_v49  ;;  %v532_v51 = vsel %vm442_vm6, %v400_v14, %v517_v46  ;;  %v217_v52 = vmin.f32 %v5728_v47, 0.0  ;;  %v459_v55 = vmin.f32 %v5731_v48, 0.0 }
  0xac   :  { %v547_v53 = vmul.f32 1.050701, %v532_v51  ;;  %vm202_vm12 = vcmp.gt.f32.partialorder %v5728_v47, 0.0  ;;  %vm444_vm13 = vcmp.gt.f32.partialorder %v5731_v48, 0.0 }
  0xad   :  { %v5274_v56 = vpop.eup %5273  ;;  %v235_v57 = vmul.f32 1.442695, %v217_v52  ;;  %v477_v61 = vmul.f32 1.442695, %v459_v55 }
  0xae   :  { %v5276_v58 = vpop.eup %5275  ;;  %v562_v59 = vadd.f32 %v547_v53, %v305_v50  ;;  %v4456_v60 = vadd.f32 -1.0, %v5274_v56 }
  0xaf   :  { %v4487_v62 = vadd.f32 -1.0, %v5276_v58  ;;  %5277 = vpow2.f32 %v235_v57 }
  0xb0   :  { %v5738_v63 = vmul.f32 0.5, %v562_v59  ;;  %v276_v0 = vmul.f32 1.6732632, %v4456_v60  ;;  %5279 = vpow2.f32 %v477_v61  ;;  %v166_v1 = vpop.f32.mrf.mxu0  ;;  %v408_v2 = vpop.f32.mrf.mxu1 }
  0xb1   :  { %v518_v4 = vmul.f32 1.6732632, %v4487_v62  ;;  %v5742_v5 = vadd.f32 %v5678_v54, %v166_v1  ;;  %v5745_v6 = vadd.f32 %v5678_v54, %v408_v2 }
  0xb2   :  { %v291_v8 = vsel %vm201_vm10, %v161_v27, %v276_v0  ;;  %4523 = vmatmul.msk.f32.gmra.mxu3 %vm653_vm4, %v5738_v63  ;;  %v625_v9 = vrot.slane %v5738_v63, 1  ;;  %v839_v10 = vrot.slane %v5738_v63, 2  ;;  %v979_v11 = vrot.slane %v5738_v63, 3 }
  0xb3   :  { %v306_v12 = vmul.f32 1.050701, %v291_v8  ;;  %v533_v13 = vsel %vm443_vm11, %v5722_v28, %v518_v4  ;;  %v218_v14 = vmin.f32 %v5742_v5, 0.0  ;;  %v460_v17 = vmin.f32 %v5745_v6, 0.0 }
  0xb4   :  { %v548_v16 = vmul.f32 1.050701, %v533_v13  ;;  %v626_v18 = vsel %vm623_vm7, %v624_v3, %v625_v9  ;;  %v840_v21 = vsel %vm837_vm8, %v838_v7, %v839_v10  ;;  %v980_v22 = vsel %vm977_vm9, %v978_v15, %v979_v11 }
  0xb5   :  { %v5278_v19 = vpop.eup %5277  ;;  %v237_v20 = vmul.f32 1.442695, %v218_v14  ;;  %4508 = vmatmul.msk.f32.vlgmr.msra.gmra.mxu2 %vm653_vm4, %v626_v18  ;;  %v479_v26 = vmul.f32 1.442695, %v460_v17  ;;  %4544 = vmatmul.msk.f32.vlgmr.msrb.gmra.mxu0 %vm653_vm4, %v840_v21  ;;  %vm203_vm14 = vcmp.gt.f32.partialorder %v5742_v5, 0.0  ;;  %vm445_vm15 = vcmp.gt.f32.partialorder %v5745_v6, 0.0 }
  0xb6   :  { %v5280_v23 = vpop.eup %5279  ;;  %v563_v24 = vadd.f32 %v548_v16, %v306_v12  ;;  %v4457_v25 = vadd.f32 -1.0, %v5278_v19  ;;  %4566 = vmatmul.msk.f32.vlgmr.msrb.gmra.mxu1 %vm653_vm4, %v980_v22 }
  0xb7   :  { %v4488_v27 = vadd.f32 -1.0, %v5280_v23  ;;  %5281 = vpow2.f32 %v237_v20 }
  0xb8   :  { %v5765_v28 = vmul.f32 0.5, %v563_v24  ;;  %v277_v29 = vmul.f32 1.6732632, %v4457_v25  ;;  %5283 = vpow2.f32 %v479_v26  ;;  %v169_v30 = vpop.f32.mrf.mxu0  ;;  %v411_v31 = vpop.f32.mrf.mxu1 }
  0xb9   :  { %v519_v32 = vmul.f32 1.6732632, %v4488_v27  ;;  %v5770_v33 = vadd.f32 %v5678_v54, %v169_v30  ;;  %v5773_v34 = vadd.f32 %v5678_v54, %v411_v31 }
  0xba   :  { %v292_v35 = vsel %vm202_vm12, %v5728_v47, %v277_v29  ;;  %4524 = vmatmul.msk.f32.gmra.mxu3 %vm653_vm4, %v5765_v28  ;;  %v627_v36 = vrot.slane %v5765_v28, 1  ;;  %v841_v37 = vrot.slane %v5765_v28, 2  ;;  %v981_v38 = vrot.slane %v5765_v28, 3 }
  0xbb   :  { %v307_v39 = vmul.f32 1.050701, %v292_v35  ;;  %v534_v40 = vsel %vm444_vm13, %v5731_v48, %v519_v32  ;;  %v219_v41 = vmin.f32 %v5770_v33, 0.0  ;;  %v461_v44 = vmin.f32 %v5773_v34, 0.0 }
  0xbc   :  { %v549_v43 = vmul.f32 1.050701, %v534_v40  ;;  %v628_v45 = vsel %vm623_vm7, %v625_v9, %v627_v36  ;;  %v842_v49 = vsel %vm837_vm8, %v839_v10, %v841_v37  ;;  %v982_v50 = vsel %vm977_vm9, %v979_v11, %v981_v38 }
  0xbd   :  { %v5282_v46 = vpop.eup %5281  ;;  %v239_v47 = vmul.f32 1.442695, %v219_v41  ;;  %4509 = vmatmul.msk.f32.gmra.mxu2 %vm653_vm4, %v628_v45  ;;  %v481_v55 = vmul.f32 1.442695, %v461_v44  ;;  %4545 = vmatmul.msk.f32.gmra.mxu0 %vm653_vm4, %v842_v49  ;;  %vm204_vm1 = vcmp.gt.f32.partialorder %v5770_v33, 0.0  ;;  %vm446_vm2 = vcmp.gt.f32.partialorder %v5773_v34, 0.0 }
  0xbe   :  { %v5284_v51 = vpop.eup %5283  ;;  %v564_v52 = vadd.f32 %v549_v43, %v307_v39  ;;  %v4458_v53 = vadd.f32 -1.0, %v5282_v46  ;;  %4567 = vmatmul.msk.f32.gmra.mxu1 %vm653_vm4, %v982_v50 }
  0xbf   :  { %v4489_v48 = vadd.f32 -1.0, %v5284_v51  ;;  %5285 = vpow2.f32 %v239_v47 }
  0xc0   :  { %v5790_v56 = vmul.f32 0.5, %v564_v52  ;;  %v278_v57 = vmul.f32 1.6732632, %v4458_v53  ;;  %5287 = vpow2.f32 %v481_v55  ;;  %v172_v58 = vpop.f32.mrf.mxu0  ;;  %v414_v59 = vpop.f32.mrf.mxu1 }
  0xc1   :  { %v520_v60 = vmul.f32 1.6732632, %v4489_v48  ;;  %v5795_v61 = vadd.f32 %v5678_v54, %v172_v58  ;;  %v5798_v62 = vadd.f32 %v5678_v54, %v414_v59 }
  0xc2   :  { %v293_v0 = vsel %vm203_vm14, %v5742_v5, %v278_v57  ;;  %4525 = vmatmul.msk.f32.gmra.mxu3 %vm653_vm4, %v5790_v56  ;;  %v629_v1 = vrot.slane %v5790_v56, 1  ;;  %v843_v2 = vrot.slane %v5790_v56, 2  ;;  %v983_v3 = vrot.slane %v5790_v56, 3 }
  0xc3   :  { %v308_v4 = vmul.f32 1.050701, %v293_v0  ;;  %v535_v7 = vsel %vm445_vm15, %v5745_v6, %v520_v60  ;;  %v220_v8 = vmin.f32 %v5795_v61, 0.0  ;;  %v462_v10 = vmin.f32 %v5798_v62, 0.0 }
  0xc4   :  { %v550_v9 = vmul.f32 1.050701, %v535_v7  ;;  %v630_v11 = vsel %vm623_vm7, %v627_v36, %v629_v1  ;;  %v844_v13 = vsel %vm837_vm8, %v841_v37, %v843_v2  ;;  %v984_v14 = vsel %vm977_vm9, %v981_v38, %v983_v3 }
  0xc5   :  { %v5286_v5 = vpop.eup %5285  ;;  %v241_v12 = vmul.f32 1.442695, %v220_v8  ;;  %4510 = vmatmul.msk.f32.gmra.mxu2 %vm653_vm4, %v630_v11  ;;  %v483_v18 = vmul.f32 1.442695, %v462_v10  ;;  %4546 = vmatmul.msk.f32.gmra.mxu0 %vm653_vm4, %v844_v13  ;;  %vm205_vm3 = vcmp.gt.f32.partialorder %v5795_v61, 0.0  ;;  %vm447_vm5 = vcmp.gt.f32.partialorder %v5798_v62, 0.0 }
  0xc6   :  { %v5288_v15 = vpop.eup %5287  ;;  %v565_v16 = vadd.f32 %v550_v9, %v308_v4  ;;  %v4459_v17 = vadd.f32 -1.0, %v5286_v5  ;;  %4568 = vmatmul.msk.f32.gmra.mxu1 %vm653_vm4, %v984_v14 }
  0xc7   :  { %v4490_v6 = vadd.f32 -1.0, %v5288_v15  ;;  %5289 = vpow2.f32 %v241_v12 }
  0xc8   :  { %v5815_v19 = vmul.f32 0.5, %v565_v16  ;;  %v279_v20 = vmul.f32 1.6732632, %v4459_v17  ;;  %5291 = vpow2.f32 %v483_v18  ;;  %v175_v21 = vpop.f32.mrf.mxu0  ;;  %v417_v22 = vpop.f32.mrf.mxu1 }
  0xc9   :  { %v521_v23 = vmul.f32 1.6732632, %v4490_v6  ;;  %v5820_v24 = vadd.f32 %v5678_v54, %v175_v21  ;;  %v5823_v25 = vadd.f32 %v5678_v54, %v417_v22 }
  0xca   :  { %v294_v26 = vsel %vm204_vm1, %v5770_v33, %v279_v20  ;;  %4526 = vmatmul.msk.f32.gmra.mxu3 %vm653_vm4, %v5815_v19  ;;  %v631_v27 = vrot.slane %v5815_v19, 1  ;;  %v845_v29 = vrot.slane %v5815_v19, 2  ;;  %v985_v30 = vrot.slane %v5815_v19, 3 }
  0xcb   :  { %v309_v31 = vmul.f32 1.050701, %v294_v26  ;;  %v536_v32 = vsel %vm446_vm2, %v5773_v34, %v521_v23  ;;  %v221_v35 = vmin.f32 %v5820_v24, 0.0  ;;  %v463_v37 = vmin.f32 %v5823_v25, 0.0 }
  0xcc   :  { %v551_v36 = vmul.f32 1.050701, %v536_v32  ;;  %v632_v38 = vsel %vm623_vm7, %v629_v1, %v631_v27  ;;  %v846_v40 = vsel %vm837_vm8, %v843_v2, %v845_v29  ;;  %v986_v41 = vsel %vm977_vm9, %v983_v3, %v985_v30 }
  0xcd   :  { %v5290_v33 = vpop.eup %5289  ;;  %v243_v39 = vmul.f32 1.442695, %v221_v35  ;;  %4511 = vmatmul.msk.f32.gmra.mxu2 %vm653_vm4, %v632_v38  ;;  %v485_v46 = vmul.f32 1.442695, %v463_v37  ;;  %4547 = vmatmul.msk.f32.gmra.mxu0 %vm653_vm4, %v846_v40  ;;  %vm206_vm6 = vcmp.gt.f32.partialorder %v5820_v24, 0.0  ;;  %vm448_vm10 = vcmp.gt.f32.partialorder %v5823_v25, 0.0 }
  0xce   :  { %v5292_v43 = vpop.eup %5291  ;;  %v566_v44 = vadd.f32 %v551_v36, %v309_v31  ;;  %v4460_v45 = vadd.f32 -1.0, %v5290_v33  ;;  %4569 = vmatmul.msk.f32.gmra.mxu1 %vm653_vm4, %v986_v41 }
  0xcf   :  { %v4491_v34 = vadd.f32 -1.0, %v5292_v43  ;;  %5293 = vpow2.f32 %v243_v39 }
  0xd0   :  { %v5840_v47 = vmul.f32 0.5, %v566_v44  ;;  %v280_v49 = vmul.f32 1.6732632, %v4460_v45  ;;  %5295 = vpow2.f32 %v485_v46  ;;  %v178_v50 = vpop.f32.mrf.mxu0  ;;  %v420_v51 = vpop.f32.mrf.mxu1 }
  0xd1   :  { %v522_v52 = vmul.f32 1.6732632, %v4491_v34  ;;  %v5845_v53 = vadd.f32 %v5678_v54, %v178_v50  ;;  %v5848_v55 = vadd.f32 %v5678_v54, %v420_v51 }
  0xd2   :  { %v295_v48 = vsel %vm205_vm3, %v5795_v61, %v280_v49  ;;  %4527 = vmatmul.msk.f32.gmra.mxu3 %vm653_vm4, %v5840_v47  ;;  %v633_v57 = vrot.slane %v5840_v47, 1  ;;  %v847_v58 = vrot.slane %v5840_v47, 2  ;;  %v987_v59 = vrot.slane %v5840_v47, 3 }
  0xd3   :  { %v310_v60 = vmul.f32 1.050701, %v295_v48  ;;  %v537_v0 = vsel %vm447_vm5, %v5798_v62, %v522_v52  ;;  %v222_v1 = vmin.f32 %v5845_v53, 0.0  ;;  %v464_v3 = vmin.f32 %v5848_v55, 0.0 }
  0xd4   :  { %v552_v2 = vmul.f32 1.050701, %v537_v0  ;;  %v634_v4 = vsel %vm623_vm7, %v631_v27, %v633_v57  ;;  %v848_v8 = vsel %vm837_vm8, %v845_v29, %v847_v58  ;;  %v988_v9 = vsel %vm977_vm9, %v985_v30, %v987_v59 }
  0xd5   :  { %v5294_v61 = vpop.eup %5293  ;;  %v245_v7 = vmul.f32 1.442695, %v222_v1  ;;  %4512 = vmatmul.msk.f32.gmra.mxu2 %vm653_vm4, %v634_v4  ;;  %v487_v12 = vmul.f32 1.442695, %v464_v3  ;;  %4548 = vmatmul.msk.f32.gmra.mxu0 %vm653_vm4, %v848_v8  ;;  %vm207_vm11 = vcmp.gt.f32.partialorder %v5845_v53, 0.0  ;;  %vm449_vm12 = vcmp.gt.f32.partialorder %v5848_v55, 0.0 }
  0xd6   :  { %v5296_v10 = vpop.eup %5295  ;;  %v567_v11 = vadd.f32 %v552_v2, %v310_v60  ;;  %v4461_v5 = vadd.f32 -1.0, %v5294_v61  ;;  %4570 = vmatmul.msk.f32.gmra.mxu1 %vm653_vm4, %v988_v9 }
  0xd7   :  { %v4492_v62 = vadd.f32 -1.0, %v5296_v10  ;;  %5297 = vpow2.f32 %v245_v7 }
  0xd8   :  { %v5865_v13 = vmul.f32 0.5, %v567_v11  ;;  %v281_v14 = vmul.f32 1.6732632, %v4461_v5  ;;  %5299 = vpow2.f32 %v487_v12  ;;  %v181_v15 = vpop.f32.mrf.mxu0  ;;  %v423_v16 = vpop.f32.mrf.mxu1 }
  0xd9   :  { %v523_v17 = vmul.f32 1.6732632, %v4492_v62  ;;  %v5870_v18 = vadd.f32 %v5678_v54, %v181_v15  ;;  %v5873_v6 = vadd.f32 %v5678_v54, %v423_v16 }
  0xda   :  { %v296_v20 = vsel %vm206_vm6, %v5820_v24, %v281_v14  ;;  %4528 = vmatmul.msk.f32.gmra.mxu3 %vm653_vm4, %v5865_v13  ;;  %v635_v21 = vrot.slane %v5865_v13, 1  ;;  %v849_v22 = vrot.slane %v5865_v13, 2  ;;  %v989_v23 = vrot.slane %v5865_v13, 3 }
  0xdb   :  { %v311_v26 = vmul.f32 1.050701, %v296_v20  ;;  %v538_v27 = vsel %vm448_vm10, %v5823_v25, %v523_v17  ;;  %v223_v29 = vmin.f32 %v5870_v18, 0.0  ;;  %v465_v31 = vmin.f32 %v5873_v6, 0.0 }
  0xdc   :  { %v553_v30 = vmul.f32 1.050701, %v538_v27  ;;  %v636_v32 = vsel %vm623_vm7, %v633_v57, %v635_v21  ;;  %v850_v36 = vsel %vm837_vm8, %v847_v58, %v849_v22  ;;  %v990_v37 = vsel %vm977_vm9, %v987_v59, %v989_v23  ;;  %v4609_v27 = vld [vmem:[%s9336_s4 + $0x178] sm:$0xff] }
  0xdd   :  { %v5298_v24 = vpop.eup %5297  ;;  %v247_v35 = vmul.f32 1.442695, %v223_v29  ;;  %4513 = vmatmul.msk.f32.gmra.mxu2 %vm653_vm4, %v636_v32  ;;  %v489_v40 = vmul.f32 1.442695, %v465_v31  ;;  %4549 = vmatmul.msk.f32.gmra.mxu0 %vm653_vm4, %v850_v36  ;;  %vm208_vm13 = vcmp.gt.f32.partialorder %v5870_v18, 0.0  ;;  %vm450_vm14 = vcmp.gt.f32.partialorder %v5873_v6, 0.0 }
  0xde   :  { %v5300_v38 = vpop.eup %5299  ;;  %v568_v33 = vadd.f32 %v553_v30, %v311_v26  ;;  %v4462_v39 = vadd.f32 -1.0, %v5298_v24  ;;  %4571 = vmatmul.msk.f32.gmra.mxu1 %vm653_vm4, %v990_v37  ;;  %1322 = vmatpush.msrb.mxu3 %v4609_v27  ;;  %v4586_v27 = vld [vmem:[%s9336_s4 + $0x130] sm:$0xff] }
  0xdf   :  { %v4493_v25 = vadd.f32 -1.0, %v5300_v38  ;;  %5301 = vpow2.f32 %v247_v35  ;;  %v4608_v35 = vld [vmem:[%s9336_s4 + $0x170] sm:$0xff] }
  0xe0   :  { %v5890_v41 = vmul.f32 0.5, %v568_v33  ;;  %v282_v43 = vmul.f32 1.6732632, %v4462_v39  ;;  %5303 = vpow2.f32 %v489_v40  ;;  %v184_v44 = vpop.f32.mrf.mxu0  ;;  %v426_v45 = vpop.f32.mrf.mxu1  ;;  %1323 = vmatpush.msrb.mxu3 %v4608_v35  ;;  %v4607_v40 = vld [vmem:[%s9336_s4 + $0x168] sm:$0xff] }
  0xe1   :  { %v524_v46 = vmul.f32 1.6732632, %v4493_v25  ;;  %v5895_v34 = vadd.f32 %v5678_v54, %v184_v44  ;;  %v5898_v49 = vadd.f32 %v5678_v54, %v426_v45 }
  0xe2   :  { %v297_v50 = vsel %vm207_vm11, %v5845_v53, %v282_v43  ;;  %4529 = vmatmul.msk.f32.gmra.mxu3 %vm653_vm4, %v5890_v41  ;;  %v637_v51 = vrot.slane %v5890_v41, 1  ;;  %v851_v52 = vrot.slane %v5890_v41, 2  ;;  %v991_v48 = vrot.slane %v5890_v41, 3 }
  0xe3   :  { %v312_v57 = vmul.f32 1.050701, %v297_v50  ;;  %v539_v58 = vsel %vm449_vm12, %v5848_v55, %v524_v46  ;;  %v224_v59 = vmin.f32 %v5895_v34, 0.0  ;;  %v466_v0 = vmin.f32 %v5898_v49, 0.0  ;;  %1324 = vmatpush.msrb.mxu3 %v4607_v40 }
  0xe4   :  { %v554_v60 = vmul.f32 1.050701, %v539_v58  ;;  %v638_v1 = vsel %vm623_vm7, %v635_v21, %v637_v51  ;;  %v852_v3 = vsel %vm837_vm8, %v849_v22, %v851_v52  ;;  %v992_v4 = vsel %vm977_vm9, %v989_v23, %v991_v48 }
  0xe5   :  { %v5302_v53 = vpop.eup %5301  ;;  %v249_v2 = vmul.f32 1.442695, %v224_v59  ;;  %4514 = vmatmul.msk.f32.gmra.mxu2 %vm653_vm4, %v638_v1  ;;  %v491_v9 = vmul.f32 1.442695, %v466_v0  ;;  %4550 = vmatmul.msk.f32.gmra.mxu0 %vm653_vm4, %v852_v3  ;;  %vm209_vm15 = vcmp.gt.f32.partialorder %v5895_v34, 0.0  ;;  %vm451_vm1 = vcmp.gt.f32.partialorder %v5898_v49, 0.0 }
  0xe6   :  { %v5304_v61 = vpop.eup %5303  ;;  %v569_v7 = vadd.f32 %v554_v60, %v312_v57  ;;  %v4463_v8 = vadd.f32 -1.0, %v5302_v53  ;;  %4572 = vmatmul.msk.f32.gmra.mxu1 %vm653_vm4, %v992_v4  ;;  %v4605_v53 = vld [vmem:[%s9336_s4 + $0x158] sm:$0xff] }
  0xe7   :  { %v4494_v55 = vadd.f32 -1.0, %v5304_v61  ;;  %5305 = vpow2.f32 %v249_v2 }
  0xe8   :  { %v5915_v10 = vmul.f32 0.5, %v569_v7  ;;  %v283_v11 = vmul.f32 1.6732632, %v4463_v8  ;;  %5307 = vpow2.f32 %v491_v9  ;;  %v187_v5 = vpop.f32.mrf.mxu0  ;;  %v429_v12 = vpop.f32.mrf.mxu1  ;;  %v4604_v8 = vld [vmem:[%s9336_s4 + $0x150] sm:$0xff] }
  0xe9   :  { %v525_v62 = vmul.f32 1.6732632, %v4494_v55  ;;  %v5920_v14 = vadd.f32 %v5678_v54, %v187_v5  ;;  %v5923_v15 = vadd.f32 %v5678_v54, %v429_v12  ;;  %v4587_v12 = vld [vmem:[%s9336_s4 + $0x138] sm:$0xff] }
  0xea   :  { %v298_v16 = vsel %vm208_vm13, %v5870_v18, %v283_v11  ;;  %4530 = vmatmul.msk.f32.gmra.mxu3 %vm653_vm4, %v5915_v10  ;;  %v639_v17 = vrot.slane %v5915_v10, 1  ;;  %v853_v20 = vrot.slane %v5915_v10, 2  ;;  %v993_v21 = vrot.slane %v5915_v10, 3  ;;  %1183 = vmatpush.msrb.mxu2 %v4587_v12 }
  0xeb   :  { %v313_v22 = vmul.f32 1.050701, %v298_v16  ;;  %v540_v23 = vsel %vm450_vm14, %v5873_v6, %v525_v62  ;;  %v225_v26 = vmin.f32 %v5920_v14, 0.0  ;;  %v467_v18 = vmin.f32 %v5923_v15, 0.0  ;;  %v4631_v62 = vld [vmem:[%s9336_s4 + $0x1b8] sm:$0xff] }
  0xec   :  { %v555_v29 = vmul.f32 1.050701, %v540_v23  ;;  %v640_v30 = vsel %vm623_vm7, %v637_v51, %v639_v17  ;;  %v854_v24 = vsel %vm837_vm8, %v851_v52, %v853_v20  ;;  %v994_v6 = vsel %vm977_vm9, %v991_v48, %v993_v21  ;;  %v4606_v52 = vld [vmem:[%s9336_s4 + $0x160] sm:$0xff]  ;;  %v4653_v16 = vld [vmem:[%s9336_s4 + $0x1f8] sm:$0xff]  ;;  %1462 = vmatpush.msra.mxu0 %v4631_v62  ;;  %1184 = vmatpush.msrb.mxu2 %v4586_v27 }
  0xed   :  { %v5306_v31 = vpop.eup %5305  ;;  %v251_v32 = vmul.f32 1.442695, %v225_v26  ;;  %4515 = vmatmul.msk.f32.gmra.mxu2 %vm653_vm4, %v640_v30  ;;  %v493_v33 = vmul.f32 1.442695, %v467_v18  ;;  %4551 = vmatmul.msk.f32.gmra.mxu0 %vm653_vm4, %v854_v24  ;;  %vm210_vm2 = vcmp.gt.f32.partialorder %v5920_v14, 0.0  ;;  %v4652_v18 = vld [vmem:[%s9336_s4 + $0x1f0] sm:$0xff] }
  0xee   :  { %v5308_v36 = vpop.eup %5307  ;;  %v570_v37 = vadd.f32 %v555_v29, %v313_v22  ;;  %v4464_v38 = vadd.f32 -1.0, %v5306_v31  ;;  %4573 = vmatmul.msk.f32.gmra.mxu1 %vm653_vm4, %v994_v6  ;;  %1325 = vmatpush.msrb.mxu3 %v4606_v52  ;;  %v4630_v29 = vld [vmem:[%s9336_s4 + $0x1b0] sm:$0xff]  ;;  %vm452_vm3 = vcmp.gt.f32.partialorder %v5923_v15, 0.0  ;;  %v4602_v24 = vld [vmem:[%s9336_s4 + $0x140] sm:$0xff]  ;;  %v4585_v6 = vld [vmem:[%s9336_s4 + $0x128] sm:$0xff]  ;;  %vm1117_vm14 = vcmask 1043456  }
  0xef   :  { %v4495_v39 = vadd.f32 -1.0, %v5308_v36  ;;  %5309 = vpow2.f32 %v251_v32  ;;  %1602 = vmatpush.msra.mxu1 %v4653_v16  ;;  %1463 = vmatpush.msra.mxu0 %v4630_v29  ;;  %v4584_v52 = vld [vmem:[%s9336_s4 + $0x120] sm:$0xff]  ;;  %v4648_v16 = vld [vmem:[%s9336_s4 + $0x1d0] sm:$0xff] }
  0xf0   :  { %v5949_v25 = vmul.f32 0.5, %v570_v37  ;;  %v284_v43 = vmul.f32 1.6732632, %v4464_v38  ;;  %5311 = vpow2.f32 %v493_v33  ;;  %v190_v44 = vpop.f32.mrf.mxu0  ;;  %v432_v45 = vpop.f32.mrf.mxu1  ;;  %1326 = vmatpush.msrb.mxu3 %v4605_v53  ;;  %v4629_v33 = vld [vmem:[%s9336_s4 + $0x1a8] sm:$0xff]  ;;  %1185 = vmatpush.msrb.mxu2 %v4585_v6 }
  0xf1   :  { %v526_v46 = vmul.f32 1.6732632, %v4495_v39  ;;  %v5954_v50 = vadd.f32 %v5678_v54, %v190_v44  ;;  %v5957_v51 = vadd.f32 %v5678_v54, %v432_v45  ;;  %v4651_v39 = vld [vmem:[%s9336_s4 + $0x1e8] sm:$0xff]  ;;  %1603 = vmatpush.msra.mxu1 %v4652_v18  ;;  %1464 = vmatpush.msra.mxu0 %v4629_v33 }
  0xf2   :  { %v299_v48 = vsel %vm209_vm15, %v5895_v34, %v284_v43  ;;  %4531 = vmatmul.msk.f32.gmra.mxu3 %vm653_vm4, %v5949_v25  ;;  %v641_v57 = vrot.slane %v5949_v25, 1  ;;  %v855_v58 = vrot.slane %v5949_v25, 2  ;;  %v995_v59 = vrot.slane %v5949_v25, 3  ;;  %1186 = vmatpush.msrb.mxu2 %v4584_v52 }
  0xf3   :  { %v314_v60 = vmul.f32 1.050701, %v299_v48  ;;  %v541_v0 = vsel %vm451_vm1, %v5898_v49, %v526_v46  ;;  %v226_v1 = vmin.f32 %v5954_v50, 0.0  ;;  %v468_v2 = vmin.f32 %v5957_v51, 0.0  ;;  %1327 = vmatpush.msrb.mxu3 %v4604_v8  ;;  %1604 = vmatpush.msra.mxu1 %v4651_v39  ;;  %v4624_v39 = vld [vmem:[%s9336_s4 + $0x180] sm:$0xff] }
  0xf4   :  { %v556_v34 = vmul.f32 1.050701, %v541_v0  ;;  %v642_v3 = vsel %vm623_vm7, %v639_v17, %v641_v57  ;;  %v856_v49 = vsel %vm837_vm8, %v853_v20, %v855_v58  ;;  %v996_v7 = vsel %vm977_vm9, %v993_v21, %v995_v59  ;;  %v4603_v20 = vld [vmem:[%s9336_s4 + $0x148] sm:$0xff] }
  0xf5   :  { %v5310_v4 = vpop.eup %5309  ;;  %v253_v61 = vmul.f32 1.442695, %v226_v1  ;;  %4516 = vmatmul.msk.f32.gmra.mxu2 %vm653_vm4, %v642_v3  ;;  %v495_v5 = vmul.f32 1.442695, %v468_v2  ;;  %4552 = vmatmul.msk.f32.gmra.mxu0 %vm653_vm4, %v856_v49  ;;  %v4650_v1 = vld [vmem:[%s9336_s4 + $0x1e0] sm:$0xff]  ;;  %vm211_vm5 = vcmp.gt.f32.partialorder %v5954_v50, 0.0 }
  0xf6   :  { %v5312_v9 = vpop.eup %5311  ;;  %v571_v55 = vadd.f32 %v556_v34, %v314_v60  ;;  %v4465_v11 = vadd.f32 -1.0, %v5310_v4  ;;  %4574 = vmatmul.msk.f32.gmra.mxu1 %vm653_vm4, %v996_v7  ;;  %1328 = vmatpush.msrb.mxu3 %v4603_v20  ;;  %vm453_vm6 = vcmp.gt.f32.partialorder %v5957_v51, 0.0  ;;  %vm1396_vm15 = vcmask 1041408  }
  0xf7   :  { %v4496_v17 = vadd.f32 -1.0, %v5312_v9  ;;  %5313 = vpow2.f32 %v253_v61  ;;  %v4649_v61 = vld [vmem:[%s9336_s4 + $0x1d8] sm:$0xff]  ;;  %1605 = vmatpush.msra.mxu1 %v4650_v1  ;;  %vm1536_vm1 = vcmask 1040384  }
  0xf8   :  { %v6002_v21 = vmul.f32 0.5, %v571_v55  ;;  %v285_v22 = vmul.f32 1.6732632, %v4465_v11  ;;  %5315 = vpow2.f32 %v495_v5  ;;  %v193_v23 = vpop.f32.mrf.mxu0  ;;  %v435_v26 = vpop.f32.mrf.mxu1  ;;  %1329 = vmatpush.msrb.mxu3 %v4602_v24  ;;  %v4582_v55 = vld [vmem:[%s9336_s4 + $0x110] sm:$0xff]  ;;  %v4581_v24 = vld [vmem:[%s9336_s4 + $0x108] sm:$0xff] }
  0xf9   :  { %v527_v30 = vmul.f32 1.6732632, %v4496_v17  ;;  %v6015_v31 = vadd.f32 %v5678_v54, %v193_v23  ;;  %v6018_v32 = vadd.f32 %v5678_v54, %v435_v26  ;;  %v4626_v11 = vld [vmem:[%s9336_s4 + $0x190] sm:$0xff]  ;;  %1606 = vmatpush.msra.mxu1 %v4649_v61 }
  0xfa   :  { %v300_v35 = vsel %vm210_vm2, %v5920_v14, %v285_v22  ;;  %4532 = vmatmul.msk.f32.gmra.mxu3 %vm653_vm4, %v6002_v21  ;;  %v643_v36 = vrot.slane %v6002_v21, 1  ;;  %v857_v37 = vrot.slane %v6002_v21, 2  ;;  %v997_v38 = vrot.slane %v6002_v21, 3 }
  0xfb   :  { %v315_v40 = vmul.f32 1.050701, %v300_v35  ;;  %v542_v14 = vsel %vm452_vm3, %v5923_v15, %v527_v30  ;;  %v227_v43 = vmin.f32 %v6015_v31, 0.0  ;;  %v469_v45 = vmin.f32 %v6018_v32, 0.0  ;;  %v4628_v15 = vld [vmem:[%s9336_s4 + $0x1a0] sm:$0xff]  ;;  %1607 = vmatpush.msra.mxu1 %v4648_v16 }
  0xfc   :  { %v557_v44 = vmul.f32 1.050701, %v542_v14  ;;  %v644_v46 = vsel %vm623_vm7, %v641_v57, %v643_v36  ;;  %v858_v57 = vsel %vm837_vm8, %v855_v58, %v857_v37  ;;  %v998_v0 = vsel %vm977_vm9, %v995_v59, %v997_v38  ;;  %v4583_v58 = vld [vmem:[%s9336_s4 + $0x118] sm:$0xff]  ;;  %1465 = vmatpush.msra.mxu0 %v4628_v15 }
  0xfd   :  { %v5314_v48 = vpop.eup %5313  ;;  %v255_v60 = vmul.f32 1.442695, %v227_v43  ;;  %4517 = vmatmul.msk.f32.gmra.mxu2 %vm653_vm4, %v644_v46  ;;  %v497_v3 = vmul.f32 1.442695, %v469_v45  ;;  %4553 = vmatmul.msk.f32.gmra.mxu0 %vm653_vm4, %v858_v57  ;;  %v4627_v59 = vld [vmem:[%s9336_s4 + $0x198] sm:$0xff]  ;;  %vm212_vm10 = vcmp.gt.f32.partialorder %v6015_v31, 0.0 }
  0xfe   :  { %v5316_v53 = vpop.eup %5315  ;;  %v572_v34 = vadd.f32 %v557_v44, %v315_v40  ;;  %v4466_v2 = vadd.f32 -1.0, %v5314_v48  ;;  %4575 = vmatmul.msk.f32.gmra.mxu1 %vm653_vm4, %v998_v0  ;;  %1187 = vmatpush.msrb.mxu2 %v4583_v58  ;;  %vm454_vm11 = vcmp.gt.f32.partialorder %v6018_v32, 0.0 }
  0xff   :  { %v4497_v4 = vadd.f32 -1.0, %v5316_v53  ;;  %5317 = vpow2.f32 %v255_v60  ;;  %1466 = vmatpush.msra.mxu0 %v4627_v59 }
 0x100   :  { %v6081_v49 = vmul.f32 0.5, %v572_v34  ;;  %v286_v7 = vmul.f32 1.6732632, %v4466_v2  ;;  %5319 = vpow2.f32 %v497_v3  ;;  %v196_v8 = vpop.f32.mrf.mxu0  ;;  %v438_v9 = vpop.f32.mrf.mxu1  ;;  %1188 = vmatpush.msrb.mxu2 %v4582_v55 }
 0x101   :  { %v528_v5 = vmul.f32 1.6732632, %v4497_v4  ;;  %v6092_v12 = vadd.f32 %v5678_v54, %v196_v8  ;;  %v6095_v62 = vadd.f32 %v5678_v54, %v438_v9  ;;  %v4625_v54 = vld [vmem:[%s9336_s4 + $0x188] sm:$0xff]  ;;  %1467 = vmatpush.msra.mxu0 %v4626_v11 }
 0x102   :  { %v301_v17 = vsel %vm211_vm5, %v5954_v50, %v286_v7  ;;  %4533 = vmatmul.msk.f32.gmra.mxu3 %vm653_vm4, %v6081_v49  ;;  %v645_v20 = vrot.slane %v6081_v49, 1  ;;  %v859_v22 = vrot.slane %v6081_v49, 2  ;;  %v999_v23 = vrot.slane %v6081_v49, 3  ;;  %1189 = vmatpush.msrb.mxu2 %v4581_v24 }
 0x103   :  { %v316_v26 = vmul.f32 1.050701, %v301_v17  ;;  %v543_v27 = vsel %vm453_vm6, %v5957_v51, %v528_v5  ;;  %v228_v29 = vmin.f32 %v6092_v12, 0.0  ;;  %v470_v18 = vmin.f32 %v6095_v62, 0.0  ;;  %v4647_v51 = vld [vmem:[%s9336_s4 + $0x1c8] sm:$0xff]  ;;  %1468 = vmatpush.msra.mxu0 %v4625_v54 }
 0x104   :  { %v558_v50 = vmul.f32 1.050701, %v543_v27  ;;  %v646_v30 = vsel %vm623_vm7, %v643_v36, %v645_v20  ;;  %v860_v33 = vsel %vm837_vm8, %v857_v37, %v859_v22  ;;  %v1000_v36 = vsel %vm977_vm9, %v997_v38, %v999_v23  ;;  %v4580_v37 = vld [vmem:[%s9336_s4 + $0x100] sm:$0xff]  ;;  %1608 = vmatpush.msra.mxu1 %v4647_v51 }
 0x105   :  { %v5318_v6 = vpop.eup %5317  ;;  %v257_v35 = vmul.f32 1.442695, %v228_v29  ;;  %4518 = vmatmul.msk.f32.gmra.mxu2 %vm653_vm4, %v646_v30  ;;  %v499_v44 = vmul.f32 1.442695, %v470_v18  ;;  %4554 = vmatmul.msk.f32.gmra.mxu0 %vm653_vm4, %v860_v33  ;;  %v4646_v38 = vld [vmem:[%s9336_s4 + $0x1c0] sm:$0xff]  ;;  %vm213_vm12 = vcmp.gt.f32.partialorder %v6092_v12, 0.0 }
 0x106   :  { %v5320_v40 = vpop.eup %5319  ;;  %v573_v14 = vadd.f32 %v558_v50, %v316_v26  ;;  %v4467_v43 = vadd.f32 -1.0, %v5318_v6  ;;  %4576 = vmatmul.msk.f32.gmra.mxu1 %vm653_vm4, %v1000_v36  ;;  %1469 = vmatpush.msra.mxu0 %v4624_v39  ;;  %vm455_vm13 = vcmp.gt.f32.partialorder %v6095_v62, 0.0  ;;  %v1257_v29 = vrot.slane %v5725_v42, 5 }
 0x107   :  { %v4498_v45 = vadd.f32 -1.0, %v5320_v40  ;;  %5321 = vpow2.f32 %v257_v35  ;;  %1190 = vmatpush.msrb.mxu2 %v4580_v37  ;;  %1609 = vmatpush.msra.mxu1 %v4646_v38  ;;  %v1260_v33 = vrot.slane %v5765_v28, 5  ;;  %v1119_v36 = vrot.slane %v5738_v63, 4 }
 0x108   :  { %v6139_v46 = vmul.f32 0.5, %v573_v14  ;;  %v287_v52 = vmul.f32 1.6732632, %v4467_v43  ;;  %5323 = vpow2.f32 %v499_v44  ;;  %v1398_v40 = vrot.slane %v5738_v63, 6 }
 0x109   :  { %v529_v15 = vmul.f32 1.6732632, %v4498_v45  ;;  %v1538_v14 = vrot.slane %v5738_v63, 7  ;;  %v1118_v43 = vrot.slane %v5725_v42, 4  ;;  %v1397_v44 = vrot.slane %v5725_v42, 6 }
 0x10a   :  { %v302_v48 = vsel %vm212_vm10, %v6015_v31, %v287_v52  ;;  %4534 = vmatmul.msk.f32.gmra.mxu3 %vm653_vm4, %v6139_v46  ;;  %v647_v60 = vrot.slane %v6139_v46, 1  ;;  %v861_v57 = vrot.slane %v6139_v46, 2  ;;  %v1001_v0 = vrot.slane %v6139_v46, 3 }
 0x10b   :  { %v317_v1 = vmul.f32 1.050701, %v302_v48  ;;  %v544_v53 = vsel %vm454_vm11, %v6018_v32, %v529_v15  ;;  %v1537_v37 = vrot.slane %v5725_v42, 7  ;;  %v1120_v38 = vsel %vm1117_vm14, %v1118_v43, %v1119_v36 }
 0x10c   :  { %v559_v34 = vmul.f32 1.050701, %v544_v53  ;;  %v648_v2 = vsel %vm623_vm7, %v645_v20, %v647_v60  ;;  %v862_v3 = vsel %vm837_vm8, %v859_v22, %v861_v57  ;;  %v1002_v58 = vsel %vm977_vm9, %v999_v23, %v1001_v0 }
 0x10d   :  { %v5322_v31 = vpop.eup %5321  ;;  %4519 = vmatmul.msk.f32.gmra.mxu2 %vm653_vm4, %v648_v2  ;;  %4555 = vmatmul.msk.f32.gmra.mxu0 %vm653_vm4, %v862_v3  ;;  %v1399_v45 = vsel %vm1396_vm15, %v1397_v44, %v1398_v40  ;;  %v1539_v52 = vsel %vm1536_vm1, %v1537_v37, %v1538_v14  ;;  %v1262_v15 = vrot.slane %v5790_v56, 5  ;;  %v1121_v48 = vrot.slane %v5765_v28, 4 }
 0x10e   :  { %v5324_v59 = vpop.eup %5323  ;;  %v574_v4 = vadd.f32 %v559_v34, %v317_v1  ;;  %v4468_v61 = vadd.f32 -1.0, %v5322_v31  ;;  %4577 = vmatmul.msk.f32.gmra.mxu1 %vm653_vm4, %v1002_v58  ;;  %v1400_v42 = vrot.slane %v5765_v28, 6  ;;  %v1264_v34 = vrot.slane %v5815_v19, 5 }
 0x10f   :  { %v4499_v7 = vadd.f32 -1.0, %v5324_v59  ;;  %v1123_v2 = vrot.slane %v5790_v56, 4  ;;  %v1402_v58 = vrot.slane %v5790_v56, 6  ;;  %v1542_v31 = vrot.slane %v5790_v56, 7 }
 0x110   :  { %v6156_v8 = vmul.f32 0.5, %v574_v4  ;;  %v288_v32 = vmul.f32 1.6732632, %v4468_v61  ;;  %v1401_v1 = vsel %vm1396_vm15, %v1398_v40, %v1400_v42  ;;  %v1265_v3 = vsel %vm133_vm0, %v1262_v15, %v1264_v34 }
 0x111   :  { %v530_v9 = vmul.f32 1.6732632, %v4499_v7  ;;  %v1124_v61 = vsel %vm1117_vm14, %v1121_v48, %v1123_v2  ;;  %v1403_v7 = vsel %vm1396_vm15, %v1400_v42, %v1402_v58  ;;  %v1270_v44 = vrot.slane %v5890_v41, 5 }
 0x112   :  { %v303_v55 = vsel %vm213_vm12, %v6092_v12, %v288_v32  ;;  %4535 = vmatmul.msk.f32.gmra.mxu3 %vm653_vm4, %v6156_v8  ;;  %v649_v11 = vrot.slane %v6156_v8, 1  ;;  %v863_v5 = vrot.slane %v6156_v8, 2  ;;  %v1003_v16 = vrot.slane %v6156_v8, 3 }
 0x113   :  { %v318_v17 = vmul.f32 1.050701, %v303_v55  ;;  %v545_v20 = vsel %vm455_vm13, %v6095_v62, %v530_v9  ;;  %v1258_v12 = vrot.slane %v5738_v63, 5  ;;  %v1266_v9 = vrot.slane %v5840_v47, 5 }
 0x114   :  { %v560_v22 = vmul.f32 1.050701, %v545_v20  ;;  %v650_v23 = vsel %vm623_vm7, %v647_v60, %v649_v11  ;;  %v864_v54 = vsel %vm837_vm8, %v861_v57, %v863_v5  ;;  %v1004_v26 = vsel %vm977_vm9, %v1001_v0, %v1003_v16 }
 0x115   :  { %4520 = vmatmul.msk.f32.gmra.mxu2 %vm653_vm4, %v650_v23  ;;  %4556 = vmatmul.msk.f32.gmra.mxu0 %vm653_vm4, %v864_v54  ;;  %v1259_v62 = vsel %vm133_vm0, %v1257_v29, %v1258_v12  ;;  %v1261_v39 = vsel %vm133_vm0, %v1258_v12, %v1260_v33  ;;  %v1263_v60 = vsel %vm133_vm0, %v1260_v33, %v1262_v15  ;;  %v1540_v57 = vrot.slane %v5765_v28, 7 }
 0x116   :  { %v575_v27 = vadd.f32 %v560_v22, %v318_v17  ;;  %4578 = vmatmul.msk.f32.gmra.mxu1 %vm653_vm4, %v1004_v26  ;;  %v1122_v0 = vsel %vm1117_vm14, %v1119_v36, %v1121_v48  ;;  %v1267_v17 = vsel %vm133_vm0, %v1264_v34, %v1266_v9  ;;  %v1404_v20 = vrot.slane %v5815_v19, 6 }
 0x117   :  { %v1541_v53 = vsel %vm1536_vm1, %v1538_v14, %v1540_v57  ;;  %v1543_v32 = vsel %vm1536_vm1, %v1540_v57, %v1542_v31  ;;  %v1544_v22 = vrot.slane %v5815_v19, 7  ;;  %v1268_v29 = vrot.slane %v5865_v13, 5 }
 0x118   :  { %v6175_v50 = vmul.f32 0.5, %v575_v27  ;;  %v1405_v12 = vsel %vm1396_vm15, %v1402_v58, %v1404_v20  ;;  %v1406_v33 = vrot.slane %v5840_v47, 6  ;;  %v1546_v36 = vrot.slane %v5840_v47, 7 }
 0x119   :  { %v1545_v27 = vsel %vm1536_vm1, %v1542_v31, %v1544_v22  ;;  %v1129_v15 = vrot.slane %v5865_v13, 4  ;;  %v1408_v42 = vrot.slane %v5865_v13, 6  ;;  %v1548_v57 = vrot.slane %v5865_v13, 7 }
 0x11a   :  { %4610 = vmatmul.msk.f32.vlgmr.msrb.gmra.mxu3 %vm653_vm4, %v1259_v62  ;;  %v651_v18 = vrot.slane %v6175_v50, 1  ;;  %v865_v30 = vrot.slane %v6175_v50, 2  ;;  %v1005_v24 = vrot.slane %v6175_v50, 3  ;;  %v1407_v14 = vsel %vm1396_vm15, %v1404_v20, %v1406_v33 }
 0x11b   :  { %v1547_v43 = vsel %vm1536_vm1, %v1544_v22, %v1546_v36  ;;  %v1409_v34 = vsel %vm1396_vm15, %v1406_v33, %v1408_v42  ;;  %v1274_v22 = vrot.slane %v5949_v25, 5  ;;  %v1135_v33 = vrot.slane %v5949_v25, 4 }
 0x11c   :  { %v652_v51 = vsel %vm623_vm7, %v649_v11, %v651_v18  ;;  %v866_v6 = vsel %vm837_vm8, %v863_v5, %v865_v30  ;;  %v1006_v35 = vsel %vm977_vm9, %v1003_v16, %v1005_v24  ;;  %v1125_v5 = vrot.slane %v5815_v19, 4 }
 0x11d   :  { %4521 = vmatmul.msk.f32.gmra.mxu2 %vm653_vm4, %v652_v51  ;;  %4557 = vmatmul.msk.f32.gmra.mxu0 %vm653_vm4, %v866_v6  ;;  %v1127_v24 = vrot.slane %v5840_v47, 4 }
 0x11e   :  { %4579 = vmatmul.msk.f32.gmra.mxu1 %vm653_vm4, %v1006_v35  ;;  %v1126_v26 = vsel %vm1117_vm14, %v1123_v2, %v1125_v5  ;;  %v1269_v35 = vsel %vm133_vm0, %v1266_v9, %v1268_v29  ;;  %v1549_v2 = vsel %vm1536_vm1, %v1546_v36, %v1548_v57  ;;  %v1550_v9 = vrot.slane %v5890_v41, 7 }
 0x11f   :  { %v1128_v40 = vsel %vm1117_vm14, %v1125_v5, %v1127_v24 }
 0x120   :  { %v1551_v20 = vsel %vm1536_vm1, %v1548_v57, %v1550_v9 }
 0x122   :  { %4611 = vmatmul.msk.f32.gmra.mxu3 %vm653_vm4, %v1261_v39 }
 0x125   :  { %4588 = vmatmul.msk.f32.vlgmr.msrb.gmra.mxu2 %vm653_vm4, %v1120_v38  ;;  %4632 = vmatmul.msk.f32.vlgmr.msra.gmra.mxu0 %vm653_vm4, %v1399_v45 }
 0x126   :  { %4654 = vmatmul.msk.f32.vlgmr.msra.gmra.mxu1 %vm653_vm4, %v1539_v52 }
 0x12a   :  { %4612 = vmatmul.msk.f32.gmra.mxu3 %vm653_vm4, %v1263_v60  ;;  %v1271_v60 = vsel %vm133_vm0, %v1268_v29, %v1270_v44  ;;  %v1552_v29 = vrot.slane %v5915_v10, 7 }
 0x12d   :  { %4589 = vmatmul.msk.f32.gmra.mxu2 %vm653_vm4, %v1122_v0  ;;  %4633 = vmatmul.msk.f32.gmra.mxu0 %vm653_vm4, %v1401_v1  ;;  %v786_v59 = vpop.f32.mrf.mxu3 }
 0x12e   :  { %4655 = vmatmul.msk.f32.gmra.mxu1 %vm653_vm4, %v1541_v53  ;;  %v1130_v53 = vsel %vm1117_vm14, %v1127_v24, %v1129_v15 }
 0x132   :  { %4613 = vmatmul.msk.f32.gmra.mxu3 %vm653_vm4, %v1265_v3  ;;  %v912_v4 = vpop.f32.mrf.mxu0  ;;  %v1272_v3 = vrot.slane %v5915_v10, 5 }
 0x133   :  { %v1052_v55 = vpop.f32.mrf.mxu1 }
 0x135   :  { %4590 = vmatmul.msk.f32.gmra.mxu2 %vm653_vm4, %v1124_v61  ;;  %4634 = vmatmul.msk.f32.gmra.mxu0 %vm653_vm4, %v1403_v7  ;;  %v789_v54 = vpop.f32.mrf.mxu3  ;;  %v1273_v7 = vsel %vm133_vm0, %v1270_v44, %v1272_v3 }
 0x136   :  { %4656 = vmatmul.msk.f32.gmra.mxu1 %vm653_vm4, %v1543_v32  ;;  %v1410_v32 = vrot.slane %v5890_v41, 6 }
 0x138   :  { %v699_v11 = vpop.f32.mrf.mxu2 }
 0x139   :  { %v787_v16 = vadd.f32 %v786_v59, %v699_v11 }
 0x13a   :  { %4614 = vmatmul.msk.f32.gmra.mxu3 %vm653_vm4, %v1267_v17  ;;  %v915_v62 = vpop.f32.mrf.mxu0  ;;  %v1411_v17 = vsel %vm1396_vm15, %v1408_v42, %v1410_v32  ;;  %v4674_v42 = vld [vmem:[%s9336_s4 + $0x230] sm:$0xff] }
 0x13b   :  { %v954_v23 = vadd.f32 %v912_v4, %v787_v16  ;;  %v1055_v51 = vpop.f32.mrf.mxu1  ;;  %v1131_v4 = vrot.slane %v5890_v41, 4 }
 0x13d   :  { %4591 = vmatmul.msk.f32.gmra.mxu2 %vm653_vm4, %v1126_v26  ;;  %4635 = vmatmul.msk.f32.gmra.mxu0 %vm653_vm4, %v1405_v12  ;;  %v6240_v18 = vadd.f32 %v1052_v55, %v954_v23  ;;  %v792_v37 = vpop.f32.mrf.mxu3  ;;  %v1132_v5 = vsel %vm1117_vm14, %v1129_v15, %v1131_v4  ;;  %v1133_v26 = vrot.slane %v5915_v10, 4  ;;  %v1275_v12 = vsel %vm133_vm0, %v1272_v3, %v1274_v22 }
 0x13e   :  { %4657 = vmatmul.msk.f32.gmra.mxu1 %vm653_vm4, %v1545_v27  ;;  %v1412_v27 = vrot.slane %v5915_v10, 6 }
 0x140   :  { %v702_v30 = vpop.f32.mrf.mxu2  ;;  %v1413_v24 = vsel %vm1396_vm15, %v1410_v32, %v1412_v27 }
 0x141   :  { %v790_v6 = vadd.f32 %v789_v54, %v702_v30  ;;  %v1134_v30 = vsel %vm1117_vm14, %v1131_v4, %v1133_v26 }
 0x142   :  { %4615 = vmatmul.msk.f32.gmra.mxu3 %vm653_vm4, %v1269_v35  ;;  %v918_v45 = vpop.f32.mrf.mxu0 }
 0x143   :  { %v955_v39 = vadd.f32 %v915_v62, %v790_v6  ;;  %v1058_v0 = vpop.f32.mrf.mxu1  ;;  %v4675_v62 = vld [vmem:[%s9336_s4 + $0x238] sm:$0xff]  ;;  %v1276_v6 = vrot.slane %v6002_v21, 5 }
 0x144   :  { %1686 = vmatpush.msra.mxu2 %v4675_v62 }
 0x145   :  { %4592 = vmatmul.msk.f32.gmra.mxu2 %vm653_vm4, %v1128_v40  ;;  %4636 = vmatmul.msk.f32.gmra.mxu0 %vm653_vm4, %v1407_v14  ;;  %v6254_v38 = vadd.f32 %v1055_v51, %v955_v39  ;;  %v795_v31 = vpop.f32.mrf.mxu3  ;;  %v1553_v51 = vsel %vm1536_vm1, %v1550_v9, %v1552_v29  ;;  %v1277_v36 = vsel %vm133_vm0, %v1274_v22, %v1276_v6  ;;  %v1414_v39 = vrot.slane %v5949_v25, 6  ;;  %v4670_v9 = vld [vmem:[%s9336_s4 + $0x210] sm:$0xff]  ;;  %v4668_v22 = vld [vmem:[%s9336_s4 + $0x200] sm:$0xff] }
 0x146   :  { %4658 = vmatmul.msk.f32.gmra.mxu1 %vm653_vm4, %v1547_v43  ;;  %v1554_v40 = vrot.slane %v5949_v25, 7  ;;  %v1136_v14 = vsel %vm1117_vm14, %v1133_v26, %v1135_v33  ;;  %1687 = vmatpush.msra.mxu2 %v4674_v42 }
 0x147   :  { %v1415_v43 = vsel %vm1396_vm15, %v1412_v27, %v1414_v39  ;;  %v1560_v27 = vrot.slane %v6139_v46, 7 }
 0x148   :  { %v705_v52 = vpop.f32.mrf.mxu2  ;;  %v1555_v44 = vsel %vm1536_vm1, %v1552_v29, %v1554_v40 }
 0x149   :  { %v793_v48 = vadd.f32 %v792_v37, %v705_v52  ;;  %v1278_v37 = vrot.slane %v6081_v49, 5  ;;  %v1137_v52 = vrot.slane %v6002_v21, 4 }
 0x14a   :  { %4616 = vmatmul.msk.f32.gmra.mxu3 %vm653_vm4, %v1271_v60  ;;  %v921_v55 = vpop.f32.mrf.mxu0  ;;  %v1556_v60 = vrot.slane %v6002_v21, 7 }
 0x14b   :  { %v956_v1 = vadd.f32 %v918_v45, %v793_v48  ;;  %v1061_v16 = vpop.f32.mrf.mxu1  ;;  %v1279_v15 = vsel %vm133_vm0, %v1276_v6, %v1278_v37  ;;  %v1416_v48 = vrot.slane %v6002_v21, 6  ;;  %v1138_v57 = vsel %vm1117_vm14, %v1135_v33, %v1137_v52 }
 0x14c   :  { %v1143_v6 = vrot.slane %v6156_v8, 4 }
 0x14d   :  { %4593 = vmatmul.msk.f32.gmra.mxu2 %vm653_vm4, %v1130_v53  ;;  %4637 = vmatmul.msk.f32.gmra.mxu0 %vm653_vm4, %v1409_v34  ;;  %v6268_v58 = vadd.f32 %v1058_v0, %v956_v1  ;;  %v4673_v0 = vld [vmem:[%s9336_s4 + $0x228] sm:$0xff]  ;;  %v1417_v1 = vsel %vm1396_vm15, %v1414_v39, %v1416_v48  ;;  %v1557_v53 = vsel %vm1536_vm1, %v1554_v40, %v1556_v60  ;;  %v1280_v34 = vrot.slane %v6139_v46, 5 }
 0x14e   :  { %4659 = vmatmul.msk.f32.gmra.mxu1 %vm653_vm4, %v1549_v2  ;;  %v4672_v2 = vld [vmem:[%s9336_s4 + $0x220] sm:$0xff]  ;;  %1688 = vmatpush.msra.mxu2 %v4673_v0  ;;  %v1562_v39 = vrot.slane %v6156_v8, 7 }
 0x14f   :  { %v1281_v4 = vsel %vm133_vm0, %v1278_v37, %v1280_v34  ;;  %v1145_v37 = vrot.slane %v6175_v50, 4 }
 0x150   :  { %v708_v59 = vpop.f32.mrf.mxu2  ;;  %1689 = vmatpush.msra.mxu2 %v4672_v2 }
 0x151   :  { %v796_v61 = vadd.f32 %v795_v31, %v708_v59  ;;  %v1139_v31 = vrot.slane %v6081_v49, 4  ;;  %v4671_v59 = vld [vmem:[%s9336_s4 + $0x218] sm:$0xff] }
 0x152   :  { %4617 = vmatmul.msk.f32.gmra.mxu3 %vm653_vm4, %v1273_v7  ;;  %v1558_v7 = vrot.slane %v6081_v49, 7  ;;  %1690 = vmatpush.msra.mxu2 %v4671_v59 }
 0x153   :  { %v957_v11 = vadd.f32 %v921_v55, %v796_v61  ;;  %v1418_v61 = vrot.slane %v6081_v49, 6  ;;  %v1140_v32 = vsel %vm1117_vm14, %v1137_v52, %v1139_v31  ;;  %v1424_v52 = vrot.slane %v6175_v50, 6 }
 0x154   :  { %1691 = vmatpush.msra.mxu2 %v4670_v9 }
 0x155   :  { %4594 = vmatmul.msk.f32.gmra.mxu2 %vm653_vm4, %v1132_v5  ;;  %4638 = vmatmul.msk.f32.gmra.mxu0 %vm653_vm4, %v1411_v17  ;;  %v6282_v23 = vadd.f32 %v1061_v16, %v957_v11  ;;  %v1419_v55 = vsel %vm1396_vm15, %v1416_v48, %v1418_v61  ;;  %v1559_v11 = vsel %vm1536_vm1, %v1556_v60, %v1558_v7  ;;  %v1282_v5 = vrot.slane %v6156_v8, 5  ;;  %v4669_v16 = vld [vmem:[%s9336_s4 + $0x208] sm:$0xff] }
 0x156   :  { %4660 = vmatmul.msk.f32.gmra.mxu1 %vm653_vm4, %v1551_v20  ;;  %v1141_v20 = vrot.slane %v6139_v46, 4  ;;  %1692 = vmatpush.msra.mxu2 %v4669_v16  ;;  %v1146_v48 = vsel %vm1117_vm14, %v1143_v6, %v1145_v37 }
 0x157   :  { %v1283_v26 = vsel %vm133_vm0, %v1280_v34, %v1282_v5 }
 0x158   :  { %v6284_v54 = vpop.f32.mrf.mxu2  ;;  %1693 = vmatpush.msra.mxu2 %v4668_v22  ;;  %v1142_v29 = vsel %vm1117_vm14, %v1139_v31, %v1141_v20  ;;  %v1144_v40 = vsel %vm1117_vm14, %v1141_v20, %v1143_v6 }
 0x15a   :  { %4618 = vmatmul.msk.f32.gmra.mxu3 %vm653_vm4, %v1275_v12  ;;  %v1420_v12 = vrot.slane %v6139_v46, 6 }
 0x15c   :  { %v1421_v62 = vsel %vm1396_vm15, %v1418_v61, %v1420_v12 }
 0x15d   :  { %4595 = vmatmul.msk.f32.gmra.mxu2 %vm653_vm4, %v1134_v30  ;;  %4639 = vmatmul.msk.f32.gmra.mxu0 %vm653_vm4, %v1413_v24  ;;  %v1561_v30 = vsel %vm1536_vm1, %v1558_v7, %v1560_v27  ;;  %v1284_v24 = vrot.slane %v6175_v50, 5 }
 0x15e   :  { %4661 = vmatmul.msk.f32.gmra.mxu1 %vm653_vm4, %v1553_v51 }
 0x15f   :  { %v1285_v33 = vsel %vm133_vm0, %v1282_v5, %v1284_v24 }
 0x160   :  { %v6301_v35 = vpop.f32.mrf.mxu2 }
 0x162   :  { %4619 = vmatmul.msk.f32.gmra.mxu3 %vm653_vm4, %v1277_v36  ;;  %v1422_v36 = vrot.slane %v6156_v8, 6 }
 0x164   :  { %v1425_v60 = vsel %vm1396_vm15, %v1422_v36, %v1424_v52 }
 0x165   :  { %4596 = vmatmul.msk.f32.gmra.mxu2 %vm653_vm4, %v1136_v14  ;;  %4640 = vmatmul.msk.f32.gmra.mxu0 %vm653_vm4, %v1415_v43  ;;  %v1423_v14 = vsel %vm1396_vm15, %v1420_v12, %v1422_v36  ;;  %v1563_v43 = vsel %vm1536_vm1, %v1560_v27, %v1562_v39 }
 0x166   :  { %4662 = vmatmul.msk.f32.gmra.mxu1 %vm653_vm4, %v1555_v44 }
 0x168   :  { %v6315_v45 = vpop.f32.mrf.mxu2 }
 0x16a   :  { %4620 = vmatmul.msk.f32.gmra.mxu3 %vm653_vm4, %v1279_v15  ;;  %v1564_v15 = vrot.slane %v6175_v50, 7 }
 0x16c   :  { %v1565_v42 = vsel %vm1536_vm1, %v1562_v39, %v1564_v15 }
 0x16d   :  { %4597 = vmatmul.msk.f32.gmra.mxu2 %vm653_vm4, %v1138_v57  ;;  %4641 = vmatmul.msk.f32.gmra.mxu0 %vm653_vm4, %v1417_v1  ;;  %v6402_v57 = vpop.f32.mrf.mxu3  ;;  %v6406_v1 = vpop.f32.mrf.mxu0 }
 0x16e   :  { %4663 = vmatmul.msk.f32.gmra.mxu1 %vm653_vm4, %v1557_v53  ;;  %v6410_v53 = vpop.f32.mrf.mxu1 }
 0x170   :  { %v6338_v3 = vpop.f32.mrf.mxu2 }
 0x172   :  { %4621 = vmatmul.msk.f32.gmra.mxu3 %vm653_vm4, %v1281_v4 }
 0x175   :  { %4598 = vmatmul.msk.f32.gmra.mxu2 %vm653_vm4, %v1140_v32  ;;  %4642 = vmatmul.msk.f32.gmra.mxu0 %vm653_vm4, %v1419_v55  ;;  %v6414_v2 = vpop.f32.mrf.mxu3  ;;  %v6418_v31 = vpop.f32.mrf.mxu0 }
 0x176   :  { %4664 = vmatmul.msk.f32.gmra.mxu1 %vm653_vm4, %v1559_v11  ;;  %v6422_v4 = vpop.f32.mrf.mxu1 }
 0x178   :  { %v6361_v17 = vpop.f32.mrf.mxu2 }
 0x17a   :  { %4622 = vmatmul.msk.f32.gmra.mxu3 %vm653_vm4, %v1283_v26 }
 0x17d   :  { %4599 = vmatmul.msk.f32.gmra.mxu2 %vm653_vm4, %v1142_v29  ;;  %4643 = vmatmul.msk.f32.gmra.mxu0 %vm653_vm4, %v1421_v62  ;;  %v6424_v61 = vpop.f32.mrf.mxu3 }
 0x17e   :  { %4665 = vmatmul.msk.f32.gmra.mxu1 %vm653_vm4, %v1561_v30  ;;  %v6433_v9 = vpop.f32.mrf.mxu1 }
 0x180   :  { %v6378_v51 = vpop.f32.mrf.mxu2 }
 0x182   :  { %4623 = vmatmul.msk.f32.gmra.mxu3 %vm653_vm4, %v1285_v33 }
 0x185   :  { %4600 = vmatmul.msk.f32.gmra.mxu2 %vm653_vm4, %v1144_v40  ;;  %4644 = vmatmul.msk.f32.gmra.mxu0 %vm653_vm4, %v1423_v14 }
 0x186   :  { %4666 = vmatmul.msk.f32.gmra.mxu1 %vm653_vm4, %v1563_v43 }
 0x188   :  { %v6391_v44 = vpop.f32.mrf.mxu2 }
 0x18d   :  { %4601 = vmatmul.msk.f32.gmra.mxu2 %vm653_vm4, %v1146_v48  ;;  %4645 = vmatmul.msk.f32.gmra.mxu0 %vm653_vm4, %v1425_v60 }
 0x18e   :  { %4667 = vmatmul.msk.f32.gmra.mxu1 %vm653_vm4, %v1565_v42 }
 0x190   :  { %v6404_v0 = vpop.f32.mrf.mxu2 }
 0x195   :  { %4676 = vmatmul.msk.f32.vlgmr.msra.gmra.mxu2 %vm653_vm4, %v5738_v63  ;;  %v6428_v63 = vpop.f32.mrf.mxu0 }
 0x198   :  { %v6412_v34 = vpop.f32.mrf.mxu2 }
 0x19d   :  { %4677 = vmatmul.msk.f32.gmra.mxu2 %vm653_vm4, %v5765_v28  ;;  %v6437_v28 = vpop.f32.mrf.mxu3  ;;  %v6442_v5 = vpop.f32.mrf.mxu0 }
 0x1a0   :  { %v6420_v59 = vpop.f32.mrf.mxu2 }
 0x1a5   :  { %4678 = vmatmul.msk.f32.gmra.mxu2 %vm653_vm4, %v5790_v56  ;;  %v6446_v56 = vpop.f32.mrf.mxu1 }
 0x1a8   :  { %v1192_v7 = vpop.f32.mrf.mxu2 }
 0x1a9   :  { %v6431_v32 = vadd.f32 %v1192_v7, %v6240_v18  ;;  %v6448_v18 = vpop.f32.mrf.mxu3 }
 0x1ab   :  { %9363 = vst [vmem:[#allocation3_spill] sm:$0xff] %v6431_v32 }
 0x1ad   :  { %4679 = vmatmul.msk.f32.gmra.mxu2 %vm653_vm4, %v5815_v19  ;;  %v6453_v19 = vpop.f32.mrf.mxu0 }
 0x1b0   :  { %v1195_v55 = vpop.f32.mrf.mxu2 }
 0x1b1   :  { %v6440_v11 = vadd.f32 %v1195_v55, %v6254_v38  ;;  %v6457_v38 = vpop.f32.mrf.mxu1 }
 0x1b3   :  { %9364 = vst [vmem:[#allocation4_spill] sm:$0xff] %v6440_v11 }
 0x1b5   :  { %4680 = vmatmul.msk.f32.gmra.mxu2 %vm653_vm4, %v5840_v47  ;;  %v6462_v47 = vpop.f32.mrf.mxu3  ;;  %v6466_v12 = vpop.f32.mrf.mxu0 }
 0x1b8   :  { %v1198_v16 = vpop.f32.mrf.mxu2 }
 0x1b9   :  { %v6451_v20 = vadd.f32 %v1198_v16, %v6268_v58  ;;  %v6470_v27 = vpop.f32.mrf.mxu1 }
 0x1bb   :  { %9365 = vst [vmem:[#allocation5_spill] sm:$0xff] %v6451_v20 }
 0x1bd   :  { %4681 = vmatmul.msk.f32.gmra.mxu2 %vm653_vm4, %v5865_v13  ;;  %v6472_v29 = vpop.f32.mrf.mxu3  ;;  %v6476_v13 = vpop.f32.mrf.mxu0 }
 0x1c0   :  { %v1201_v22 = vpop.f32.mrf.mxu2 }
 0x1c1   :  { %v6460_v26 = vadd.f32 %v1201_v22, %v6282_v23  ;;  %v6480_v62 = vpop.f32.mrf.mxu1 }
 0x1c3   :  { %9366 = vst [vmem:[#allocation6_spill] sm:$0xff] %v6460_v26 }
 0x1c5   :  { %4682 = vmatmul.msk.f32.gmra.mxu2 %vm653_vm4, %v5890_v41  ;;  %v6484_v41 = vpop.f32.mrf.mxu3  ;;  %v6488_v24 = vpop.f32.mrf.mxu0 }
 0x1c8   :  { %v6468_v58 = vpop.f32.mrf.mxu2 }
 0x1c9   :  { %9367 = vst [vmem:[#allocation7_spill] sm:$0xff] %v6468_v58  ;;  %v6492_v6 = vpop.f32.mrf.mxu1 }
 0x1cd   :  { %4683 = vmatmul.msk.f32.gmra.mxu2 %vm653_vm4, %v5915_v10  ;;  %v6494_v10 = vpop.f32.mrf.mxu3  ;;  %v6498_v36 = vpop.f32.mrf.mxu0 }
 0x1d0   :  { %v6478_v23 = vpop.f32.mrf.mxu2 }
 0x1d5   :  { %4684 = vmatmul.msk.f32.gmra.mxu2 %vm653_vm4, %v5949_v25  ;;  %v6502_v25 = vpop.f32.mrf.mxu1  ;;  %v6506_v40 = vpop.f32.mrf.mxu3 }
 0x1d8   :  { %v6486_v30 = vpop.f32.mrf.mxu2 }
 0x1dd   :  { %4685 = vmatmul.msk.f32.gmra.mxu2 %vm653_vm4, %v6002_v21  ;;  %v6510_v21 = vpop.f32.mrf.mxu0  ;;  %v6514_v43 = vpop.f32.mrf.mxu1 }
 0x1de   :  { %v6516_v37 = vpop.f32.mrf.mxu3 }
 0x1df   :  { %9368 = vst [vmem:[#allocation8_spill] sm:$0xff] %v6516_v37 }
 0x1e0   :  { %v6496_v33 = vpop.f32.mrf.mxu2 }
 0x1e5   :  { %4686 = vmatmul.msk.f32.gmra.mxu2 %vm653_vm4, %v6081_v49  ;;  %v6520_v49 = vpop.f32.mrf.mxu0  ;;  %v6524_v15 = vpop.f32.mrf.mxu1 }
 0x1e6   :  { %9369 = vst [vmem:[#allocation9_spill] sm:$0xff] %v6520_v49 }
 0x1e7   :  { %9370 = vst [vmem:[#allocation10_spill] sm:$0xff] %v6524_v15 }
 0x1e8   :  { %v6504_v39 = vpop.f32.mrf.mxu2 }
 0x1ed   :  { %4687 = vmatmul.msk.f32.gmra.mxu2 %vm653_vm4, %v6139_v46  ;;  %v6528_v46 = vpop.f32.mrf.mxu3  ;;  %v6530_v60 = vpop.f32.mrf.mxu0 }
 0x1ee   :  { %9371 = vst [vmem:[#allocation11_spill] sm:$0xff] %v6528_v46  ;;  %v6532_v42 = vpop.f32.mrf.mxu1 }
 0x1ef   :  { %9372 = vst [vmem:[#allocation12_spill] sm:$0xff] %v6530_v60 }
 0x1f0   :  { %v6512_v14 = vpop.f32.mrf.mxu2  ;;  %9373 = vst [vmem:[#allocation13_spill] sm:$0xff] %v6532_v42 }
 0x1f5   :  { %4688 = vmatmul.msk.f32.gmra.mxu2 %vm653_vm4, %v6156_v8  ;;  %v6534_v7 = vpop.f32.mrf.mxu3  ;;  %v6538_v8 = vpop.f32.mrf.mxu0 }
 0x1f6   :  { %9374 = vst [vmem:[#allocation14_spill] sm:$0xff] %v6534_v7  ;;  %v6540_v16 = vpop.f32.mrf.mxu1 }
 0x1f7   :  { %9375 = vst [vmem:[#allocation15_spill] sm:$0xff] %v6538_v8 }
 0x1f8   :  { %v6522_v52 = vpop.f32.mrf.mxu2  ;;  %9376 = vst [vmem:[#allocation16_spill] sm:$0xff] %v6540_v16 }
 0x1fd   :  { %4689 = vmatmul.msk.f32.gmra.mxu2 %vm653_vm4, %v6175_v50  ;;  %v6544_v15 = vpop.f32.mrf.mxu3  ;;  %v6546_v50 = vpop.f32.mrf.mxu0 }
 0x1fe   :  { %9377 = vst [vmem:[#allocation17_spill] sm:$0xff] %v6544_v15  ;;  %v6550_v37 = vpop.f32.mrf.mxu1 }
 0x1ff   :  { %9378 = vst [vmem:[#allocation18_spill] sm:$0xff] %v6546_v50 }
 0x200   :  { %v1225_v48 = vpop.f32.mrf.mxu2  ;;  %9380 = vst [vmem:[#allocation20_spill] sm:$0xff] %v6550_v37 }
 0x205   :  { %v6552_v60 = vpop.f32.mrf.mxu3  ;;  %v6554_v42 = vpop.f32.mrf.mxu0 }
 0x206   :  { %9381 = vst [vmem:[#allocation21_spill] sm:$0xff] %v6552_v60  ;;  %v6558_v46 = vpop.f32.mrf.mxu1 }
 0x207   :  { %9382 = vst [vmem:[#allocation22_spill] sm:$0xff] %v6554_v42 }
 0x208   :  { %v6536_v55 = vpop.f32.mrf.mxu2  ;;  %9384 = vst [vmem:[#allocation24_spill] sm:$0xff] %v6558_v46 }
 0x20d   :  { %v6560_v8 = vpop.f32.mrf.mxu3  ;;  %v6564_v11 = vpop.f32.mrf.mxu0 }
 0x20e   :  { %9385 = vst [vmem:[#allocation25_spill] sm:$0xff] %v6560_v8  ;;  %v6566_v7 = vpop.f32.mrf.mxu1 }
 0x20f   :  { %9387 = vst [vmem:[#allocation27_spill] sm:$0xff] %v6564_v11 }
 0x210   :  { %v6542_v22 = vpop.f32.mrf.mxu2  ;;  %9388 = vst [vmem:[#allocation28_spill] sm:$0xff] %v6566_v7 }
 0x215   :  { %v6568_v50 = vpop.f32.mrf.mxu3  ;;  %v6572_v37 = vpop.f32.mrf.mxu0 }
 0x216   :  { %9389 = vst [vmem:[#allocation29_spill] sm:$0xff] %v6568_v50  ;;  %v6574_v20 = vpop.f32.mrf.mxu1 }
 0x217   :  { %9391 = vst [vmem:[#allocation31_spill] sm:$0xff] %v6572_v37 }
 0x218   :  { %v6548_v49 = vpop.f32.mrf.mxu2  ;;  %9392 = vst [vmem:[#allocation32_spill] sm:$0xff] %v6574_v20 }
 0x219   :  { %9379 = vst [vmem:[#allocation19_spill] sm:$0xff] %v6548_v49 }
 0x21d   :  { %v6580_v46 = vpop.f32.mrf.mxu0 }
 0x21e   :  { %9394 = vst [vmem:[#allocation34_spill] sm:$0xff] %v6580_v46 }
 0x220   :  { %v6556_v32 = vpop.f32.mrf.mxu2 }
 0x221   :  { %9383 = vst [vmem:[#allocation23_spill] sm:$0xff] %v6556_v32  ;;  %v6578_v32 = vpop.f32.mrf.mxu3 }
 0x225   :  { %v6586_v7 = vpop.f32.mrf.mxu0 }
 0x226   :  { %9397 = vst [vmem:[#allocation37_spill] sm:$0xff] %v6586_v7 }
 0x228   :  { %v6562_v16 = vpop.f32.mrf.mxu2 }
 0x229   :  { %9386 = vst [vmem:[#allocation26_spill] sm:$0xff] %v6562_v16  ;;  %v6584_v16 = vpop.f32.mrf.mxu1  ;;  %v1355_v11 = vpop.f32.mrf.mxu3 }
 0x22a   :  { %9396 = vst [vmem:[#allocation36_spill] sm:$0xff] %v6584_v16  ;;  %v817_v16 = vadd.f32 %v6472_v29, %v6391_v44  ;;  %v808_v44 = vadd.f32 %v6437_v28, %v6338_v3 }
 0x22c   :  { %v961_v3 = vadd.f32 %v6442_v5, %v808_v44 }
 0x22d   :  { %v1498_v20 = vpop.f32.mrf.mxu0 }
 0x230   :  { %v6570_v49 = vpop.f32.mrf.mxu2 }
 0x231   :  { %9390 = vst [vmem:[#allocation30_spill] sm:$0xff] %v6570_v49  ;;  %v6590_v49 = vpop.f32.mrf.mxu1  ;;  %v1358_v37 = vpop.f32.mrf.mxu3 }
 0x232   :  { %9399 = vst [vmem:[#allocation39_spill] sm:$0xff] %v6590_v49 }
 0x235   :  { %v1501_v46 = vpop.f32.mrf.mxu0 }
 0x238   :  { %v6576_v42 = vpop.f32.mrf.mxu2 }
 0x239   :  { %9393 = vst [vmem:[#allocation33_spill] sm:$0xff] %v6576_v42  ;;  %v6594_v42 = vpop.f32.mrf.mxu1  ;;  %v1361_v8 = vpop.f32.mrf.mxu3 }
 0x23a   :  { %9401 = vst [vmem:[#allocation41_spill] sm:$0xff] %v6594_v42  ;;  %v823_v42 = vadd.f32 %v6494_v10, %v6412_v34 }
 0x240   :  { %v6582_v15 = vpop.f32.mrf.mxu2 }
 0x241   :  { %9395 = vst [vmem:[#allocation35_spill] sm:$0xff] %v6582_v15  ;;  %v820_v15 = vadd.f32 %v6484_v41, %v6404_v0  ;;  %v1641_v49 = vpop.f32.mrf.mxu1  ;;  %v1364_v58 = vpop.f32.mrf.mxu3  ;;  %v964_v0 = vadd.f32 %v6476_v13, %v817_v16  ;;  %v805_v41 = vadd.f32 %v6424_v61, %v6315_v45  ;;  %v799_v61 = vadd.f32 %v6402_v57, %v6284_v54 }
 0x243   :  { %v1104_v10 = vadd.f32 %v6480_v62, %v964_v0  ;;  %v958_v57 = vadd.f32 %v6406_v1, %v799_v61 }
 0x245   :  { %v1244_v13 = vadd.f32 %v6522_v52, %v1104_v10  ;;  %v9409_v10 = vld [vmem:[#allocation21_spill] sm:$0xff] }
 0x247   :  { %v1383_v54 = vadd.f32 %v1361_v8, %v1244_v13 }
 0x248   :  { %v6588_v26 = vpop.f32.mrf.mxu2 }
 0x249   :  { %9398 = vst [vmem:[#allocation38_spill] sm:$0xff] %v6588_v26  ;;  %v814_v26 = vadd.f32 %v6462_v47, %v6378_v51  ;;  %v966_v51 = vadd.f32 %v6498_v36, %v823_v42  ;;  %v1367_v36 = vpop.f32.mrf.mxu3  ;;  %v1098_v42 = vadd.f32 %v6410_v53, %v958_v57  ;;  %v9418_v57 = vld [vmem:[#allocation14_spill] sm:$0xff] }
 0x24b   :  { %v963_v29 = vadd.f32 %v6466_v12, %v814_v26  ;;  %v826_v12 = vadd.f32 %v6506_v40, %v6420_v59  ;;  %v1106_v45 = vadd.f32 %v6502_v25, %v966_v51  ;;  %v1101_v59 = vadd.f32 %v6446_v56, %v961_v3 }
 0x24d   :  { %v1103_v28 = vadd.f32 %v6470_v27, %v963_v29  ;;  %v1246_v27 = vadd.f32 %v6536_v55, %v1106_v45  ;;  %v967_v25 = vadd.f32 %v6510_v21, %v826_v12  ;;  %v9406_v29 = vld [vmem:[#allocation25_spill] sm:$0xff]  ;;  %v9411_v12 = vld [vmem:[#allocation39_spill] sm:$0xff] }
 0x24f   :  { %v1243_v62 = vadd.f32 %v6512_v14, %v1103_v28  ;;  %v1241_v14 = vadd.f32 %v6496_v33, %v1101_v59  ;;  %v1107_v21 = vadd.f32 %v6514_v43, %v967_v25 }
 0x250   :  { %v6592_v60 = vpop.f32.mrf.mxu2 }
 0x251   :  { %9400 = vst [vmem:[#allocation40_spill] sm:$0xff] %v6592_v60  ;;  %v965_v60 = vadd.f32 %v6488_v24, %v820_v15  ;;  %v1504_v24 = vpop.f32.mrf.mxu0  ;;  %v1370_v51 = vpop.f32.mrf.mxu3 }
 0x253   :  { %v1105_v47 = vadd.f32 %v6492_v6, %v965_v60 }
 0x258   :  { %v6596_v50 = vpop.f32.mrf.mxu2 }
 0x259   :  { %9402 = vst [vmem:[#allocation42_spill] sm:$0xff] %v6596_v50  ;;  %v811_v50 = vadd.f32 %v6448_v18, %v6361_v17  ;;  %v1245_v17 = vadd.f32 %v1225_v48, %v1105_v47  ;;  %v802_v18 = vadd.f32 %v6414_v2, %v6301_v35  ;;  %v1644_v35 = vpop.f32.mrf.mxu1  ;;  %v1507_v56 = vpop.f32.mrf.mxu0 }
 0x25b   :  { %v962_v34 = vadd.f32 %v6453_v19, %v811_v50  ;;  %v960_v19 = vadd.f32 %v6428_v63, %v805_v41  ;;  %v1384_v5 = vadd.f32 %v1364_v58, %v1245_v17  ;;  %v959_v6 = vadd.f32 %v6418_v31, %v802_v18  ;;  %v9410_v18 = vld [vmem:[#allocation31_spill] sm:$0xff] }
 0x25c   :  { %v1385_v58 = vadd.f32 %v1367_v36, %v1246_v27  ;;  %v9415_v27 = vld [vmem:[#allocation36_spill] sm:$0xff] }
 0x25d   :  { %v1102_v2 = vadd.f32 %v6457_v38, %v962_v34  ;;  %v1100_v63 = vadd.f32 %v6433_v9, %v960_v19  ;;  %v1382_v38 = vadd.f32 %v1358_v37, %v1243_v62  ;;  %v1524_v52 = vadd.f32 %v1504_v24, %v1384_v5  ;;  %v9412_v19 = vld [vmem:[#allocation6_spill] sm:$0xff]  ;;  %v9413_v62 = vld [vmem:[#allocation17_spill] sm:$0xff]  ;;  %v9414_v5 = vld [vmem:[#allocation27_spill] sm:$0xff] }
 0x25e   :  { %v1099_v15 = vadd.f32 %v6422_v4, %v959_v6  ;;  %v1380_v9 = vadd.f32 %v6578_v32, %v1241_v14  ;;  %v1247_v37 = vadd.f32 %v6542_v22, %v1107_v21  ;;  %v1525_v8 = vadd.f32 %v1507_v56, %v1385_v58  ;;  %v9403_v4 = vld [vmem:[#allocation7_spill] sm:$0xff]  ;;  %v9408_v32 = vld [vmem:[#allocation41_spill] sm:$0xff]  ;;  %v6658_v22 = vld [vmem:[%s9337_s5] ss:$0 sm:$0xff] }
 0x25f   :  { %v1242_v40 = vadd.f32 %v6504_v39, %v1102_v2  ;;  %v1240_v31 = vadd.f32 %v6486_v30, %v1100_v63  ;;  %v1523_v39 = vadd.f32 %v1501_v46, %v1383_v54  ;;  %v1522_v33 = vadd.f32 %v1498_v20, %v1382_v38  ;;  %v9404_v30 = vld [vmem:[#allocation29_spill] sm:$0xff]  ;;  %v9419_v14 = vld [vmem:[#allocation22_spill] sm:$0xff]  ;;  %v9420_v58 = vld [vmem:[#allocation32_spill] sm:$0xff] }
 0x260   :  { %v6604_v7 = vpop.f32.mrf.mxu2  ;;  %v1239_v1 = vadd.f32 %v6478_v23, %v1099_v15  ;;  %v1664_v55 = vadd.f32 %v1644_v35, %v1524_v52  ;;  %v1238_v16 = vadd.f32 %v9403_v4, %v1098_v42  ;;  %v9407_v23 = vld [vmem:[#allocation34_spill] sm:$0xff]  ;;  %v1386_v41 = vadd.f32 %v1370_v51, %v1247_v37  ;;  %v9417_v54 = vld [vmem:[#allocation5_spill] sm:$0xff]  ;;  %v9422_v21 = vld [vmem:[#allocation4_spill] sm:$0xff] }
 0x261   :  { %v1381_v60 = vadd.f32 %v1355_v11, %v1242_v40  ;;  %v1379_v50 = vadd.f32 %v9404_v30, %v1240_v31  ;;  %v1647_v0 = vpop.f32.mrf.mxu1  ;;  %v9405_v11 = vld [vmem:[#allocation37_spill] sm:$0xff]  ;;  %v1663_v43 = vadd.f32 %v1641_v49, %v1523_v39  ;;  %v1520_v47 = vadd.f32 %v9407_v23, %v1380_v9  ;;  %v1510_v2 = vpop.f32.mrf.mxu0  ;;  %v9416_v59 = vld [vmem:[#allocation42_spill] sm:$0xff]  ;;  %v9421_v31 = vld [vmem:[#allocation40_spill] sm:$0xff] }
 0x262   :  { %v1378_v53 = vadd.f32 %v9406_v29, %v1239_v1  ;;  %v1662_v20 = vadd.f32 %v9408_v32, %v1522_v33  ;;  %v1665_v34 = vadd.f32 %v1647_v0, %v1525_v8  ;;  %v1377_v17 = vadd.f32 %v9409_v10, %v1238_v16  ;;  %v9423_v39 = vld [vmem:[#allocation11_spill] sm:$0xff]  ;;  %v9424_v9 = vld [vmem:[#allocation18_spill] sm:$0xff]  ;;  %v9425_v37 = vld [vmem:[#allocation28_spill] sm:$0xff] }
 0x263   :  { %v1521_v44 = vadd.f32 %v9405_v11, %v1381_v60  ;;  %v1519_v49 = vadd.f32 %v9410_v18, %v1379_v50  ;;  %v1376_v35 = vadd.f32 %v9413_v62, %v9412_v19  ;;  %v1660_v6 = vadd.f32 %v9415_v27, %v1520_v47  ;;  %v9426_v8 = vld [vmem:[#allocation38_spill] sm:$0xff]  ;;  %v9427_v11 = vld [vmem:[#allocation3_spill] sm:$0xff]  ;;  %v9432_v10 = vld [vmem:[#allocation12_spill] sm:$0xff] }
 0x264   :  { %v1746_v3 = vadd.f32 %v6604_v7, %v1662_v20  ;;  %v1526_v40 = vadd.f32 %v1510_v2, %v1386_v41  ;;  %v1375_v63 = vadd.f32 %v9418_v57, %v9417_v54  ;;  %v1517_v38 = vadd.f32 %v9419_v14, %v1377_v17  ;;  %v9431_v32 = vld [vmem:[#allocation35_spill] sm:$0xff]  ;;  %v9433_v18 = vld [vmem:[#allocation20_spill] sm:$0xff]  ;;  %v9435_v62 = vld [vmem:[#allocation9_spill] sm:$0xff] }
 0x265   :  { %v1661_v13 = vadd.f32 %v9411_v12, %v1521_v44  ;;  %v1659_v52 = vadd.f32 %v9420_v58, %v1519_v49  ;;  %v1744_v56 = vadd.f32 %v9421_v31, %v1660_v6  ;;  %v1374_v42 = vadd.f32 %v9423_v39, %v9422_v21  ;;  %v9428_v44 = vld [vmem:[#allocation8_spill] sm:$0xff]  ;;  %v9438_v54 = vld [vmem:[#allocation13_spill] sm:$0xff] }
 0x266   :  { %v6683_v15 = vadd.f32 %v6658_v22, %v1746_v3  ;;  %v1516_v33 = vadd.f32 %v9424_v9, %v1376_v35  ;;  %v9434_v3 = vld [vmem:[#allocation33_spill] sm:$0xff]  ;;  %v9436_v2 = vld [vmem:[#allocation16_spill] sm:$0xff] }
 0x267   :  { %v1745_v36 = vadd.f32 %v9416_v59, %v1661_v13  ;;  %v1743_v4 = vadd.f32 %v9426_v8, %v1659_v52  ;;  %v6704_v41 = vadd.f32 %v6658_v22, %v1744_v56  ;;  %v1514_v17 = vadd.f32 %v9432_v10, %v1374_v42  ;;  %v9440_v56 = vld [vmem:[#allocation10_spill] sm:$0xff] }
 0x268   :  { %v1725_v26 = vpop.f32.mrf.mxu2  ;;  %v1792_v23 = vmin.f32 %v6683_v15, 0.0  ;;  %v1656_v49 = vadd.f32 %v9433_v18, %v1516_v33  ;;  %v9442_v33 = vld [vmem:[#allocation19_spill] sm:$0xff]  ;;  %vm1778_vm10 = vcmp.gt.f32.partialorder %v6683_v15, 0.0 }
 0x269   :  { %v1747_v24 = vadd.f32 %v1725_v26, %v1663_v43  ;;  %v1518_v26 = vadd.f32 %v9414_v5, %v1378_v53  ;;  %v1650_v1 = vpop.f32.mrf.mxu1  ;;  %v6694_v16 = vadd.f32 %v6658_v22, %v1745_v36  ;;  %v1373_v43 = vadd.f32 %v9428_v44, %v9427_v11  ;;  %v9430_v53 = vld [vmem:[#allocation24_spill] sm:$0xff] }
 0x26a   :  { %v1666_v0 = vadd.f32 %v1650_v1, %v1526_v40  ;;  %v1657_v51 = vadd.f32 %v9430_v53, %v1517_v38  ;;  %v6710_v12 = vadd.f32 %v6658_v22, %v1743_v4  ;;  %v1815_v6 = vmul.f32 1.442695, %v1792_v23 }
 0x26b   :  { %v6673_v25 = vadd.f32 %v6658_v22, %v1747_v24  ;;  %v1791_v13 = vmin.f32 %v6694_v16, 0.0  ;;  %v1513_v35 = vadd.f32 %v9435_v62, %v1373_v43  ;;  %v1790_v36 = vmin.f32 %v6704_v41, 0.0 }
 0x26c   :  { %v1654_v57 = vadd.f32 %v9438_v54, %v1514_v17  ;;  %v1789_v58 = vmin.f32 %v6710_v12, 0.0  ;;  %vm1777_vm11 = vcmp.gt.f32.partialorder %v6694_v16, 0.0  ;;  %vm1776_vm12 = vcmp.gt.f32.partialorder %v6704_v41, 0.0 }
 0x26d   :  { %v1793_v30 = vmin.f32 %v6673_v25, 0.0  ;;  %v1813_v52 = vmul.f32 1.442695, %v1791_v13  ;;  %v1811_v9 = vmul.f32 1.442695, %v1790_v36  ;;  %vm1779_vm6 = vcmp.gt.f32.partialorder %v6673_v25, 0.0 }
 0x26e   :  { %vm1775_vm13 = vcmp.gt.f32.partialorder %v6710_v12, 0.0 }
 0x270   :  { %v1728_v48 = vpop.f32.mrf.mxu2 }
 0x271   :  { %v1748_v46 = vadd.f32 %v1728_v48, %v1664_v55  ;;  %v1658_v55 = vadd.f32 %v9425_v37, %v1518_v26  ;;  %v9437_v26 = vld [vmem:[#allocation30_spill] sm:$0xff] }
 0x272   :  { %v1740_v27 = vadd.f32 %v9437_v26, %v1656_v49 }
 0x273   :  { %v6665_v45 = vadd.f32 %v6658_v22, %v1748_v46  ;;  %v9429_v46 = vld [vmem:[#allocation15_spill] sm:$0xff]  ;;  %v1742_v20 = vadd.f32 %v9431_v32, %v1658_v55 }
 0x274   :  { %v1515_v29 = vadd.f32 %v9429_v46, %v1375_v63  ;;  %v9439_v63 = vld [vmem:[#allocation26_spill] sm:$0xff]  ;;  %v6730_v42 = vadd.f32 %v6658_v22, %v1740_v27 }
 0x275   :  { %v1794_v48 = vmin.f32 %v6665_v45, 0.0  ;;  %v6718_v59 = vadd.f32 %v6658_v22, %v1742_v20  ;;  %vm1780_vm5 = vcmp.gt.f32.partialorder %v6665_v45, 0.0 }
 0x276   :  { %v1655_v5 = vadd.f32 %v9436_v2, %v1515_v29  ;;  %v1786_v44 = vmin.f32 %v6730_v42, 0.0 }
 0x277   :  { %v1819_v24 = vmul.f32 1.442695, %v1794_v48  ;;  %v1653_v48 = vadd.f32 %v9440_v56, %v1513_v35  ;;  %v1788_v1 = vmin.f32 %v6718_v59, 0.0 }
 0x278   :  { %v1731_v28 = vpop.f32.mrf.mxu2  ;;  %v1739_v14 = vadd.f32 %v9439_v63, %v1655_v5  ;;  %v1803_v17 = vmul.f32 1.442695, %v1786_v44 }
 0x279   :  { %v1749_v61 = vadd.f32 %v1731_v28, %v1665_v34  ;;  %v1741_v28 = vadd.f32 %v9434_v3, %v1657_v51  ;;  %v1737_v37 = vadd.f32 %v9442_v33, %v1653_v48  ;;  %v1807_v43 = vmul.f32 1.442695, %v1788_v1 }
 0x27a   :  { %v6735_v8 = vadd.f32 %v6658_v22, %v1739_v14 }
 0x27b   :  { %v6676_v7 = vadd.f32 %v6658_v22, %v1749_v61  ;;  %v1817_v61 = vmul.f32 1.442695, %v1793_v30  ;;  %v6724_v38 = vadd.f32 %v6658_v22, %v1741_v28  ;;  %v1809_v30 = vmul.f32 1.442695, %v1789_v58 }
 0x27c   :  { %v6743_v29 = vadd.f32 %v6658_v22, %v1737_v37  ;;  %v1785_v23 = vmin.f32 %v6735_v8, 0.0 }
 0x27d   :  { %v1795_v60 = vmin.f32 %v6676_v7, 0.0  ;;  %v1787_v4 = vmin.f32 %v6724_v38, 0.0  ;;  %vm1781_vm3 = vcmp.gt.f32.partialorder %v6676_v7, 0.0 }
 0x27e   :  { %v1783_v18 = vmin.f32 %v6743_v29, 0.0  ;;  %v1801_v13 = vmul.f32 1.442695, %v1785_v23 }
 0x27f   :  { %v1821_v50 = vmul.f32 1.442695, %v1795_v60  ;;  %v9441_v60 = vld [vmem:[#allocation23_spill] sm:$0xff] }
 0x280   :  { %v1734_v47 = vpop.f32.mrf.mxu2  ;;  %v1738_v21 = vadd.f32 %v9441_v60, %v1654_v57  ;;  %v1797_v57 = vmul.f32 1.442695, %v1783_v18 }
 0x281   :  { %v1750_v34 = vadd.f32 %v1734_v47, %v1666_v0  ;;  %5325 = vpow2.f32 %v1821_v50  ;;  %v1805_v47 = vmul.f32 1.442695, %v1787_v4 }
 0x282   :  { %5327 = vpow2.f32 %v1819_v24  ;;  %v6739_v11 = vadd.f32 %v6658_v22, %v1738_v21 }
 0x283   :  { %v1768_v19 = vadd.f32 %v6658_v22, %v1750_v34  ;;  %5329 = vpow2.f32 %v1817_v61 }
 0x284   :  { %5331 = vpow2.f32 %v1815_v6  ;;  %v1784_v10 = vmin.f32 %v6739_v11, 0.0 }
 0x285   :  { %v1796_v40 = vmin.f32 %v1768_v19, 0.0  ;;  %vm1782_vm2 = vcmp.gt.f32.partialorder %v1768_v19, 0.0 }
 0x286   :  { %v1799_v26 = vmul.f32 1.442695, %v1784_v10 }
 0x287   :  { %v1823_v31 = vmul.f32 1.442695, %v1796_v40  ;;  %v5326_v39 = vpop.eup %5325 }
 0x288   :  { %v5328_v55 = vpop.eup %5327  ;;  %v4702_v50 = vadd.f32 -1.0, %v5326_v39 }
 0x289   :  { %5333 = vpow2.f32 %v1823_v31  ;;  %v5330_v0 = vpop.eup %5329  ;;  %v4701_v53 = vadd.f32 -1.0, %v5328_v55 }
 0x28a   :  { %5335 = vpow2.f32 %v1813_v52  ;;  %v5332_v46 = vpop.eup %5331  ;;  %v1851_v20 = vmul.f32 1.6732632, %v4702_v50  ;;  %v4700_v24 = vadd.f32 -1.0, %v5330_v0 }
 0x28b   :  { %5337 = vpow2.f32 %v1811_v9  ;;  %v1850_v3 = vmul.f32 1.6732632, %v4701_v53  ;;  %v4699_v22 = vadd.f32 -1.0, %v5332_v46 }
 0x28c   :  { %5339 = vpow2.f32 %v1809_v30  ;;  %v1865_v62 = vsel %vm1781_vm3, %v6676_v7, %v1851_v20  ;;  %v1849_v35 = vmul.f32 1.6732632, %v4700_v24  ;;  %vm1773_vm3 = vcmp.gt.f32.partialorder %v6724_v38, 0.0 }
 0x28d   :  { %5341 = vpow2.f32 %v1807_v43  ;;  %v1864_v6 = vsel %vm1780_vm5, %v6665_v45, %v1850_v3  ;;  %v1848_v36 = vmul.f32 1.6732632, %v4699_v22  ;;  %v1879_v63 = vmul.f32 1.050701, %v1865_v62  ;;  %v1978_v3 = vld [vmem:[%s9339_s7 + $0xf0] sm:$0xff]  ;;  %v1979_v22 = vld [vmem:[%s9339_s7 + $0xf8] sm:$0xff] }
 0x28e   :  { %5343 = vpow2.f32 %v1805_v47  ;;  %v1863_v7 = vsel %vm1779_vm6, %v6673_v25, %v1849_v35  ;;  %v1878_v52 = vmul.f32 1.050701, %v1864_v6  ;;  %vm1772_vm5 = vcmp.gt.f32.partialorder %v6730_v42, 0.0  ;;  %2106 = vmatpush.msrb.mxu0 %v1978_v3  ;;  %2141 = vmatpush.msrb.mxu1 %v1979_v22  ;;  %v1975_v62 = vld [vmem:[%s9339_s7 + $0xd8] sm:$0xff]  ;;  %v1972_v35 = vld [vmem:[%s9339_s7 + $0xc0] sm:$0xff]  ;;  %v4713_v3 = vld [vmem:[%s9339_s7 + $0x110] sm:$0xff] }
 0x28f   :  { %v5334_v51 = vpop.eup %5333  ;;  %5345 = vpow2.f32 %v1803_v17  ;;  %v1862_v45 = vsel %vm1778_vm10, %v6683_v15, %v1848_v36  ;;  %v1877_v60 = vmul.f32 1.050701, %v1863_v7  ;;  %vm1771_vm6 = vcmp.gt.f32.partialorder %v6735_v8, 0.0  ;;  %v4771_v6 = vld [vmem:[%s9339_s7 + $0x2e0] sm:$0xff]  ;;  %v1970_v36 = vld [vmem:[%s9339_s7 + $0xb0] sm:$0xff]  ;;  %v1969_v7 = vld [vmem:[%s9339_s7 + $0xa8] sm:$0xff] }
 0x290   :  { %v4703_v32 = vadd.f32 -1.0, %v5334_v51  ;;  %v5336_v34 = vpop.eup %5335  ;;  %5347 = vpow2.f32 %v1801_v13  ;;  %v1876_v9 = vmul.f32 1.050701, %v1862_v45  ;;  %vm1770_vm10 = vcmp.gt.f32.partialorder %v6739_v11, 0.0  ;;  %v1977_v13 = vld [vmem:[%s9339_s7 + $0xe8] sm:$0xff]  ;;  %v4735_v45 = vld [vmem:[%s9339_s7 + $0x1c0] sm:$0xff] }
 0x291   :  { %v5338_v28 = vpop.eup %5337  ;;  %v4698_v2 = vadd.f32 -1.0, %v5336_v34  ;;  %5349 = vpow2.f32 %v1799_v26  ;;  %2142 = vmatpush.msrb.mxu1 %v1977_v13  ;;  %v4773_v26 = vld [vmem:[%s9339_s7 + $0x2f0] sm:$0xff]  ;;  %v4743_v13 = vld [vmem:[%s9339_s7 + $0x200] sm:$0xff] }
 0x292   :  { %v1852_v49 = vmul.f32 1.6732632, %v4703_v32  ;;  %v5340_v5 = vpop.eup %5339  ;;  %v4697_v40 = vadd.f32 -1.0, %v5338_v28  ;;  %5351 = vpow2.f32 %v1797_v57  ;;  %v1976_v28 = vld [vmem:[%s9339_s7 + $0xe0] sm:$0xff]  ;;  %2226 = vmatpush.msrb.mxu2 %v4773_v26  ;;  %v4769_v57 = vld [vmem:[%s9339_s7 + $0x2d0] sm:$0xff]  ;;  %v4802_v26 = vld [vmem:[%s9339_s7 + $0x3d8] sm:$0xff] }
 0x293   :  { %v5342_v54 = vpop.eup %5341  ;;  %v4696_v14 = vadd.f32 -1.0, %v5340_v5  ;;  %2107 = vmatpush.msrb.mxu0 %v1976_v28  ;;  %v4741_v5 = vld [vmem:[%s9339_s7 + $0x1f0] sm:$0xff]  ;;  %2143 = vmatpush.msrb.mxu1 %v1975_v62  ;;  %v4711_v28 = vld [vmem:[%s9339_s7 + $0x100] sm:$0xff]  ;;  %v4806_v62 = vld [vmem:[%s9339_s7 + $0x3f8] sm:$0xff] }
 0x294   :  { %v1866_v61 = vsel %vm1782_vm2, %v1768_v19, %v1852_v49  ;;  %v1847_v19 = vmul.f32 1.6732632, %v4698_v2  ;;  %v5344_v58 = vpop.eup %5343  ;;  %v1846_v31 = vmul.f32 1.6732632, %v4697_v40  ;;  %v4695_v56 = vadd.f32 -1.0, %v5342_v54  ;;  %v1973_v2 = vld [vmem:[%s9339_s7 + $0xc8] sm:$0xff]  ;;  %2227 = vmatpush.msrb.mxu2 %v4771_v6 }
 0x295   :  { %v1880_v27 = vmul.f32 1.050701, %v1866_v61  ;;  %v5346_v48 = vpop.eup %5345  ;;  %v1845_v21 = vmul.f32 1.6732632, %v4696_v14  ;;  %v4694_v39 = vadd.f32 -1.0, %v5344_v58  ;;  %vm1774_vm2 = vcmp.gt.f32.partialorder %v6718_v59, 0.0  ;;  %2144 = vmatpush.msrb.mxu1 %v1973_v2 }
 0x296   :  { %v1861_v25 = vsel %vm1777_vm11, %v6694_v16, %v1847_v19  ;;  %v5348_v1 = vpop.eup %5347  ;;  %v1860_v33 = vsel %vm1776_vm12, %v6704_v41, %v1846_v31  ;;  %v1844_v15 = vmul.f32 1.6732632, %v4695_v56  ;;  %v4693_v37 = vadd.f32 -1.0, %v5346_v48  ;;  %v1974_v61 = vld [vmem:[%s9339_s7 + $0xd0] sm:$0xff]  ;;  %v1971_v40 = vld [vmem:[%s9339_s7 + $0xb8] sm:$0xff]  ;;  %v4739_v54 = vld [vmem:[%s9339_s7 + $0x1e0] sm:$0xff]  ;;  %2228 = vmatpush.msrb.mxu2 %v4769_v57 }
 0x297   :  { %1912 = vmatpush.msra.mxu3 %v1880_v27  ;;  %v5350_v55 = vpop.eup %5349  ;;  %v1875_v4 = vmul.f32 1.050701, %v1861_v25  ;;  %v1859_v30 = vsel %vm1775_vm13, %v6710_v12, %v1845_v21  ;;  %v1843_v50 = vmul.f32 1.6732632, %v4694_v39  ;;  %v4692_v16 = vadd.f32 -1.0, %v5348_v1  ;;  %v1884_v27 = vld [vmem:[%s9338_s6 + $0x18] sm:$0xff]  ;;  %2108 = vmatpush.msrb.mxu0 %v1974_v61 }
 0x298   :  { %v5352_v0 = vpop.eup %5351  ;;  %v1874_v44 = vmul.f32 1.050701, %v1860_v33  ;;  %v1858_v43 = vsel %vm1774_vm2, %v6718_v59, %v1844_v15  ;;  %v1842_v46 = vmul.f32 1.6732632, %v4693_v37  ;;  %v4691_v41 = vadd.f32 -1.0, %v5350_v55  ;;  %2145 = vmatpush.msrb.mxu1 %v1971_v40  ;;  %v4737_v19 = vld [vmem:[%s9339_s7 + $0x1d0] sm:$0xff] }
 0x299   :  { %1913 = vmatpush.msra.mxu3 %v1879_v63  ;;  %v1873_v53 = vmul.f32 1.050701, %v1859_v30  ;;  %v1857_v51 = vsel %vm1773_vm3, %v6724_v38, %v1843_v50  ;;  %v1841_v23 = vmul.f32 1.6732632, %v4692_v16  ;;  %v4690_v47 = vadd.f32 -1.0, %v5352_v0  ;;  %2109 = vmatpush.msrb.mxu0 %v1972_v35  ;;  %v1968_v63 = vld [vmem:[%s9339_s7 + $0xa0] sm:$0xff] }
 0x29a   :  { %v1872_v12 = vmul.f32 1.050701, %v1858_v43  ;;  %v1856_v32 = vsel %vm1772_vm5, %v6730_v42, %v1842_v46  ;;  %v1840_v20 = vmul.f32 1.6732632, %v4691_v41  ;;  %v1871_v24 = vmul.f32 1.050701, %v1857_v51  ;;  %2146 = vmatpush.msrb.mxu1 %v1969_v7 }
 0x29b   :  { %1914 = vmatpush.msra.mxu3 %v1878_v52  ;;  %v1855_v59 = vsel %vm1771_vm6, %v6735_v8, %v1841_v23  ;;  %v1839_v34 = vmul.f32 1.6732632, %v4690_v47  ;;  %v1870_v10 = vmul.f32 1.050701, %v1856_v32  ;;  %vm1769_vm11 = vcmp.gt.f32.partialorder %v6743_v29, 0.0  ;;  %v1881_v8 = vld [vmem:[%s9338_s6] sm:$0xff]  ;;  %2110 = vmatpush.msrb.mxu0 %v1970_v36 }
 0x29c   :  { %v1854_v38 = vsel %vm1770_vm10, %v6739_v11, %v1840_v20  ;;  %v1869_v17 = vmul.f32 1.050701, %v1855_v59  ;;  %vm1888_vm12 = vcmask 916480   ;;  %v1882_v11 = vld [vmem:[%s9338_s6 + $0x8] sm:$0xff]  ;;  %v4767_v14 = vld [vmem:[%s9339_s7 + $0x2c0] sm:$0xff]  ;;  %v1966_v58 = vld [vmem:[%s9339_s7 + $0x90] sm:$0xff] }
 0x29d   :  { %1915 = vmatpush.msra.mxu3 %v1877_v60  ;;  %v1853_v42 = vsel %vm1769_vm11, %v6743_v29, %v1839_v34  ;;  %v1868_v18 = vmul.f32 1.050701, %v1854_v38  ;;  %v1883_v29 = vld [vmem:[%s9338_s6 + $0x10] sm:$0xff]  ;;  %v1967_v52 = vld [vmem:[%s9339_s7 + $0x98] sm:$0xff]  ;;  %2111 = vmatpush.msrb.mxu0 %v1968_v63  ;;  %v1964_v56 = vld [vmem:[%s9339_s7 + $0x80] sm:$0xff]  ;;  %vm3207_vm2 = vcmask 359424  }
 0x29e   :  { %v1867_v49 = vmul.f32 1.050701, %v1853_v42  ;;  %v4765_v31 = vld [vmem:[%s9339_s7 + $0x2b0] sm:$0xff]  ;;  %v1965_v48 = vld [vmem:[%s9339_s7 + $0x88] sm:$0xff]  ;;  %2229 = vmatpush.msrb.mxu2 %v4767_v14  ;;  %v1885_v60 = vld [vmem:[%s9338_s6 + $0x20] sm:$0xff]  ;;  %2147 = vmatpush.msrb.mxu1 %v1967_v52 }
 0x29f   :  { %1916 = vmatpush.msra.mxu3 %v1876_v9  ;;  %2112 = vmatpush.msrb.mxu0 %v1966_v58  ;;  %v4763_v25 = vld [vmem:[%s9339_s7 + $0x2a0] sm:$0xff]  ;;  %v1962_v21 = vld [vmem:[%s9339_s7 + $0x70] sm:$0xff]  ;;  %v1963_v39 = vld [vmem:[%s9339_s7 + $0x78] sm:$0xff] }
 0x2a0   :  { %2230 = vmatpush.msrb.mxu2 %v4765_v31  ;;  %2148 = vmatpush.msrb.mxu1 %v1965_v48  ;;  %v4733_v1 = vld [vmem:[%s9339_s7 + $0x1b0] sm:$0xff]  ;;  %v1960_v33 = vld [vmem:[%s9339_s7 + $0x60] sm:$0xff]  ;;  %v1961_v15 = vld [vmem:[%s9339_s7 + $0x68] sm:$0xff] }
 0x2a1   :  { %1917 = vmatpush.msra.mxu3 %v1875_v4  ;;  %2113 = vmatpush.msrb.mxu0 %v1964_v56  ;;  %v4761_v9 = vld [vmem:[%s9339_s7 + $0x290] sm:$0xff]  ;;  %v4731_v37 = vld [vmem:[%s9339_s7 + $0x1a0] sm:$0xff]  ;;  %v1959_v30 = vld [vmem:[%s9339_s7 + $0x58] sm:$0xff] }
 0x2a2   :  { %2231 = vmatpush.msrb.mxu2 %v4763_v25  ;;  %2149 = vmatpush.msrb.mxu1 %v1963_v39  ;;  %v4759_v55 = vld [vmem:[%s9339_s7 + $0x280] sm:$0xff]  ;;  %v1958_v4 = vld [vmem:[%s9339_s7 + $0x50] sm:$0xff]  ;;  %v1886_v43 = vld [vmem:[%s9338_s6 + $0x28] sm:$0xff] }
 0x2a3   :  { %1918 = vmatpush.msra.mxu3 %v1874_v44  ;;  %2114 = vmatpush.msrb.mxu0 %v1962_v21  ;;  %v4729_v50 = vld [vmem:[%s9339_s7 + $0x190] sm:$0xff]  ;;  %v1956_v0 = vld [vmem:[%s9339_s7 + $0x40] sm:$0xff]  ;;  %v1957_v44 = vld [vmem:[%s9339_s7 + $0x48] sm:$0xff] }
 0x2a4   :  { %2232 = vmatpush.msrb.mxu2 %v4761_v9  ;;  %2150 = vmatpush.msrb.mxu1 %v1961_v15  ;;  %v4757_v16 = vld [vmem:[%s9339_s7 + $0x270] sm:$0xff]  ;;  %v4755_v46 = vld [vmem:[%s9339_s7 + $0x260] sm:$0xff]  ;;  %v1953_v47 = vld [vmem:[%s9339_s7 + $0x28] sm:$0xff] }
 0x2a5   :  { %1919 = vmatpush.msra.mxu3 %v1873_v53  ;;  %2115 = vmatpush.msrb.mxu0 %v1960_v33  ;;  %v1954_v41 = vld [vmem:[%s9339_s7 + $0x30] sm:$0xff]  ;;  %v1955_v53 = vld [vmem:[%s9339_s7 + $0x38] sm:$0xff]  ;;  %v4727_v51 = vld [vmem:[%s9339_s7 + $0x180] sm:$0xff] }
 0x2a6   :  { %2233 = vmatpush.msrb.mxu2 %v4759_v55  ;;  %2151 = vmatpush.msrb.mxu1 %v1959_v30  ;;  %v1952_v23 = vld [vmem:[%s9339_s7 + $0x20] sm:$0xff]  ;;  %v1950_v32 = vld [vmem:[%s9339_s7 + $0x10] sm:$0xff]  ;;  %v1951_v20 = vld [vmem:[%s9339_s7 + $0x18] sm:$0xff] }
 0x2a7   :  { %1920 = vmatpush.msra.mxu3 %v1872_v12  ;;  %2116 = vmatpush.msrb.mxu0 %v1958_v4  ;;  %v4725_v12 = vld [vmem:[%s9339_s7 + $0x170] sm:$0xff]  ;;  %v1948_v34 = vld [vmem:[%s9339_s7] sm:$0xff]  ;;  %v4804_v2 = vld [vmem:[%s9339_s7 + $0x3e8] sm:$0xff] }
 0x2a8   :  { %2234 = vmatpush.msrb.mxu2 %v4757_v16  ;;  %2152 = vmatpush.msrb.mxu1 %v1957_v44  ;;  %v1887_v59 = vld [vmem:[%s9338_s6 + $0x30] sm:$0xf]  ;;  %v4719_v42 = vld [vmem:[%s9339_s7 + $0x140] sm:$0xff]  ;;  %v4800_v6 = vld [vmem:[%s9339_s7 + $0x3c8] sm:$0xff] }
 0x2a9   :  { %1921 = vmatpush.msra.mxu3 %v1871_v24  ;;  %2117 = vmatpush.msrb.mxu0 %v1956_v0  ;;  %v4723_v24 = vld [vmem:[%s9339_s7 + $0x160] sm:$0xff]  ;;  %v4721_v38 = vld [vmem:[%s9339_s7 + $0x150] sm:$0xff]  ;;  %v4798_v40 = vld [vmem:[%s9339_s7 + $0x3b8] sm:$0xff] }
 0x2aa   :  { %2235 = vmatpush.msrb.mxu2 %v4755_v46  ;;  %2153 = vmatpush.msrb.mxu1 %v1955_v53  ;;  %v4745_v22 = vld [vmem:[%s9339_s7 + $0x210] sm:$0xff]  ;;  %v4803_v35 = vld [vmem:[%s9339_s7 + $0x3e0] sm:$0xff]  ;;  %v4796_v57 = vld [vmem:[%s9339_s7 + $0x3a8] sm:$0xff] }
 0x2ab   :  { %1922 = vmatpush.msra.mxu3 %v1870_v10  ;;  %2118 = vmatpush.msrb.mxu0 %v1954_v41  ;;  %v1949_v10 = vld [vmem:[%s9339_s7 + $0x8] sm:$0xff]  ;;  %v4805_v61 = vld [vmem:[%s9339_s7 + $0x3f0] sm:$0xff]  ;;  %v4742_v63 = vld [vmem:[%s9339_s7 + $0x1f8] sm:$0xff] }
 0x2ac   :  { %2154 = vmatpush.msrb.mxu1 %v1953_v47  ;;  %v4797_v36 = vld [vmem:[%s9339_s7 + $0x3b0] sm:$0xff]  ;;  %v4794_v14 = vld [vmem:[%s9339_s7 + $0x398] sm:$0xff]  ;;  %v4740_v58 = vld [vmem:[%s9339_s7 + $0x1e8] sm:$0xff] }
 0x2ad   :  { %1923 = vmatpush.msra.mxu3 %v1869_v17  ;;  %2119 = vmatpush.msrb.mxu0 %v1952_v23  ;;  %v4753_v17 = vld [vmem:[%s9339_s7 + $0x250] sm:$0xff]  ;;  %v4835_v52 = vld [vmem:[%s9339_s7 + $0x4e0] sm:$0xff]  ;;  %v4792_v56 = vld [vmem:[%s9339_s7 + $0x388] sm:$0xff] }
 0x2ae   :  { %2155 = vmatpush.msrb.mxu1 %v1951_v20  ;;  %2236 = vmatpush.msrb.mxu2 %v4753_v17  ;;  %v4837_v7 = vld [vmem:[%s9339_s7 + $0x4f0] sm:$0xff]  ;;  %v4791_v31 = vld [vmem:[%s9339_s7 + $0x380] sm:$0xff]  ;;  %v4738_v48 = vld [vmem:[%s9339_s7 + $0x1d8] sm:$0xff] }
 0x2af   :  { %1924 = vmatpush.msra.mxu3 %v1868_v18  ;;  %2120 = vmatpush.msrb.mxu0 %v1950_v32  ;;  %v4751_v18 = vld [vmem:[%s9339_s7 + $0x240] sm:$0xff]  ;;  %v4789_v25 = vld [vmem:[%s9339_s7 + $0x370] sm:$0xff]  ;;  %v4790_v21 = vld [vmem:[%s9339_s7 + $0x378] sm:$0xff] }
 0x2b0   :  { %2156 = vmatpush.msrb.mxu1 %v1949_v10  ;;  %2237 = vmatpush.msrb.mxu2 %v4751_v18  ;;  %v4736_v39 = vld [vmem:[%s9339_s7 + $0x1c8] sm:$0xff]  ;;  %v4787_v9 = vld [vmem:[%s9339_s7 + $0x360] sm:$0xff]  ;;  %v4734_v15 = vld [vmem:[%s9339_s7 + $0x1b8] sm:$0xff] }
 0x2b1   :  { %1925 = vmatpush.msra.mxu3 %v1867_v49  ;;  %2121 = vmatpush.msrb.mxu0 %v1948_v34  ;;  %v4717_v49 = vld [vmem:[%s9339_s7 + $0x130] sm:$0xff]  ;;  %v4788_v33 = vld [vmem:[%s9339_s7 + $0x368] sm:$0xff]  ;;  %v4786_v4 = vld [vmem:[%s9339_s7 + $0x358] sm:$0xff] }
 0x2b2   :  { %4704 = vmatmul.msk.f32.vlgmr.msra.gmra.mxu3 %vm1888_vm12, %v1881_v8  ;;  %v4749_v8 = vld [vmem:[%s9339_s7 + $0x230] sm:$0xff]  ;;  %2393 = vmatpush.msra.mxu1 %v4806_v62  ;;  %v4732_v30 = vld [vmem:[%s9339_s7 + $0x1a8] sm:$0xff]  ;;  %v4783_v0 = vld [vmem:[%s9339_s7 + $0x340] sm:$0xff] }
 0x2b3   :  { %2036 = vmatpush.msrb.mxu3 %v4741_v5  ;;  %2238 = vmatpush.msrb.mxu2 %v4749_v8  ;;  %v4801_v5 = vld [vmem:[%s9339_s7 + $0x3d0] sm:$0xff]  ;;  %v4784_v44 = vld [vmem:[%s9339_s7 + $0x348] sm:$0xff]  ;;  %v4782_v20 = vld [vmem:[%s9339_s7 + $0x338] sm:$0xff] }
 0x2b4   :  { %2358 = vmatpush.msra.mxu0 %v4805_v61  ;;  %2394 = vmatpush.msra.mxu1 %v4804_v2  ;;  %v4785_v55 = vld [vmem:[%s9339_s7 + $0x350] sm:$0xff]  ;;  %v4779_v34 = vld [vmem:[%s9339_s7 + $0x320] sm:$0xff]  ;;  %v4780_v10 = vld [vmem:[%s9339_s7 + $0x328] sm:$0xff] }
 0x2b5   :  { %2037 = vmatpush.msrb.mxu3 %v4739_v54  ;;  %v4795_v54 = vld [vmem:[%s9339_s7 + $0x3a0] sm:$0xff]  ;;  %v4825_v23 = vld [vmem:[%s9339_s7 + $0x490] sm:$0xff]  ;;  %v4776_v61 = vld [vmem:[%s9339_s7 + $0x308] sm:$0xff] }
 0x2b6   :  { %2359 = vmatpush.msra.mxu0 %v4803_v35  ;;  %2395 = vmatpush.msra.mxu1 %v4802_v26  ;;  %v4781_v32 = vld [vmem:[%s9339_s7 + $0x330] sm:$0xff]  ;;  %v4722_v62 = vld [vmem:[%s9339_s7 + $0x158] sm:$0xff]  ;;  %v4720_v2 = vld [vmem:[%s9339_s7 + $0x148] sm:$0xff] }
 0x2b7   :  { %2038 = vmatpush.msrb.mxu3 %v4737_v19  ;;  %v4793_v19 = vld [vmem:[%s9339_s7 + $0x390] sm:$0xff] }
 0x2b8   :  { %2360 = vmatpush.msra.mxu0 %v4801_v5  ;;  %2396 = vmatpush.msra.mxu1 %v4800_v6  ;;  %v4821_v17 = vld [vmem:[%s9339_s7 + $0x470] sm:$0xff]  ;;  %v4815_v5 = vld [vmem:[%s9339_s7 + $0x440] sm:$0xff] }
 0x2b9   :  { %2039 = vmatpush.msrb.mxu3 %v4735_v45  ;;  %v4777_v18 = vld [vmem:[%s9339_s7 + $0x310] sm:$0xff] }
 0x2ba   :  { %4705 = vmatmul.msk.f32.gmra.mxu3 %vm1888_vm12, %v1882_v11  ;;  %v4715_v11 = vld [vmem:[%s9339_s7 + $0x120] sm:$0xff]  ;;  %2397 = vmatpush.msra.mxu1 %v4798_v40  ;;  %v4817_v35 = vld [vmem:[%s9339_s7 + $0x450] sm:$0xff] }
 0x2bb   :  { %2040 = vmatpush.msrb.mxu3 %v4733_v1  ;;  %v4831_v1 = vld [vmem:[%s9339_s7 + $0x4c0] sm:$0xff]  ;;  %v4813_v40 = vld [vmem:[%s9339_s7 + $0x430] sm:$0xff] }
 0x2bc   :  { %2398 = vmatpush.msra.mxu1 %v4796_v57 }
 0x2bd   :  { %2041 = vmatpush.msrb.mxu3 %v4731_v37  ;;  %v4829_v37 = vld [vmem:[%s9339_s7 + $0x4b0] sm:$0xff] }
 0x2be   :  { %2399 = vmatpush.msra.mxu1 %v4794_v14  ;;  %v4809_v14 = vld [vmem:[%s9339_s7 + $0x410] sm:$0xff] }
 0x2bf   :  { %2042 = vmatpush.msrb.mxu3 %v4729_v50  ;;  %v4827_v50 = vld [vmem:[%s9339_s7 + $0x4a0] sm:$0xff] }
 0x2c0   :  { %2400 = vmatpush.msra.mxu1 %v4792_v56  ;;  %v4869_v56 = vld [vmem:[%s9339_s7 + $0x5f0] sm:$0xff] }
 0x2c1   :  { %2043 = vmatpush.msrb.mxu3 %v4727_v51  ;;  %v4730_v51 = vld [vmem:[%s9339_s7 + $0x198] sm:$0xff] }
 0x2c2   :  { %4706 = vmatmul.msk.f32.gmra.mxu3 %vm1888_vm12, %v1883_v29  ;;  %v4747_v29 = vld [vmem:[%s9339_s7 + $0x220] sm:$0xff]  ;;  %2401 = vmatpush.msra.mxu1 %v4790_v21 }
 0x2c3   :  { %2044 = vmatpush.msrb.mxu3 %v4725_v12  ;;  %2239 = vmatpush.msrb.mxu2 %v4747_v29  ;;  %v4724_v29 = vld [vmem:[%s9339_s7 + $0x168] sm:$0xff] }
 0x2c4   :  { %2402 = vmatpush.msra.mxu1 %v4788_v33  ;;  %v4865_v33 = vld [vmem:[%s9339_s7 + $0x5d0] sm:$0xff] }
 0x2c5   :  { %2045 = vmatpush.msrb.mxu3 %v4723_v24  ;;  %2240 = vmatpush.msrb.mxu2 %v4745_v22  ;;  %v4728_v24 = vld [vmem:[%s9339_s7 + $0x188] sm:$0xff] }
 0x2c6   :  { %2403 = vmatpush.msra.mxu1 %v4786_v4 }
 0x2c7   :  { %2046 = vmatpush.msrb.mxu3 %v4721_v38  ;;  %2241 = vmatpush.msrb.mxu2 %v4743_v13  ;;  %v4726_v38 = vld [vmem:[%s9339_s7 + $0x178] sm:$0xff]  ;;  %v4775_v13 = vld [vmem:[%s9339_s7 + $0x300] sm:$0xff] }
 0x2c8   :  { %2404 = vmatpush.msra.mxu1 %v4784_v44  ;;  %v4862_v44 = vld [vmem:[%s9339_s7 + $0x5b8] sm:$0xff] }
 0x2c9   :  { %2047 = vmatpush.msrb.mxu3 %v4719_v42  ;;  %2490 = vmatpush.msra.mxu2 %v4837_v7  ;;  %v4811_v7 = vld [vmem:[%s9339_s7 + $0x420] sm:$0xff] }
 0x2ca   :  { %4707 = vmatmul.msk.f32.gmra.mxu3 %vm1888_vm12, %v1884_v27  ;;  %v4799_v27 = vld [vmem:[%s9339_s7 + $0x3c0] sm:$0xff]  ;;  %2405 = vmatpush.msra.mxu1 %v4782_v20 }
 0x2cb   :  { %2048 = vmatpush.msrb.mxu3 %v4717_v49  ;;  %2361 = vmatpush.msra.mxu0 %v4799_v27  ;;  %v4778_v49 = vld [vmem:[%s9339_s7 + $0x318] sm:$0xff] }
 0x2cc   :  { %2491 = vmatpush.msra.mxu2 %v4835_v52  ;;  %2406 = vmatpush.msra.mxu1 %v4780_v10  ;;  %v4858_v10 = vld [vmem:[%s9339_s7 + $0x598] sm:$0xff] }
 0x2cd   :  { %2049 = vmatpush.msrb.mxu3 %v4715_v11  ;;  %2362 = vmatpush.msra.mxu0 %v4797_v36  ;;  %v4718_v36 = vld [vmem:[%s9339_s7 + $0x138] sm:$0xff] }
 0x2ce   :  { %2407 = vmatpush.msra.mxu1 %v4778_v49  ;;  %v4855_v49 = vld [vmem:[%s9339_s7 + $0x580] sm:$0xff] }
 0x2cf   :  { %2050 = vmatpush.msrb.mxu3 %v4713_v3  ;;  %2363 = vmatpush.msra.mxu0 %v4795_v54  ;;  %v4819_v3 = vld [vmem:[%s9339_s7 + $0x460] sm:$0xff] }
 0x2d0   :  { %2408 = vmatpush.msra.mxu1 %v4776_v61  ;;  %v4854_v61 = vld [vmem:[%s9339_s7 + $0x578] sm:$0xff] }
 0x2d1   :  { %2051 = vmatpush.msrb.mxu3 %v4711_v28  ;;  %2364 = vmatpush.msra.mxu0 %v4793_v19  ;;  %v4714_v19 = vld [vmem:[%s9339_s7 + $0x118] sm:$0xff] }
 0x2d2   :  { %4708 = vmatmul.msk.f32.gmra.mxu3 %vm1888_vm12, %v1885_v60  ;;  %v4833_v60 = vld [vmem:[%s9339_s7 + $0x4d0] sm:$0xff] }
 0x2d3   :  { %2071 = vmatpush.msra.mxu3 %v4742_v63  ;;  %2365 = vmatpush.msra.mxu0 %v4791_v31  ;;  %v4716_v63 = vld [vmem:[%s9339_s7 + $0x128] sm:$0xff] }
 0x2d4   :  { %2492 = vmatpush.msra.mxu2 %v4833_v60  ;;  %v4712_v60 = vld [vmem:[%s9339_s7 + $0x108] sm:$0xff] }
 0x2d5   :  { %2072 = vmatpush.msra.mxu3 %v4740_v58  ;;  %2366 = vmatpush.msra.mxu0 %v4789_v25  ;;  %v4807_v25 = vld [vmem:[%s9339_s7 + $0x400] sm:$0xff] }
 0x2d6   :  { %2493 = vmatpush.msra.mxu2 %v4831_v1  ;;  %v4867_v1 = vld [vmem:[%s9339_s7 + $0x5e0] sm:$0xff] }
 0x2d7   :  { %2073 = vmatpush.msra.mxu3 %v4738_v48  ;;  %2367 = vmatpush.msra.mxu0 %v4787_v9  ;;  %v4870_v48 = vld [vmem:[%s9339_s7 + $0x5f8] sm:$0xff]  ;;  %v4868_v9 = vld [vmem:[%s9339_s7 + $0x5e8] sm:$0xff] }
 0x2d8   :  { %2494 = vmatpush.msra.mxu2 %v4829_v37  ;;  %v4863_v37 = vld [vmem:[%s9339_s7 + $0x5c0] sm:$0xff] }
 0x2d9   :  { %2074 = vmatpush.msra.mxu3 %v4736_v39  ;;  %2368 = vmatpush.msra.mxu0 %v4785_v55  ;;  %v4864_v55 = vld [vmem:[%s9339_s7 + $0x5c8] sm:$0xff] }
 0x2da   :  { %4709 = vmatmul.msk.f32.gmra.mxu3 %vm1888_vm12, %v1886_v43  ;;  %2495 = vmatpush.msra.mxu2 %v4827_v50 }
 0x2db   :  { %2075 = vmatpush.msra.mxu3 %v4734_v15  ;;  %2369 = vmatpush.msra.mxu0 %v4783_v0  ;;  %v4866_v15 = vld [vmem:[%s9339_s7 + $0x5d8] sm:$0xff]  ;;  %v4861_v0 = vld [vmem:[%s9339_s7 + $0x5b0] sm:$0xff] }
 0x2dc   :  { %2496 = vmatpush.msra.mxu2 %v4825_v23  ;;  %v4774_v23 = vld [vmem:[%s9339_s7 + $0x2f8] sm:$0xff] }
 0x2dd   :  { %2076 = vmatpush.msra.mxu3 %v4732_v30  ;;  %2370 = vmatpush.msra.mxu0 %v4781_v32  ;;  %v4901_v32 = vld [vmem:[%s9339_s7 + $0x6f0] sm:$0xff] }
 0x2df   :  { %2077 = vmatpush.msra.mxu3 %v4730_v51  ;;  %2371 = vmatpush.msra.mxu0 %v4779_v34  ;;  %v4860_v51 = vld [vmem:[%s9339_s7 + $0x5a8] sm:$0xff]  ;;  %v4857_v34 = vld [vmem:[%s9339_s7 + $0x590] sm:$0xff] }
 0x2e1   :  { %2078 = vmatpush.msra.mxu3 %v4728_v24  ;;  %2372 = vmatpush.msra.mxu0 %v4777_v18  ;;  %v4772_v24 = vld [vmem:[%s9339_s7 + $0x2e8] sm:$0xff]  ;;  %v4897_v18 = vld [vmem:[%s9339_s7 + $0x6d0] sm:$0xff] }
 0x2e2   :  { %4710 = vmatmul.msk.f32.gmra.mxu3 %vm1888_vm12, %v1887_v59  ;;  %v4823_v59 = vld [vmem:[%s9339_s7 + $0x480] sm:$0xff] }
 0x2e3   :  { %2497 = vmatpush.msra.mxu2 %v4823_v59  ;;  %2079 = vmatpush.msra.mxu3 %v4726_v38  ;;  %v4899_v59 = vld [vmem:[%s9339_s7 + $0x6e0] sm:$0xff] }
 0x2e4   :  { %2373 = vmatpush.msra.mxu0 %v4775_v13  ;;  %v4853_v13 = vld [vmem:[%s9339_s7 + $0x570] sm:$0xff] }
 0x2e5   :  { %2498 = vmatpush.msra.mxu2 %v4821_v17  ;;  %2080 = vmatpush.msra.mxu3 %v4724_v29  ;;  %v4770_v17 = vld [vmem:[%s9339_s7 + $0x2d8] sm:$0xff]  ;;  %v4895_v29 = vld [vmem:[%s9339_s7 + $0x6c0] sm:$0xff] }
 0x2e7   :  { %2499 = vmatpush.msra.mxu2 %v4819_v3  ;;  %2081 = vmatpush.msra.mxu3 %v4722_v62  ;;  %v4766_v62 = vld [vmem:[%s9339_s7 + $0x2b8] sm:$0xff] }
 0x2e9   :  { %2500 = vmatpush.msra.mxu2 %v4817_v35  ;;  %2082 = vmatpush.msra.mxu3 %v4720_v2  ;;  %v4893_v35 = vld [vmem:[%s9339_s7 + $0x6b0] sm:$0xff] }
 0x2eb   :  { %2501 = vmatpush.msra.mxu2 %v4815_v5  ;;  %2083 = vmatpush.msra.mxu3 %v4718_v36  ;;  %v4851_v5 = vld [vmem:[%s9339_s7 + $0x560] sm:$0xff]  ;;  %v4764_v36 = vld [vmem:[%s9339_s7 + $0x2a8] sm:$0xff] }
 0x2ed   :  { %2502 = vmatpush.msra.mxu2 %v4813_v40  ;;  %2084 = vmatpush.msra.mxu3 %v4716_v63  ;;  %v4891_v40 = vld [vmem:[%s9339_s7 + $0x6a0] sm:$0xff] }
 0x2ef   :  { %2503 = vmatpush.msra.mxu2 %v4811_v7  ;;  %2085 = vmatpush.msra.mxu3 %v4714_v19  ;;  %v4849_v7 = vld [vmem:[%s9339_s7 + $0x550] sm:$0xff]  ;;  %v4850_v19 = vld [vmem:[%s9339_s7 + $0x558] sm:$0xff] }
 0x2f1   :  { %2504 = vmatpush.msra.mxu2 %v4809_v14  ;;  %2086 = vmatpush.msra.mxu3 %v4712_v60  ;;  %v4848_v60 = vld [vmem:[%s9339_s7 + $0x548] sm:$0xff] }
 0x2f3   :  { %2505 = vmatpush.msra.mxu2 %v4807_v25  ;;  %v4760_v25 = vld [vmem:[%s9339_s7 + $0x288] sm:$0xff] }
 0x335   :  { %v7048_v45 = vpop.f32.mrf.mxu3 }
 0x336   :  { %2122 = vmatmul.f32.vlgmr.msrb.gmra.mxu0 %v7048_v45  ;;  %2157 = vmatmul.f32.vlgmr.msrb.gmra.mxu1 %v7048_v45  ;;  %v2019_v43 = vrot.slane %v7048_v45, 1  ;;  %v2209_v41 = vrot.slane %v7048_v45, 2  ;;  %v2341_v20 = vrot.slane %v7048_v45, 3  ;;  %v2473_v63 = vrot.slane %v7048_v45, 4 }
 0x337   :  { %2625 = vmatpush.msrb.mxu0 %v4869_v56  ;;  %2660 = vmatpush.msrb.mxu1 %v4870_v48  ;;  %v4847_v48 = vld [vmem:[%s9339_s7 + $0x540] sm:$0xff] }
 0x339   :  { %2626 = vmatpush.msrb.mxu0 %v4867_v1  ;;  %2661 = vmatpush.msrb.mxu1 %v4868_v9  ;;  %v4845_v9 = vld [vmem:[%s9339_s7 + $0x530] sm:$0xff] }
 0x33b   :  { %2627 = vmatpush.msrb.mxu0 %v4865_v33  ;;  %2662 = vmatpush.msrb.mxu1 %v4866_v15  ;;  %v4846_v33 = vld [vmem:[%s9339_s7 + $0x538] sm:$0xff] }
 0x33d   :  { %v7100_v16 = vpop.f32.mrf.mxu3  ;;  %2628 = vmatpush.msrb.mxu0 %v4863_v37  ;;  %2663 = vmatpush.msrb.mxu1 %v4864_v55  ;;  %v4758_v37 = vld [vmem:[%s9339_s7 + $0x278] sm:$0xff]  ;;  %v4885_v55 = vld [vmem:[%s9339_s7 + $0x670] sm:$0xff] }
 0x33e   :  { %2125 = vmatmul.f32.gmra.mxu0 %v7100_v16  ;;  %2160 = vmatmul.f32.gmra.mxu1 %v7100_v16  ;;  %v2020_v46 = vrot.slane %v7100_v16, 1  ;;  %v2210_v53 = vrot.slane %v7100_v16, 2  ;;  %v2474_v2 = vrot.slane %v7100_v16, 4 }
 0x33f   :  { %2629 = vmatpush.msrb.mxu0 %v4861_v0  ;;  %2664 = vmatpush.msrb.mxu1 %v4862_v44  ;;  %v4843_v0 = vld [vmem:[%s9339_s7 + $0x520] sm:$0xff]  ;;  %v4844_v44 = vld [vmem:[%s9339_s7 + $0x528] sm:$0xff] }
 0x340   :  { %v7121_v47 = vsel %vm623_vm7, %v2019_v43, %v2020_v46  ;;  %v7124_v12 = vsel %vm837_vm8, %v2209_v41, %v2210_v53  ;;  %v2342_v41 = vrot.slane %v7100_v16, 3  ;;  %v7380_v14 = vsel %vm1117_vm14, %v2473_v63, %v2474_v2  ;;  %v4932_v63 = vld [vmem:[%s9339_s7 + $0x7e8] sm:$0xff] }
 0x341   :  { %2052 = vmatmul.f32.vlgmr.msrb.gmra.mxu3 %v7121_v47  ;;  %2242 = vmatmul.f32.vlgmr.msrb.gmra.mxu2 %v7124_v12 }
 0x342   :  { %2261 = vmatpush.msrb.mxu3 %v4774_v23  ;;  %2759 = vmatpush.msrb.mxu2 %v4901_v32  ;;  %v2343_v38 = vsel %vm977_vm9, %v2341_v20, %v2342_v41  ;;  %v4841_v32 = vld [vmem:[%s9339_s7 + $0x510] sm:$0xff]  ;;  %v4842_v20 = vld [vmem:[%s9339_s7 + $0x518] sm:$0xff] }
 0x343   :  { %2665 = vmatpush.msrb.mxu1 %v4860_v51  ;;  %v4883_v51 = vld [vmem:[%s9339_s7 + $0x660] sm:$0xff] }
 0x344   :  { %2262 = vmatpush.msrb.mxu3 %v4772_v24  ;;  %2760 = vmatpush.msrb.mxu2 %v4899_v59  ;;  %v4754_v24 = vld [vmem:[%s9339_s7 + $0x258] sm:$0xff] }
 0x345   :  { %v7152_v42 = vpop.f32.mrf.mxu3  ;;  %2666 = vmatpush.msrb.mxu1 %v4858_v10  ;;  %v4840_v10 = vld [vmem:[%s9339_s7 + $0x508] sm:$0xff] }
 0x346   :  { %2128 = vmatmul.f32.gmra.mxu0 %v7152_v42  ;;  %2163 = vmatmul.f32.gmra.mxu1 %v7152_v42  ;;  %v2022_v8 = vrot.slane %v7152_v42, 1  ;;  %v2212_v11 = vrot.slane %v7152_v42, 2  ;;  %v2344_v3 = vrot.slane %v7152_v42, 3  ;;  %v2476_v1 = vrot.slane %v7152_v42, 4 }
 0x347   :  { %2263 = vmatpush.msrb.mxu3 %v4770_v17  ;;  %2761 = vmatpush.msrb.mxu2 %v4897_v18  ;;  %v4752_v17 = vld [vmem:[%s9339_s7 + $0x248] sm:$0xff]  ;;  %v4879_v18 = vld [vmem:[%s9339_s7 + $0x640] sm:$0xff] }
 0x348   :  { %v7171_v22 = vsel %vm623_vm7, %v2020_v46, %v2022_v8  ;;  %v7174_v28 = vsel %vm837_vm8, %v2210_v53, %v2212_v11  ;;  %v4859_v53 = vld [vmem:[%s9339_s7 + $0x5a0] sm:$0xff] }
 0x349   :  { %2055 = vmatmul.f32.gmra.mxu3 %v7171_v22  ;;  %2245 = vmatmul.f32.gmra.mxu2 %v7174_v28 }
 0x34a   :  { %2630 = vmatpush.msrb.mxu0 %v4859_v53  ;;  %2762 = vmatpush.msrb.mxu2 %v4895_v29  ;;  %v4756_v53 = vld [vmem:[%s9339_s7 + $0x268] sm:$0xff] }
 0x34c   :  { %2631 = vmatpush.msrb.mxu0 %v4857_v34  ;;  %2763 = vmatpush.msrb.mxu2 %v4893_v35  ;;  %v4839_v34 = vld [vmem:[%s9339_s7 + $0x500] sm:$0xff] }
 0x34d   :  { %v7196_v26 = vpop.f32.mrf.mxu3 }
 0x34e   :  { %2131 = vmatmul.f32.gmra.mxu0 %v7196_v26  ;;  %2166 = vmatmul.f32.gmra.mxu1 %v7196_v26  ;;  %v2024_v27 = vrot.slane %v7196_v26, 1  ;;  %v2214_v6 = vrot.slane %v7196_v26, 2  ;;  %v2346_v56 = vrot.slane %v7196_v26, 3  ;;  %v2478_v59 = vrot.slane %v7196_v26, 4 }
 0x34f   :  { %2632 = vmatpush.msrb.mxu0 %v4855_v49  ;;  %2764 = vmatpush.msrb.mxu2 %v4891_v40  ;;  %v4750_v49 = vld [vmem:[%s9339_s7 + $0x238] sm:$0xff]  ;;  %v4931_v40 = vld [vmem:[%s9339_s7 + $0x7e0] sm:$0xff] }
 0x350   :  { %v7209_v54 = vsel %vm623_vm7, %v2022_v8, %v2024_v27  ;;  %v7212_v57 = vsel %vm837_vm8, %v2212_v11, %v2214_v6  ;;  %v4856_v8 = vld [vmem:[%s9339_s7 + $0x588] sm:$0xff]  ;;  %v2347_v15 = vsel %vm977_vm9, %v2344_v3, %v2346_v56 }
 0x351   :  { %2058 = vmatmul.f32.gmra.mxu3 %v7209_v54  ;;  %2248 = vmatmul.f32.gmra.mxu2 %v7212_v57  ;;  %v4768_v11 = vld [vmem:[%s9339_s7 + $0x2c8] sm:$0xff] }
 0x352   :  { %2667 = vmatpush.msrb.mxu1 %v4856_v8  ;;  %2264 = vmatpush.msrb.mxu3 %v4768_v11  ;;  %v4877_v8 = vld [vmem:[%s9339_s7 + $0x630] sm:$0xff]  ;;  %v7468_v11 = vsel %vm1117_vm14, %v2476_v1, %v2478_v59 }
 0x353   :  { %2633 = vmatpush.msrb.mxu0 %v4853_v13  ;;  %v4875_v13 = vld [vmem:[%s9339_s7 + $0x620] sm:$0xff] }
 0x354   :  { %2668 = vmatpush.msrb.mxu1 %v4854_v61  ;;  %2265 = vmatpush.msrb.mxu3 %v4766_v62  ;;  %v4873_v62 = vld [vmem:[%s9339_s7 + $0x610] sm:$0xff] }
 0x355   :  { %v7228_v58 = vpop.f32.mrf.mxu3  ;;  %2634 = vmatpush.msrb.mxu0 %v4851_v5  ;;  %v4934_v5 = vld [vmem:[%s9339_s7 + $0x7f8] sm:$0xff] }
 0x356   :  { %2134 = vmatmul.f32.gmra.mxu0 %v7228_v58  ;;  %2169 = vmatmul.f32.gmra.mxu1 %v7228_v58  ;;  %v2026_v52 = vrot.slane %v7228_v58, 1  ;;  %v2216_v31 = vrot.slane %v7228_v58, 2  ;;  %v2348_v23 = vrot.slane %v7228_v58, 3  ;;  %v2480_v61 = vrot.slane %v7228_v58, 4 }
 0x357   :  { %2266 = vmatpush.msrb.mxu3 %v4764_v36  ;;  %2635 = vmatpush.msrb.mxu0 %v4849_v7  ;;  %v4929_v7 = vld [vmem:[%s9339_s7 + $0x7d0] sm:$0xff] }
 0x358   :  { %v7247_v21 = vsel %vm623_vm7, %v2024_v27, %v2026_v52  ;;  %v7250_v39 = vsel %vm837_vm8, %v2214_v6, %v2216_v31  ;;  %v4852_v27 = vld [vmem:[%s9339_s7 + $0x568] sm:$0xff]  ;;  %v2345_v6 = vsel %vm977_vm9, %v2342_v41, %v2344_v3  ;;  %v7424_v41 = vsel %vm1117_vm14, %v2474_v2, %v2476_v1  ;;  %v4933_v2 = vld [vmem:[%s9339_s7 + $0x7f0] sm:$0xff] }
 0x359   :  { %2061 = vmatmul.f32.gmra.mxu3 %v7247_v21  ;;  %2251 = vmatmul.f32.gmra.mxu2 %v7250_v39  ;;  %v4748_v3 = vld [vmem:[%s9339_s7 + $0x228] sm:$0xff]  ;;  %v7500_v36 = vsel %vm1117_vm14, %v2478_v59, %v2480_v61  ;;  %v4917_v59 = vld [vmem:[%s9339_s7 + $0x770] sm:$0xff] }
 0x35a   :  { %2669 = vmatpush.msrb.mxu1 %v4852_v27  ;;  %2636 = vmatpush.msrb.mxu0 %v4847_v48  ;;  %v4744_v27 = vld [vmem:[%s9339_s7 + $0x208] sm:$0xff]  ;;  %v4926_v48 = vld [vmem:[%s9339_s7 + $0x7b8] sm:$0xff] }
 0x35b   :  { %v4924_v1 = vld [vmem:[%s9339_s7 + $0x7a8] sm:$0xff] }
 0x35c   :  { %2670 = vmatpush.msrb.mxu1 %v4850_v19  ;;  %2637 = vmatpush.msrb.mxu0 %v4845_v9  ;;  %v4838_v9 = vld [vmem:[%s9339_s7 + $0x4f8] sm:$0xff] }
 0x35d   :  { %v7272_v4 = vpop.f32.mrf.mxu3 }
 0x35e   :  { %2137 = vmatmul.f32.gmra.mxu0 %v7272_v4  ;;  %2172 = vmatmul.f32.gmra.mxu1 %v7272_v4  ;;  %v7277_v30 = vrot.slane %v7272_v4, 1  ;;  %v7280_v50 = vrot.slane %v7272_v4, 2  ;;  %v2350_v29 = vrot.slane %v7272_v4, 3  ;;  %v7517_v19 = vrot.slane %v7272_v4, 4 }
 0x35f   :  { %2671 = vmatpush.msrb.mxu1 %v4848_v60  ;;  %2638 = vmatpush.msrb.mxu0 %v4843_v0  ;;  %v4963_v0 = vld [vmem:[%s9339_s7 + $0x8e0] sm:$0xff] }
 0x360   :  { %v7290_v43 = vsel %vm623_vm7, %v2026_v52, %v7277_v30  ;;  %v7294_v46 = vsel %vm837_vm8, %v2216_v31, %v7280_v50  ;;  %v4762_v52 = vld [vmem:[%s9339_s7 + $0x298] sm:$0xff]  ;;  %v4889_v31 = vld [vmem:[%s9339_s7 + $0x690] sm:$0xff]  ;;  %v2351_v35 = vsel %vm977_vm9, %v2348_v23, %v2350_v29  ;;  %v7533_v60 = vsel %vm1117_vm14, %v2480_v61, %v7517_v19 }
 0x361   :  { %2064 = vmatmul.f32.gmra.mxu3 %v7290_v43  ;;  %2254 = vmatmul.f32.gmra.mxu2 %v7294_v46  ;;  %v4914_v61 = vld [vmem:[%s9339_s7 + $0x758] sm:$0xff] }
 0x362   :  { %2267 = vmatpush.msrb.mxu3 %v4762_v52  ;;  %2765 = vmatpush.msrb.mxu2 %v4889_v31  ;;  %v4927_v52 = vld [vmem:[%s9339_s7 + $0x7c0] sm:$0xff]  ;;  %v4928_v31 = vld [vmem:[%s9339_s7 + $0x7c8] sm:$0xff] }
 0x363   :  { %2672 = vmatpush.msrb.mxu1 %v4846_v33  ;;  %2639 = vmatpush.msrb.mxu0 %v4841_v32  ;;  %v2606_v33 = vrot.slane %v7048_v45, 5  ;;  %v4920_v32 = vld [vmem:[%s9339_s7 + $0x788] sm:$0xff] }
 0x364   :  { %2268 = vmatpush.msrb.mxu3 %v4760_v25  ;;  %v2607_v25 = vrot.slane %v7100_v16, 5 }
 0x365   :  { %2673 = vmatpush.msrb.mxu1 %v4844_v44  ;;  %2640 = vmatpush.msrb.mxu0 %v4839_v34  ;;  %v4918_v34 = vld [vmem:[%s9339_s7 + $0x778] sm:$0xff] }
 0x366   :  { %2374 = vmatmul.f32.vlgmr.msra.gmra.mxu0 %v2343_v38  ;;  %2409 = vmatmul.f32.vlgmr.msra.gmra.mxu1 %v2343_v38  ;;  %v2349_v38 = vsel %vm977_vm9, %v2346_v56, %v2348_v23  ;;  %v4925_v56 = vld [vmem:[%s9339_s7 + $0x7b0] sm:$0xff]  ;;  %v2608_v44 = vsel %vm133_vm0, %v2606_v33, %v2607_v25  ;;  %v4919_v23 = vld [vmem:[%s9339_s7 + $0x780] sm:$0xff]  ;;  %v4906_v33 = vld [vmem:[%s9339_s7 + $0x718] sm:$0xff] }
 0x367   :  { %2269 = vmatpush.msrb.mxu3 %v4758_v37  ;;  %2674 = vmatpush.msrb.mxu1 %v4842_v20  ;;  %v4921_v37 = vld [vmem:[%s9339_s7 + $0x790] sm:$0xff]  ;;  %v4832_v20 = vld [vmem:[%s9339_s7 + $0x4c8] sm:$0xff] }
 0x368   :  { %2893 = vmatpush.msra.mxu0 %v4933_v2  ;;  %v2611_v2 = vrot.slane %v7196_v26, 5 }
 0x369   :  { %2067 = vmatmul.f32.gmra.mxu3 %v7277_v30  ;;  %2257 = vmatmul.f32.gmra.mxu2 %v7280_v50 }
 0x36a   :  { %2270 = vmatpush.msrb.mxu3 %v4756_v53  ;;  %2675 = vmatpush.msrb.mxu1 %v4840_v10  ;;  %v4834_v53 = vld [vmem:[%s9339_s7 + $0x4d8] sm:$0xff] }
 0x36b   :  { %2894 = vmatpush.msra.mxu0 %v4931_v40  ;;  %v4830_v10 = vld [vmem:[%s9339_s7 + $0x4b8] sm:$0xff]  ;;  %v2743_v40 = vrot.slane %v7152_v42, 6 }
 0x36c   :  { %2271 = vmatpush.msrb.mxu3 %v4754_v24  ;;  %2928 = vmatpush.msra.mxu1 %v4934_v5  ;;  %v4959_v24 = vld [vmem:[%s9339_s7 + $0x8c0] sm:$0xff] }
 0x36d   :  { %2895 = vmatpush.msra.mxu0 %v4929_v7  ;;  %v4911_v5 = vld [vmem:[%s9339_s7 + $0x740] sm:$0xff]  ;;  %v4910_v7 = vld [vmem:[%s9339_s7 + $0x738] sm:$0xff] }
 0x36e   :  { %2377 = vmatmul.f32.gmra.mxu0 %v2345_v6  ;;  %2412 = vmatmul.f32.gmra.mxu1 %v2345_v6  ;;  %v4871_v6 = vld [vmem:[%s9339_s7 + $0x600] sm:$0xff] }
 0x36f   :  { %2272 = vmatpush.msrb.mxu3 %v4752_v17  ;;  %2929 = vmatpush.msra.mxu1 %v4932_v63  ;;  %v4915_v17 = vld [vmem:[%s9339_s7 + $0x760] sm:$0xff]  ;;  %v4909_v63 = vld [vmem:[%s9339_s7 + $0x730] sm:$0xff] }
 0x370   :  { %2896 = vmatpush.msra.mxu0 %v4927_v52  ;;  %v4822_v52 = vld [vmem:[%s9339_s7 + $0x478] sm:$0xff] }
 0x371   :  { %2087 = vmatmul.f32.vlgmr.msra.gmra.mxu3 %v7121_v47  ;;  %2506 = vmatmul.f32.vlgmr.msra.gmra.mxu2 %v7380_v14  ;;  %v4887_v47 = vld [vmem:[%s9339_s7 + $0x680] sm:$0xff] }
 0x372   :  { %2766 = vmatpush.msrb.mxu2 %v4887_v47  ;;  %2273 = vmatpush.msrb.mxu3 %v4750_v49  ;;  %v4923_v47 = vld [vmem:[%s9339_s7 + $0x7a0] sm:$0xff] }
 0x373   :  { %2897 = vmatpush.msra.mxu0 %v4925_v56  ;;  %v4907_v56 = vld [vmem:[%s9339_s7 + $0x720] sm:$0xff] }
 0x374   :  { %2767 = vmatpush.msrb.mxu2 %v4885_v55  ;;  %2274 = vmatpush.msrb.mxu3 %v4748_v3  ;;  %v4922_v55 = vld [vmem:[%s9339_s7 + $0x798] sm:$0xff]  ;;  %v2740_v3 = vrot.slane %v7048_v45, 6 }
 0x375   :  { %2898 = vmatpush.msra.mxu0 %v4923_v47  ;;  %v4820_v47 = vld [vmem:[%s9339_s7 + $0x468] sm:$0xff] }
 0x376   :  { %2380 = vmatmul.f32.gmra.mxu0 %v2347_v15  ;;  %2415 = vmatmul.f32.gmra.mxu1 %v2347_v15  ;;  %v4836_v15 = vld [vmem:[%s9339_s7 + $0x4e8] sm:$0xff] }
 0x377   :  { %2768 = vmatpush.msrb.mxu2 %v4883_v51  ;;  %v4961_v51 = vld [vmem:[%s9339_s7 + $0x8d0] sm:$0xff]  ;;  %2899 = vmatpush.msra.mxu0 %v4921_v37  ;;  %v2745_v37 = vrot.slane %v7196_v26, 6 }
 0x379   :  { %2090 = vmatmul.f32.gmra.mxu3 %v7171_v22  ;;  %2509 = vmatmul.f32.gmra.mxu2 %v7424_v41  ;;  %v4881_v22 = vld [vmem:[%s9339_s7 + $0x650] sm:$0xff] }
 0x37a   :  { %2769 = vmatpush.msrb.mxu2 %v4881_v22  ;;  %v2609_v22 = vrot.slane %v7152_v42, 5  ;;  %2900 = vmatpush.msra.mxu0 %v4919_v23  ;;  %v4814_v23 = vld [vmem:[%s9339_s7 + $0x438] sm:$0xff] }
 0x37c   :  { %2770 = vmatpush.msrb.mxu2 %v4879_v18  ;;  %2901 = vmatpush.msra.mxu0 %v4917_v59  ;;  %v4916_v18 = vld [vmem:[%s9339_s7 + $0x768] sm:$0xff]  ;;  %v2610_v49 = vsel %vm133_vm0, %v2607_v25, %v2609_v22  ;;  %v4939_v59 = vld [vmem:[%s9339_s7 + $0x820] sm:$0xff] }
 0x37e   :  { %2383 = vmatmul.f32.gmra.mxu0 %v2349_v38  ;;  %2418 = vmatmul.f32.gmra.mxu1 %v2349_v38  ;;  %v2741_v38 = vrot.slane %v7100_v16, 6 }
 0x37f   :  { %2771 = vmatpush.msrb.mxu2 %v4877_v8  ;;  %v4828_v8 = vld [vmem:[%s9339_s7 + $0x4a8] sm:$0xff]  ;;  %2902 = vmatpush.msra.mxu0 %v4915_v17  ;;  %v7728_v17 = vpop.f32.mrf.mxu3 }
 0x380   :  { %v7663_v25 = vsel %vm1396_vm15, %v2741_v38, %v2743_v40 }
 0x381   :  { %2093 = vmatmul.f32.gmra.mxu3 %v7209_v54  ;;  %2512 = vmatmul.f32.gmra.mxu2 %v7468_v11  ;;  %v4746_v54 = vld [vmem:[%s9339_s7 + $0x218] sm:$0xff] }
 0x382   :  { %2772 = vmatpush.msrb.mxu2 %v4875_v13  ;;  %2275 = vmatpush.msrb.mxu3 %v4746_v54  ;;  %v4913_v13 = vld [vmem:[%s9339_s7 + $0x750] sm:$0xff]  ;;  %v7619_v54 = vsel %vm1396_vm15, %v2740_v3, %v2741_v38 }
 0x383   :  { %2903 = vmatpush.msra.mxu0 %v4913_v13  ;;  %v2749_v13 = vrot.slane %v7272_v4, 6 }
 0x384   :  { %2773 = vmatpush.msrb.mxu2 %v4873_v62  ;;  %2276 = vmatpush.msrb.mxu3 %v4744_v27  ;;  %v4826_v62 = vld [vmem:[%s9339_s7 + $0x498] sm:$0xff]  ;;  %v4912_v27 = vld [vmem:[%s9339_s7 + $0x748] sm:$0xff] }
 0x385   :  { %2904 = vmatpush.msra.mxu0 %v4911_v5  ;;  %v2874_v5 = vrot.slane %v7048_v45, 7 }
 0x386   :  { %2386 = vmatmul.f32.gmra.mxu0 %v2351_v35  ;;  %2421 = vmatmul.f32.gmra.mxu1 %v2351_v35  ;;  %v4953_v35 = vld [vmem:[%s9339_s7 + $0x890] sm:$0xff] }
 0x387   :  { %2774 = vmatpush.msrb.mxu2 %v4871_v6  ;;  %2525 = vmatpush.msra.mxu3 %v4838_v9  ;;  %v4824_v6 = vld [vmem:[%s9339_s7 + $0x488] sm:$0xff]  ;;  %v2613_v9 = vrot.slane %v7228_v58, 5 }
 0x388   :  { %2905 = vmatpush.msra.mxu0 %v4909_v63  ;;  %v4898_v63 = vld [vmem:[%s9339_s7 + $0x6d8] sm:$0xff] }
 0x389   :  { %2096 = vmatmul.f32.gmra.mxu3 %v7247_v21  ;;  %2515 = vmatmul.f32.gmra.mxu2 %v7500_v36  ;;  %v4930_v21 = vld [vmem:[%s9339_s7 + $0x7d8] sm:$0xff] }
 0x38a   :  { %2930 = vmatpush.msra.mxu1 %v4930_v21  ;;  %2526 = vmatpush.msra.mxu3 %v4836_v15  ;;  %v2612_v21 = vsel %vm133_vm0, %v2609_v22, %v2611_v2  ;;  %v4818_v15 = vld [vmem:[%s9339_s7 + $0x458] sm:$0xff]  ;;  %v4812_v22 = vld [vmem:[%s9339_s7 + $0x428] sm:$0xff] }
 0x38b   :  { %2906 = vmatpush.msra.mxu0 %v4907_v56 }
 0x38c   :  { %2931 = vmatpush.msra.mxu1 %v4928_v31  ;;  %2527 = vmatpush.msra.mxu3 %v4834_v53  ;;  %v4949_v31 = vld [vmem:[%s9339_s7 + $0x870] sm:$0xff]  ;;  %v4816_v53 = vld [vmem:[%s9339_s7 + $0x448] sm:$0xff] }
 0x38e   :  { %2389 = vmatmul.f32.gmra.mxu0 %v2350_v29  ;;  %2424 = vmatmul.f32.gmra.mxu1 %v2350_v29  ;;  %v4955_v29 = vld [vmem:[%s9339_s7 + $0x8a0] sm:$0xff] }
 0x38f   :  { %2932 = vmatpush.msra.mxu1 %v4926_v48  ;;  %2528 = vmatpush.msra.mxu3 %v4832_v20  ;;  %v4908_v48 = vld [vmem:[%s9339_s7 + $0x728] sm:$0xff]  ;;  %v7707_v20 = vsel %vm1396_vm15, %v2743_v40, %v2745_v37 }
 0x390   :  { %v4900_v40 = vld [vmem:[%s9339_s7 + $0x6e8] sm:$0xff] }
 0x391   :  { %2099 = vmatmul.f32.gmra.mxu3 %v7290_v43  ;;  %2518 = vmatmul.f32.gmra.mxu2 %v7533_v60  ;;  %v4965_v43 = vld [vmem:[%s9339_s7 + $0x8f0] sm:$0xff] }
 0x392   :  { %3008 = vmatpush.msra.mxu2 %v4965_v43  ;;  %2933 = vmatpush.msra.mxu1 %v4924_v1  ;;  %v4947_v1 = vld [vmem:[%s9339_s7 + $0x860] sm:$0xff]  ;;  %v4905_v43 = vld [vmem:[%s9339_s7 + $0x710] sm:$0xff] }
 0x393   :  { %2529 = vmatpush.msra.mxu3 %v4830_v10  ;;  %2907 = vmatpush.msra.mxu0 %v4905_v43  ;;  %v2747_v10 = vrot.slane %v7228_v58, 6 }
 0x394   :  { %3009 = vmatpush.msra.mxu2 %v4963_v0  ;;  %2934 = vmatpush.msra.mxu1 %v4922_v55  ;;  %v4903_v55 = vld [vmem:[%s9339_s7 + $0x700] sm:$0xff]  ;;  %v4904_v0 = vld [vmem:[%s9339_s7 + $0x708] sm:$0xff] }
 0x395   :  { %2530 = vmatpush.msra.mxu3 %v4828_v8  ;;  %2908 = vmatpush.msra.mxu0 %v4903_v55  ;;  %v7737_v8 = vsel %vm1396_vm15, %v2745_v37, %v2747_v10  ;;  %v4886_v37 = vld [vmem:[%s9339_s7 + $0x678] sm:$0xff] }
 0x396   :  { %2641 = vmatmul.f32.vlgmr.msrb.gmra.mxu0 %v2608_v44  ;;  %2676 = vmatmul.f32.vlgmr.msrb.gmra.mxu1 %v2608_v44  ;;  %v2614_v44 = vsel %vm133_vm0, %v2611_v2, %v2613_v9 }
 0x397   :  { %3010 = vmatpush.msra.mxu2 %v4961_v51  ;;  %2935 = vmatpush.msra.mxu1 %v4920_v32  ;;  %v4943_v51 = vld [vmem:[%s9339_s7 + $0x840] sm:$0xff]  ;;  %v4941_v32 = vld [vmem:[%s9339_s7 + $0x830] sm:$0xff] }
 0x398   :  { %2531 = vmatpush.msra.mxu3 %v4826_v62  ;;  %v7747_v62 = vsel %vm1396_vm15, %v2747_v10, %v2749_v13 }
 0x399   :  { %2102 = vmatmul.f32.gmra.mxu3 %v7277_v30  ;;  %2521 = vmatmul.f32.gmra.mxu2 %v7517_v19  ;;  %v4957_v30 = vld [vmem:[%s9339_s7 + $0x8b0] sm:$0xff] }
 0x39a   :  { %3011 = vmatpush.msra.mxu2 %v4959_v24  ;;  %2936 = vmatpush.msra.mxu1 %v4918_v34  ;;  %v2615_v24 = vrot.slane %v7272_v4, 5 }
 0x39b   :  { %2532 = vmatpush.msra.mxu3 %v4824_v6 }
 0x39c   :  { %3012 = vmatpush.msra.mxu2 %v4957_v30  ;;  %2937 = vmatpush.msra.mxu1 %v4916_v18  ;;  %v4937_v30 = vld [vmem:[%s9339_s7 + $0x810] sm:$0xff]  ;;  %v2616_v38 = vsel %vm133_vm0, %v2613_v9, %v2615_v24  ;;  %v4808_v18 = vld [vmem:[%s9339_s7 + $0x408] sm:$0xff]  ;;  %v4890_v9 = vld [vmem:[%s9339_s7 + $0x698] sm:$0xff] }
 0x39d   :  { %2533 = vmatpush.msra.mxu3 %v4822_v52 }
 0x39e   :  { %2644 = vmatmul.f32.gmra.mxu0 %v2610_v49  ;;  %2679 = vmatmul.f32.gmra.mxu1 %v2610_v49  ;;  %v4935_v49 = vld [vmem:[%s9339_s7 + $0x800] sm:$0xff] }
 0x39f   :  { %3013 = vmatpush.msra.mxu2 %v4955_v29  ;;  %2938 = vmatpush.msra.mxu1 %v4914_v61  ;;  %v2617_v29 = vrot.slane %v7728_v17, 5 }
 0x3a0   :  { %2534 = vmatpush.msra.mxu3 %v4820_v47  ;;  %v4892_v47 = vld [vmem:[%s9339_s7 + $0x6a8] sm:$0xff] }
 0x3a1   :  { %2277 = vmatmul.f32.vlgmr.msrb.gmra.mxu3 %v7124_v12  ;;  %2775 = vmatmul.f32.vlgmr.msrb.gmra.mxu2 %v7619_v54  ;;  %v4951_v12 = vld [vmem:[%s9339_s7 + $0x880] sm:$0xff]  ;;  %v2618_v61 = vsel %vm133_vm0, %v2615_v24, %v2617_v29  ;;  %v4880_v24 = vld [vmem:[%s9339_s7 + $0x648] sm:$0xff]  ;;  %v2885_v29 = vrot.slane %v7728_v17, 7 }
 0x3a2   :  { %3014 = vmatpush.msra.mxu2 %v4953_v35  ;;  %2939 = vmatpush.msra.mxu1 %v4912_v27  ;;  %v4902_v35 = vld [vmem:[%s9339_s7 + $0x6f8] sm:$0xff] }
 0x3a3   :  { %2535 = vmatpush.msra.mxu3 %v4818_v15 }
 0x3a4   :  { %3015 = vmatpush.msra.mxu2 %v4951_v12  ;;  %2940 = vmatpush.msra.mxu1 %v4910_v7  ;;  %v2751_v12 = vrot.slane %v7728_v17, 6  ;;  %v2877_v7 = vrot.slane %v7152_v42, 7 }
 0x3a5   :  { %2536 = vmatpush.msra.mxu3 %v4816_v53 }
 0x3a6   :  { %2647 = vmatmul.f32.gmra.mxu0 %v2612_v21  ;;  %2682 = vmatmul.f32.gmra.mxu1 %v2612_v21  ;;  %v7771_v45 = vsel %vm1396_vm15, %v2749_v13, %v2751_v12  ;;  %v4896_v21 = vld [vmem:[%s9339_s7 + $0x6c8] sm:$0xff] }
 0x3a7   :  { %3016 = vmatpush.msra.mxu2 %v4949_v31  ;;  %2941 = vmatpush.msra.mxu1 %v4908_v48  ;;  %v4872_v13 = vld [vmem:[%s9339_s7 + $0x608] sm:$0xff] }
 0x3a8   :  { %2537 = vmatpush.msra.mxu3 %v4814_v23 }
 0x3a9   :  { %2280 = vmatmul.f32.gmra.mxu3 %v7174_v28  ;;  %2778 = vmatmul.f32.gmra.mxu2 %v7663_v25  ;;  %v4945_v28 = vld [vmem:[%s9339_s7 + $0x850] sm:$0xff] }
 0x3aa   :  { %3017 = vmatpush.msra.mxu2 %v4947_v1  ;;  %2942 = vmatpush.msra.mxu1 %v4906_v33  ;;  %v2879_v1 = vrot.slane %v7196_v26, 7 }
 0x3ab   :  { %2538 = vmatpush.msra.mxu3 %v4812_v22  ;;  %v2883_v22 = vrot.slane %v7272_v4, 7 }
 0x3ac   :  { %3018 = vmatpush.msra.mxu2 %v4945_v28  ;;  %2943 = vmatpush.msra.mxu1 %v4904_v0  ;;  %v2880_v28 = vsel %vm1536_vm1, %v2877_v7, %v2879_v1  ;;  %v2881_v0 = vrot.slane %v7228_v58, 7 }
 0x3ad   :  { %v2886_v12 = vsel %vm1536_vm1, %v2883_v22, %v2885_v29 }
 0x3ae   :  { %2650 = vmatmul.f32.gmra.mxu0 %v2614_v44  ;;  %2685 = vmatmul.f32.gmra.mxu1 %v2614_v44  ;;  %v4884_v44 = vld [vmem:[%s9339_s7 + $0x668] sm:$0xff] }
 0x3af   :  { %3019 = vmatpush.msra.mxu2 %v4943_v51 }
 0x3b1   :  { %2283 = vmatmul.f32.gmra.mxu3 %v7212_v57  ;;  %2781 = vmatmul.f32.gmra.mxu2 %v7707_v20  ;;  %v4810_v57 = vld [vmem:[%s9339_s7 + $0x418] sm:$0xff] }
 0x3b2   :  { %3020 = vmatpush.msra.mxu2 %v4941_v32  ;;  %2539 = vmatpush.msra.mxu3 %v4810_v57  ;;  %v2882_v32 = vsel %vm1536_vm1, %v2879_v1, %v2881_v0 }
 0x3b3   :  { %v7718_v34 = vpop.f32.mrf.mxu0  ;;  %v7811_v55 = vpop.f32.mrf.mxu1 }
 0x3b4   :  { %3021 = vmatpush.msra.mxu2 %v4939_v59  ;;  %2540 = vmatpush.msra.mxu3 %v4808_v18  ;;  %v4878_v59 = vld [vmem:[%s9339_s7 + $0x638] sm:$0xff]  ;;  %v2884_v18 = vsel %vm1536_vm1, %v2881_v0, %v2883_v22 }
 0x3b6   :  { %2653 = vmatmul.f32.gmra.mxu0 %v2616_v38  ;;  %2688 = vmatmul.f32.gmra.mxu1 %v2616_v38 }
 0x3b7   :  { %3022 = vmatpush.msra.mxu2 %v4937_v30  ;;  %2794 = vmatpush.msrb.mxu3 %v4902_v35 }
 0x3b9   :  { %2286 = vmatmul.f32.gmra.mxu3 %v7250_v39  ;;  %2784 = vmatmul.f32.gmra.mxu2 %v7737_v8  ;;  %v2875_v39 = vrot.slane %v7100_v16, 7 }
 0x3ba   :  { %3023 = vmatpush.msra.mxu2 %v4935_v49  ;;  %2795 = vmatpush.msrb.mxu3 %v4900_v40  ;;  %v4874_v49 = vld [vmem:[%s9339_s7 + $0x618] sm:$0xff] }
 0x3bb   :  { %v7742_v3 = vpop.f32.mrf.mxu0  ;;  %v2878_v48 = vsel %vm1536_vm1, %v2875_v39, %v2877_v7  ;;  %v7838_v10 = vpop.f32.mrf.mxu1  ;;  %v4964_v7 = vld [vmem:[%s9339_s7 + $0x8e8] sm:$0xff] }
 0x3bc   :  { %2796 = vmatpush.msrb.mxu3 %v4898_v63 }
 0x3be   :  { %2656 = vmatmul.f32.gmra.mxu0 %v2618_v61  ;;  %2691 = vmatmul.f32.gmra.mxu1 %v2618_v61 }
 0x3bf   :  { %2797 = vmatpush.msrb.mxu3 %v4896_v21 }
 0x3c1   :  { %2289 = vmatmul.f32.gmra.mxu3 %v7294_v46  ;;  %2787 = vmatmul.f32.gmra.mxu2 %v7747_v62  ;;  %v2876_v46 = vsel %vm1536_vm1, %v2874_v5, %v2875_v39 }
 0x3c3   :  { %v7755_v2 = vpop.f32.mrf.mxu0  ;;  %v7857_v5 = vpop.f32.mrf.mxu1 }
 0x3c4   :  { %v7758_v27 = vpop.f32.mrf.mxu3  ;;  %v7760_v6 = vpop.f32.mrf.mxu2 }
 0x3c6   :  { %2909 = vmatmul.f32.vlgmr.msra.gmra.mxu0 %v2876_v46  ;;  %2944 = vmatmul.f32.vlgmr.msra.gmra.mxu1 %v2876_v46 }
 0x3c9   :  { %2292 = vmatmul.f32.gmra.mxu3 %v7280_v50  ;;  %2790 = vmatmul.f32.gmra.mxu2 %v7771_v45  ;;  %v4894_v50 = vld [vmem:[%s9339_s7 + $0x6b8] sm:$0xff] }
 0x3ca   :  { %2798 = vmatpush.msrb.mxu3 %v4894_v50  ;;  %v4960_v50 = vld [vmem:[%s9339_s7 + $0x8c8] sm:$0xff] }
 0x3cb   :  { %v7779_v52 = vpop.f32.mrf.mxu0  ;;  %v7875_v21 = vpop.f32.mrf.mxu1 }
 0x3cc   :  { %v7781_v31 = vpop.f32.mrf.mxu3  ;;  %v7783_v56 = vpop.f32.mrf.mxu2  ;;  %2799 = vmatpush.msrb.mxu3 %v4892_v47 }
 0x3ce   :  { %2912 = vmatmul.f32.gmra.mxu0 %v2878_v48  ;;  %2947 = vmatmul.f32.gmra.mxu1 %v2878_v48  ;;  %v4958_v48 = vld [vmem:[%s9339_s7 + $0x8b8] sm:$0xff] }
 0x3cf   :  { %2800 = vmatpush.msrb.mxu3 %v4890_v9 }
 0x3d1   :  { %2541 = vmatmul.f32.vlgmr.msra.gmra.mxu3 %v7380_v14  ;;  %3024 = vmatmul.f32.vlgmr.msra.gmra.mxu2 %v7100_v16  ;;  %v4888_v14 = vld [vmem:[%s9339_s7 + $0x688] sm:$0xff] }
 0x3d2   :  { %2801 = vmatpush.msrb.mxu3 %v4888_v14  ;;  %v4956_v14 = vld [vmem:[%s9339_s7 + $0x8a8] sm:$0xff] }
 0x3d3   :  { %v7798_v43 = vpop.f32.mrf.mxu0  ;;  %v7899_v0 = vpop.f32.mrf.mxu1 }
 0x3d4   :  { %v7800_v33 = vpop.f32.mrf.mxu3  ;;  %v7802_v15 = vpop.f32.mrf.mxu2  ;;  %2802 = vmatpush.msrb.mxu3 %v4886_v37  ;;  %v4952_v37 = vld [vmem:[%s9339_s7 + $0x888] sm:$0xff] }
 0x3d6   :  { %2915 = vmatmul.f32.gmra.mxu0 %v2880_v28  ;;  %2950 = vmatmul.f32.gmra.mxu1 %v2880_v28 }
 0x3d7   :  { %2803 = vmatpush.msrb.mxu3 %v4884_v44  ;;  %v4950_v44 = vld [vmem:[%s9339_s7 + $0x878] sm:$0xff] }
 0x3d9   :  { %2544 = vmatmul.f32.gmra.mxu3 %v7424_v41  ;;  %3027 = vmatmul.f32.gmra.mxu2 %v7152_v42  ;;  %v4882_v41 = vld [vmem:[%s9339_s7 + $0x658] sm:$0xff] }
 0x3da   :  { %2804 = vmatpush.msrb.mxu3 %v4882_v41 }
 0x3db   :  { %v7819_v53 = vpop.f32.mrf.mxu0  ;;  %v7923_v29 = vpop.f32.mrf.mxu1 }
 0x3dc   :  { %v7821_v51 = vpop.f32.mrf.mxu3  ;;  %v7823_v23 = vpop.f32.mrf.mxu2  ;;  %2805 = vmatpush.msrb.mxu3 %v4880_v24 }
 0x3de   :  { %2918 = vmatmul.f32.gmra.mxu0 %v2882_v32  ;;  %2953 = vmatmul.f32.gmra.mxu1 %v2882_v32 }
 0x3df   :  { %2806 = vmatpush.msrb.mxu3 %v4878_v59  ;;  %v4948_v59 = vld [vmem:[%s9339_s7 + $0x868] sm:$0xff] }
 0x3e1   :  { %2547 = vmatmul.f32.gmra.mxu3 %v7468_v11  ;;  %3030 = vmatmul.f32.gmra.mxu2 %v7196_v26  ;;  %v4876_v11 = vld [vmem:[%s9339_s7 + $0x628] sm:$0xff] }
 0x3e2   :  { %2807 = vmatpush.msrb.mxu3 %v4876_v11  ;;  %v4942_v11 = vld [vmem:[%s9339_s7 + $0x838] sm:$0xff] }
 0x3e3   :  { %v7840_v57 = vpop.f32.mrf.mxu0 }
 0x3e4   :  { %v2065_v30 = vpop.f32.mrf.mxu3  ;;  %v2255_v38 = vpop.f32.mrf.mxu2  ;;  %2808 = vmatpush.msrb.mxu3 %v4874_v49 }
 0x3e5   :  { %v2136_v28 = vadd.f32 %v7798_v43, %v2065_v30 }
 0x3e6   :  { %2921 = vmatmul.f32.gmra.mxu0 %v2884_v18  ;;  %2956 = vmatmul.f32.gmra.mxu1 %v2884_v18  ;;  %v2124_v18 = vadd.f32 %v7718_v34, %v7758_v27  ;;  %v4936_v27 = vld [vmem:[%s9339_s7 + $0x808] sm:$0xff] }
 0x3e7   :  { %2809 = vmatpush.msrb.mxu3 %v4872_v13  ;;  %v2304_v41 = vadd.f32 %v2255_v38, %v2136_v28  ;;  %v4944_v38 = vld [vmem:[%s9339_s7 + $0x848] sm:$0xff] }
 0x3e8   :  { %v2296_v34 = vadd.f32 %v7760_v6, %v2124_v18 }
 0x3e9   :  { %2550 = vmatmul.f32.gmra.mxu3 %v7500_v36  ;;  %3033 = vmatmul.f32.gmra.mxu2 %v7228_v58  ;;  %v4966_v36 = vld [vmem:[%s9339_s7 + $0x8f8] sm:$0xff] }
 0x3ea   :  { %3043 = vmatpush.msra.mxu3 %v4966_v36  ;;  %v4938_v36 = vld [vmem:[%s9339_s7 + $0x818] sm:$0xff] }
 0x3eb   :  { %v7855_v61 = vpop.f32.mrf.mxu0 }
 0x3ec   :  { %v2068_v39 = vpop.f32.mrf.mxu3  ;;  %v2258_v35 = vpop.f32.mrf.mxu2  ;;  %3044 = vmatpush.msra.mxu3 %v4964_v7  ;;  %v2127_v7 = vadd.f32 %v7742_v3, %v7781_v31 }
 0x3ed   :  { %v2139_v30 = vadd.f32 %v7819_v53, %v2068_v39 }
 0x3ee   :  { %2924 = vmatmul.f32.gmra.mxu0 %v2886_v12  ;;  %2959 = vmatmul.f32.gmra.mxu1 %v2886_v12 }
 0x3ef   :  { %v2306_v49 = vadd.f32 %v2258_v35, %v2139_v30  ;;  %v2428_v35 = vadd.f32 %v7840_v57, %v2296_v34 }
 0x3f1   :  { %2553 = vmatmul.f32.gmra.mxu3 %v7533_v60  ;;  %3036 = vmatmul.f32.gmra.mxu2 %v7272_v4  ;;  %v4962_v60 = vld [vmem:[%s9339_s7 + $0x8d8] sm:$0xff] }
 0x3f2   :  { %3045 = vmatpush.msra.mxu3 %v4962_v60 }
 0x3f3   :  { %v7865_v46 = vpop.f32.mrf.mxu0 }
 0x3f4   :  { %v7867_v40 = vpop.f32.mrf.mxu3  ;;  %v2507_v63 = vpop.f32.mrf.mxu2  ;;  %3046 = vmatpush.msra.mxu3 %v4960_v50 }
 0x3f5   :  { %v2560_v60 = vadd.f32 %v2507_v63, %v2428_v35 }
 0x3f6   :  { %3047 = vmatpush.msra.mxu3 %v4958_v48 }
 0x3f8   :  { %3048 = vmatpush.msra.mxu3 %v4956_v14 }
 0x3f9   :  { %2556 = vmatmul.f32.gmra.mxu3 %v7517_v19  ;;  %3039 = vmatmul.f32.gmra.mxu2 %v7728_v17  ;;  %v4954_v19 = vld [vmem:[%s9339_s7 + $0x898] sm:$0xff] }
 0x3fa   :  { %3049 = vmatpush.msra.mxu3 %v4954_v19  ;;  %v2410_v19 = vpop.f32.mrf.mxu1 }
 0x3fb   :  { %v7885_v47 = vpop.f32.mrf.mxu0 }
 0x3fc   :  { %v7887_v1 = vpop.f32.mrf.mxu3  ;;  %v2510_v9 = vpop.f32.mrf.mxu2  ;;  %3050 = vmatpush.msra.mxu3 %v4952_v37  ;;  %v2298_v37 = vadd.f32 %v7783_v56, %v2127_v7 }
 0x3fe   :  { %3051 = vmatpush.msra.mxu3 %v4950_v44  ;;  %v2430_v57 = vadd.f32 %v7855_v61, %v2298_v37 }
 0x400   :  { %3052 = vmatpush.msra.mxu3 %v4948_v59  ;;  %v2562_v3 = vadd.f32 %v2510_v9, %v2430_v57 }
 0x401   :  { %2810 = vmatmul.f32.vlgmr.msrb.gmra.mxu3 %v7619_v54  ;;  %v4946_v54 = vld [vmem:[%s9339_s7 + $0x858] sm:$0xff] }
 0x402   :  { %3053 = vmatpush.msra.mxu3 %v4946_v54 }
 0x403   :  { %v2387_v32 = vpop.f32.mrf.mxu0 }
 0x404   :  { %v2436_v24 = vadd.f32 %v2387_v32, %v2304_v41  ;;  %v7905_v22 = vpop.f32.mrf.mxu3  ;;  %v2513_v43 = vpop.f32.mrf.mxu2  ;;  %3054 = vmatpush.msra.mxu3 %v4944_v38 }
 0x406   :  { %3055 = vmatpush.msra.mxu3 %v4942_v11 }
 0x409   :  { %2813 = vmatmul.f32.gmra.mxu3 %v7663_v25  ;;  %v4940_v25 = vld [vmem:[%s9339_s7 + $0x828] sm:$0xff] }
 0x40a   :  { %3056 = vmatpush.msra.mxu3 %v4940_v25 }
 0x40b   :  { %v2390_v53 = vpop.f32.mrf.mxu0 }
 0x40c   :  { %v2438_v13 = vadd.f32 %v2390_v53, %v2306_v49  ;;  %v7925_v39 = vpop.f32.mrf.mxu3  ;;  %v2516_v12 = vpop.f32.mrf.mxu2  ;;  %3057 = vmatpush.msra.mxu3 %v4938_v36 }
 0x40e   :  { %3058 = vmatpush.msra.mxu3 %v4936_v27 }
 0x411   :  { %2816 = vmatmul.f32.gmra.mxu3 %v7707_v20  ;;  %v2130_v20 = vadd.f32 %v7755_v2, %v7800_v33 }
 0x413   :  { %v2642_v50 = vpop.f32.mrf.mxu0  ;;  %v2300_v59 = vadd.f32 %v7802_v15, %v2130_v20 }
 0x414   :  { %v2695_v48 = vadd.f32 %v2642_v50, %v2560_v60  ;;  %v7941_v14 = vpop.f32.mrf.mxu3  ;;  %v2519_v6 = vpop.f32.mrf.mxu2 }
 0x415   :  { %v7943_v28 = vadd.f32 %v2519_v6, %v2436_v24  ;;  %v2413_v24 = vpop.f32.mrf.mxu1  ;;  %v2432_v54 = vadd.f32 %v7865_v46, %v2300_v59 }
 0x417   :  { %v2564_v56 = vadd.f32 %v2513_v43, %v2432_v54 }
 0x419   :  { %2819 = vmatmul.f32.gmra.mxu3 %v7737_v8  ;;  %v2133_v8 = vadd.f32 %v7779_v52, %v7821_v51 }
 0x41b   :  { %v2645_v31 = vpop.f32.mrf.mxu0  ;;  %v2302_v38 = vadd.f32 %v7823_v23, %v2133_v8 }
 0x41c   :  { %v2697_v63 = vadd.f32 %v2645_v31, %v2562_v3  ;;  %v2103_v44 = vpop.f32.mrf.mxu3  ;;  %v2522_v41 = vpop.f32.mrf.mxu2 }
 0x41d   :  { %v7950_v32 = vadd.f32 %v2522_v41, %v2438_v13  ;;  %v2434_v11 = vadd.f32 %v7885_v47, %v2302_v38  ;;  %v2416_v15 = vpop.f32.mrf.mxu1  ;;  %v2174_v60 = vadd.f32 %v7923_v29, %v2103_v44 }
 0x41f   :  { %v2566_v46 = vadd.f32 %v2516_v12, %v2434_v11 }
 0x421   :  { %2822 = vmatmul.f32.gmra.mxu3 %v7747_v62 }
 0x423   :  { %v2648_v61 = vpop.f32.mrf.mxu0 }
 0x424   :  { %v2699_v2 = vadd.f32 %v2648_v61, %v2564_v56  ;;  %v2278_v33 = vpop.f32.mrf.mxu3  ;;  %v2776_v9 = vpop.f32.mrf.mxu2 }
 0x425   :  { %v7957_v30 = vadd.f32 %v2776_v9, %v2695_v48  ;;  %v2419_v51 = vpop.f32.mrf.mxu1  ;;  %v2159_v48 = vadd.f32 %v7811_v55, %v7867_v40  ;;  %v2168_v9 = vadd.f32 %v7875_v21, %v7925_v39  ;;  %v8003_v21 = vld [vmem:[%s9340_s8] sm:$0x3] }
 0x427   :  { %v2297_v37 = vadd.f32 %v2278_v33, %v2159_v48 }
 0x429   :  { %2825 = vmatmul.f32.gmra.mxu3 %v7771_v45  ;;  %v2429_v3 = vadd.f32 %v2410_v19, %v2297_v37 }
 0x42b   :  { %v2651_v18 = vpop.f32.mrf.mxu0 }
 0x42c   :  { %v2701_v62 = vadd.f32 %v2651_v18, %v2566_v46  ;;  %v2281_v49 = vpop.f32.mrf.mxu3  ;;  %v2779_v53 = vpop.f32.mrf.mxu2 }
 0x42d   :  { %v7962_v52 = vadd.f32 %v2779_v53, %v2697_v63  ;;  %v7970_v12 = vpop.f32.mrf.mxu1 }
 0x431   :  { %3059 = vmatmul.f32.vlgmr.msra.gmra.mxu3 %v7100_v16 }
 0x433   :  { %v2654_v43 = vpop.f32.mrf.mxu0 }
 0x434   :  { %v2284_v13 = vpop.f32.mrf.mxu3  ;;  %v2782_v25 = vpop.f32.mrf.mxu2 }
 0x435   :  { %v7965_v36 = vadd.f32 %v2782_v25, %v2699_v2  ;;  %v2425_v7 = vpop.f32.mrf.mxu1 }
 0x439   :  { %3062 = vmatmul.f32.gmra.mxu3 %v7152_v42 }
 0x43b   :  { %v7968_v23 = vpop.f32.mrf.mxu0 }
 0x43c   :  { %v2287_v45 = vpop.f32.mrf.mxu3  ;;  %v2785_v47 = vpop.f32.mrf.mxu2 }
 0x43d   :  { %v2835_v34 = vadd.f32 %v2785_v47, %v2701_v62  ;;  %v2303_v11 = vadd.f32 %v2287_v45, %v2168_v9 }
 0x43f   :  { %v2435_v46 = vadd.f32 %v2419_v51, %v2303_v11 }
 0x441   :  { %3065 = vmatmul.f32.gmra.mxu3 %v7196_v26  ;;  %v2677_v26 = vpop.f32.mrf.mxu1 }
 0x443   :  { %v7973_v16 = vpop.f32.mrf.mxu0 }
 0x444   :  { %v2290_v27 = vpop.f32.mrf.mxu3  ;;  %v2788_v35 = vpop.f32.mrf.mxu2 }
 0x449   :  { %3068 = vmatmul.f32.gmra.mxu3 %v7228_v58  ;;  %v2162_v58 = vadd.f32 %v7838_v10, %v7887_v1  ;;  %v2680_v55 = vpop.f32.mrf.mxu1 }
 0x44b   :  { %v2913_v57 = vpop.f32.mrf.mxu0  ;;  %v2299_v44 = vadd.f32 %v2281_v49, %v2162_v58 }
 0x44c   :  { %v2293_v50 = vpop.f32.mrf.mxu3  ;;  %v7977_v42 = vpop.f32.mrf.mxu2 }
 0x44d   :  { %v2307_v6 = vadd.f32 %v2293_v50, %v2174_v60  ;;  %v2431_v40 = vadd.f32 %v2413_v24, %v2299_v44  ;;  %v2963_v50 = vadd.f32 %v7973_v16, %v7957_v30 }
 0x44f   :  { %v7981_v20 = vadd.f32 %v2425_v7, %v2307_v6 }
 0x451   :  { %3071 = vmatmul.f32.gmra.mxu3 %v7272_v4  ;;  %v2165_v4 = vadd.f32 %v7857_v5, %v7905_v22  ;;  %v2683_v38 = vpop.f32.mrf.mxu1  ;;  %v2171_v5 = vadd.f32 %v7899_v0, %v7941_v14  ;;  %v2965_v0 = vadd.f32 %v2913_v57, %v7962_v52  ;;  %v3092_v14 = vperm.slane %v8003_v21, 0 }
 0x453   :  { %v2916_v59 = vpop.f32.mrf.mxu0  ;;  %v2301_v56 = vadd.f32 %v2284_v13, %v2165_v4  ;;  %v2305_v13 = vadd.f32 %v2290_v27, %v2171_v5 }
 0x454   :  { %v2542_v31 = vpop.f32.mrf.mxu3  ;;  %v3025_v63 = vpop.f32.mrf.mxu2  ;;  %v2967_v45 = vadd.f32 %v2916_v59, %v7965_v36  ;;  %v2705_v36 = vadd.f32 %v7968_v23, %v7950_v32 }
 0x455   :  { %v2561_v29 = vadd.f32 %v2542_v31, %v2429_v3  ;;  %v2433_v10 = vadd.f32 %v2416_v15, %v2301_v56  ;;  %v2703_v15 = vadd.f32 %v2654_v43, %v7943_v28  ;;  %v2437_v28 = vadd.f32 %v7970_v12, %v2305_v13 }
 0x456   :  { %v3078_v52 = vadd.f32 %v3025_v63, %v2963_v50  ;;  %v2839_v3 = vadd.f32 %v7977_v42, %v2705_v36 }
 0x457   :  { %v7986_v41 = vadd.f32 %v2677_v26, %v2561_v29  ;;  %v2837_v51 = vadd.f32 %v2788_v35, %v2703_v15 }
 0x458   :  { %v8022_v29 = vadd.f32 %v3092_v14, %v3078_v52 }
 0x459   :  { %3074 = vmatmul.f32.gmra.mxu3 %v7728_v17  ;;  %v2686_v53 = vpop.f32.mrf.mxu1 }
 0x45a   :  { %vm3108_vm13 = vcmp.gt.f32.partialorder %v8022_v29, 0.0 }
 0x45b   :  { %v2919_v2 = vpop.f32.mrf.mxu0 }
 0x45c   :  { %v2545_v54 = vpop.f32.mrf.mxu3  ;;  %v3028_v8 = vpop.f32.mrf.mxu2  ;;  %v2969_v25 = vadd.f32 %v2919_v2, %v2835_v34 }
 0x45d   :  { %v2563_v19 = vadd.f32 %v2545_v54, %v2431_v40  ;;  %v3080_v43 = vadd.f32 %v3028_v8, %v2965_v0  ;;  %v3120_v54 = vmin.f32 %v8022_v29, 0.0 }
 0x45f   :  { %v7991_v61 = vadd.f32 %v2680_v55, %v2563_v19  ;;  %v8019_v26 = vadd.f32 %v3092_v14, %v3080_v43  ;;  %v3132_v56 = vmul.f32 1.442695, %v3120_v54 }
 0x461   :  { %v3122_v59 = vmin.f32 %v8019_v26, 0.0  ;;  %vm3110_vm1 = vcmp.gt.f32.partialorder %v8019_v26, 0.0 }
 0x463   :  { %v2922_v49 = vpop.f32.mrf.mxu0  ;;  %v3136_v4 = vmul.f32 1.442695, %v3122_v59 }
 0x464   :  { %v2548_v1 = vpop.f32.mrf.mxu3  ;;  %v3031_v33 = vpop.f32.mrf.mxu2  ;;  %v2971_v7 = vadd.f32 %v2922_v49, %v2837_v51 }
 0x465   :  { %v2565_v17 = vadd.f32 %v2548_v1, %v2433_v10  ;;  %v3082_v60 = vadd.f32 %v3031_v33, %v2967_v45 }
 0x467   :  { %v7995_v24 = vadd.f32 %v2683_v38, %v2565_v17  ;;  %v8017_v37 = vadd.f32 %v3092_v14, %v3082_v60 }
 0x469   :  { %v3124_v30 = vmin.f32 %v8017_v37, 0.0  ;;  %vm3112_vm9 = vcmp.gt.f32.partialorder %v8017_v37, 0.0 }
 0x46b   :  { %v2925_v12 = vpop.f32.mrf.mxu0  ;;  %v3140_v42 = vmul.f32 1.442695, %v3124_v30 }
 0x46c   :  { %v2551_v18 = vpop.f32.mrf.mxu3  ;;  %v3034_v62 = vpop.f32.mrf.mxu2  ;;  %v2973_v16 = vadd.f32 %v2925_v12, %v2839_v3 }
 0x46d   :  { %v2567_v22 = vadd.f32 %v2551_v18, %v2435_v46  ;;  %v3084_v47 = vadd.f32 %v3034_v62, %v2969_v25 }
 0x46f   :  { %v8005_v39 = vadd.f32 %v2686_v53, %v2567_v22  ;;  %v3102_v48 = vadd.f32 %v3092_v14, %v3084_v47 }
 0x471   :  { %v3126_v31 = vmin.f32 %v3102_v48, 0.0  ;;  %vm3114_vm8 = vcmp.gt.f32.partialorder %v3102_v48, 0.0 }
 0x473   :  { %v3144_v63 = vmul.f32 1.442695, %v3126_v31 }
 0x474   :  { %v2554_v34 = vpop.f32.mrf.mxu3  ;;  %v3037_v27 = vpop.f32.mrf.mxu2 }
 0x475   :  { %v8013_v6 = vadd.f32 %v2554_v34, %v2437_v28  ;;  %v3086_v35 = vadd.f32 %v3037_v27, %v2971_v7  ;;  %v2689_v28 = vpop.f32.mrf.mxu1 }
 0x477   :  { %v3104_v57 = vadd.f32 %v3092_v14, %v3086_v35 }
 0x479   :  { %v3128_v58 = vmin.f32 %v3104_v57, 0.0  ;;  %vm3116_vm7 = vcmp.gt.f32.partialorder %v3104_v57, 0.0 }
 0x47b   :  { %v3148_v44 = vmul.f32 1.442695, %v3128_v58 }
 0x47c   :  { %v2557_v32 = vpop.f32.mrf.mxu3  ;;  %v3040_v23 = vpop.f32.mrf.mxu2 }
 0x47d   :  { %v8027_v55 = vadd.f32 %v2557_v32, %v7981_v20  ;;  %v3088_v40 = vadd.f32 %v3040_v23, %v2973_v16  ;;  %5353 = vpow2.f32 %v3148_v44 }
 0x47e   :  { %5355 = vpow2.f32 %v3144_v63 }
 0x47f   :  { %v3106_v8 = vadd.f32 %v3092_v14, %v3088_v40  ;;  %5357 = vpow2.f32 %v3140_v42 }
 0x480   :  { %5359 = vpow2.f32 %v3136_v4 }
 0x481   :  { %v3130_v19 = vmin.f32 %v3106_v8, 0.0  ;;  %vm3118_vm0 = vcmp.gt.f32.partialorder %v3106_v8, 0.0 }
 0x483   :  { %v3152_v2 = vmul.f32 1.442695, %v3130_v19  ;;  %v5354_v1 = vpop.eup %5353  ;;  %v3093_v19 = vperm.slane %v8003_v21, 1 }
 0x484   :  { %v2811_v10 = vpop.f32.mrf.mxu3  ;;  %v5356_v20 = vpop.eup %5355  ;;  %v4975_v9 = vadd.f32 -1.0, %v5354_v1 }
 0x485   :  { %5361 = vpow2.f32 %v3152_v2  ;;  %v8031_v33 = vadd.f32 %v2811_v10, %v7986_v41  ;;  %v5358_v38 = vpop.eup %5357  ;;  %v4973_v11 = vadd.f32 -1.0, %v5356_v20 }
 0x486   :  { %5363 = vpow2.f32 %v3132_v56  ;;  %v5360_v17 = vpop.eup %5359  ;;  %v3176_v5 = vmul.f32 1.6732632, %v4975_v9  ;;  %v4971_v22 = vadd.f32 -1.0, %v5358_v38 }
 0x487   :  { %v3174_v13 = vmul.f32 1.6732632, %v4973_v11  ;;  %v4969_v25 = vadd.f32 -1.0, %v5360_v17 }
 0x488   :  { %v3188_v51 = vsel %vm3116_vm7, %v3104_v57, %v3176_v5  ;;  %v3172_v45 = vmul.f32 1.6732632, %v4971_v22  ;;  %vm4095_vm7 = vcmask 15360  }
 0x489   :  { %v3186_v14 = vsel %vm3114_vm8, %v3102_v48, %v3174_v13  ;;  %v3170_v7 = vmul.f32 1.6732632, %v4969_v25  ;;  %v3200_v60 = vmul.f32 1.050701, %v3188_v51  ;;  %v5002_v51 = vld [vmem:[%s9342_s10 + $0x178] sm:$0xff] }
 0x48a   :  { %v3184_v43 = vsel %vm3112_vm9, %v8017_v37, %v3172_v45  ;;  %v3198_v50 = vmul.f32 1.050701, %v3186_v14  ;;  %v5001_v45 = vld [vmem:[%s9342_s10 + $0x170] sm:$0xff]  ;;  %3346 = vmatpush.msrb.mxu2 %v5002_v51 }
 0x48b   :  { %v5362_v46 = vpop.eup %5361  ;;  %v3182_v35 = vsel %vm3110_vm1, %v8019_v26, %v3170_v7  ;;  %v3196_v48 = vmul.f32 1.050701, %v3184_v43  ;;  %v8078_v7 = vld [vmem:[%s9341_s9 + $0x8] sm:$0xff]  ;;  %v5009_v51 = vld [vmem:[%s9342_s10 + $0x1b0] sm:$0xff] }
 0x48c   :  { %v4977_v18 = vadd.f32 -1.0, %v5362_v46  ;;  %v2814_v62 = vpop.f32.mrf.mxu3  ;;  %v5364_v49 = vpop.eup %5363  ;;  %v3194_v52 = vmul.f32 1.050701, %v3182_v35  ;;  %3347 = vmatpush.msrb.mxu2 %v5001_v45  ;;  %v4998_v35 = vld [vmem:[%s9342_s10 + $0x158] sm:$0xff]  ;;  %v4987_v45 = vld [vmem:[%s9342_s10 + $0x100] sm:$0xff] }
 0x48d   :  { %v2832_v53 = vadd.f32 %v2814_v62, %v7991_v61  ;;  %v4967_v47 = vadd.f32 -1.0, %v5364_v49 }
 0x48e   :  { %v3178_v15 = vmul.f32 1.6732632, %v4977_v18 }
 0x48f   :  { %v3168_v34 = vmul.f32 1.6732632, %v4967_v47 }
 0x490   :  { %v3190_v41 = vsel %vm3118_vm0, %v3106_v8, %v3178_v15 }
 0x491   :  { %v3202_v0 = vmul.f32 1.050701, %v3190_v41  ;;  %v3180_v36 = vsel %vm3108_vm13, %v8022_v29, %v3168_v34  ;;  %v2704_v29 = vadd.f32 %v2689_v28, %v8013_v6  ;;  %v5000_v28 = vld [vmem:[%s9342_s10 + $0x168] sm:$0xff] }
 0x492   :  { %v3192_v57 = vmul.f32 1.050701, %v3180_v36  ;;  %3348 = vmatpush.msrb.mxu2 %v5000_v28  ;;  %v3206_v28 = vld [vmem:[%s9341_s9 + $0x10] sm:$0x3] }
 0x493   :  { %4979 = vmatpush.msk.msrb.mxu0 %vm1117_vm14, %v3202_v0 }
 0x494   :  { %v2817_v61 = vpop.f32.mrf.mxu3 }
 0x495   :  { %v2834_v27 = vadd.f32 %v2817_v61, %v7995_v24  ;;  %3234 = vmatpush.msrb.mxu0 %v3200_v60  ;;  %v2692_v24 = vpop.f32.mrf.mxu1 }
 0x496   :  { %v2706_v1 = vadd.f32 %v2692_v24, %v8027_v55  ;;  %v4996_v24 = vld [vmem:[%s9342_s10 + $0x148] sm:$0xff] }
 0x497   :  { %3235 = vmatpush.msrb.mxu0 %v3198_v50  ;;  %v4999_v50 = vld [vmem:[%s9342_s10 + $0x160] sm:$0xff] }
 0x498   :  { %3349 = vmatpush.msrb.mxu2 %v4999_v50  ;;  %v3287_v50 = vld [vmem:[%s9342_s10 + $0x60] sm:$0xff] }
 0x499   :  { %3236 = vmatpush.msrb.mxu0 %v3196_v48 }
 0x49a   :  { %3350 = vmatpush.msrb.mxu2 %v4998_v35  ;;  %v3303_v35 = vld [vmem:[%s9342_s10 + $0xe0] sm:$0xff] }
 0x49b   :  { %3237 = vmatpush.msrb.mxu0 %v3194_v52  ;;  %v4997_v52 = vld [vmem:[%s9342_s10 + $0x150] sm:$0xff] }
 0x49c   :  { %v2820_v37 = vpop.f32.mrf.mxu3  ;;  %3351 = vmatpush.msrb.mxu2 %v4997_v52  ;;  %v3285_v52 = vld [vmem:[%s9342_s10 + $0x50] sm:$0xff] }
 0x49d   :  { %v2836_v12 = vadd.f32 %v2820_v37, %v8005_v39  ;;  %3238 = vmatpush.msrb.mxu0 %v3192_v57  ;;  %v2945_v31 = vpop.f32.mrf.mxu1  ;;  %v8047_v39 = vld [vmem:[%s9341_s9] sm:$0xff] }
 0x49e   :  { %4980 = vmatmul.msk.f32.vlgmr.msrb.gmra.mxu0 %vm3207_vm2, %v8047_v39  ;;  %v2964_v20 = vadd.f32 %v2945_v31, %v8031_v33  ;;  %3352 = vmatpush.msrb.mxu2 %v4996_v24  ;;  %v3299_v24 = vld [vmem:[%s9342_s10 + $0xc0] sm:$0xff] }
 0x4a4   :  { %v2823_v3 = vpop.f32.mrf.mxu3 }
 0x4a5   :  { %v2948_v30 = vpop.f32.mrf.mxu1  ;;  %v2838_v63 = vadd.f32 %v2823_v3, %v2704_v29  ;;  %v5018_v3 = vld [vmem:[%s9342_s10 + $0x1f8] sm:$0xff] }
 0x4a6   :  { %v2966_v4 = vadd.f32 %v2948_v30, %v2832_v53  ;;  %4981 = vmatmul.msk.f32.gmra.mxu0 %vm3207_vm2, %v8078_v7 }
 0x4a7   :  { %3366 = vmatpush.msra.mxu0 %v5018_v3  ;;  %v3282_v3 = vld [vmem:[%s9342_s10 + $0x38] sm:$0xff] }
 0x4ac   :  { %v2826_v58 = vpop.f32.mrf.mxu3 }
 0x4ad   :  { %v2951_v16 = vpop.f32.mrf.mxu1  ;;  %v2840_v17 = vadd.f32 %v2826_v58, %v2706_v1  ;;  %v5017_v58 = vld [vmem:[%s9342_s10 + $0x1f0] sm:$0xff] }
 0x4ae   :  { %v2968_v42 = vadd.f32 %v2951_v16, %v2834_v27  ;;  %3367 = vmatpush.msra.mxu0 %v5017_v58  ;;  %v3281_v58 = vld [vmem:[%s9342_s10 + $0x30] sm:$0xff] }
 0x4af   :  { %4982 = vmatmul.msk.f32.gmra.mxu0 %vm3207_vm2, %v3206_v28 }
 0x4b4   :  { %v3060_v26 = vpop.f32.mrf.mxu3 }
 0x4b5   :  { %v2954_v32 = vpop.f32.mrf.mxu1  ;;  %v3079_v11 = vadd.f32 %v3060_v26, %v2964_v20  ;;  %v4992_v20 = vld [vmem:[%s9342_s10 + $0x128] sm:$0xff] }
 0x4b6   :  { %v2970_v40 = vadd.f32 %v2954_v32, %v2836_v12 }
 0x4b7   :  { %v8064_v49 = vadd.f32 %v3093_v19, %v3079_v11 }
 0x4b9   :  { %v3121_v47 = vmin.f32 %v8064_v49, 0.0  ;;  %vm3109_vm12 = vcmp.gt.f32.partialorder %v8064_v49, 0.0 }
 0x4bb   :  { %v3134_v43 = vmul.f32 1.442695, %v3121_v47  ;;  %v3290_v47 = vld [vmem:[%s9342_s10 + $0x78] sm:$0xff] }
 0x4bc   :  { %v3063_v44 = vpop.f32.mrf.mxu3 }
 0x4bd   :  { %v2957_v54 = vpop.f32.mrf.mxu1  ;;  %v3081_v6 = vadd.f32 %v3063_v44, %v2966_v4  ;;  %v4995_v44 = vld [vmem:[%s9342_s10 + $0x140] sm:$0xff] }
 0x4be   :  { %v2972_v2 = vadd.f32 %v2957_v54, %v2838_v63  ;;  %v5015_v54 = vld [vmem:[%s9342_s10 + $0x1e0] sm:$0xff]  ;;  %3353 = vmatpush.msrb.mxu2 %v4995_v44 }
 0x4bf   :  { %v8060_v62 = vadd.f32 %v3093_v19, %v3081_v6  ;;  %v5014_v6 = vld [vmem:[%s9342_s10 + $0x1d8] sm:$0xff]  ;;  %v3295_v44 = vld [vmem:[%s9342_s10 + $0xa0] sm:$0xff] }
 0x4c1   :  { %v3123_v15 = vmin.f32 %v8060_v62, 0.0  ;;  %vm3111_vm11 = vcmp.gt.f32.partialorder %v8060_v62, 0.0 }
 0x4c3   :  { %v3138_v60 = vmul.f32 1.442695, %v3123_v15 }
 0x4c4   :  { %v3066_v59 = vpop.f32.mrf.mxu3 }
 0x4c5   :  { %v3083_v56 = vadd.f32 %v3066_v59, %v2968_v42  ;;  %v2960_v22 = vpop.f32.mrf.mxu1  ;;  %v5016_v59 = vld [vmem:[%s9342_s10 + $0x1e8] sm:$0xff] }
 0x4c6   :  { %v2974_v53 = vadd.f32 %v2960_v22, %v2840_v17  ;;  %3368 = vmatpush.msra.mxu0 %v5016_v59  ;;  %v5013_v17 = vld [vmem:[%s9342_s10 + $0x1d0] sm:$0xff]  ;;  %v3294_v59 = vld [vmem:[%s9342_s10 + $0x98] sm:$0xff] }
 0x4c7   :  { %v8056_v46 = vadd.f32 %v3093_v19, %v3083_v56  ;;  %v4993_v56 = vld [vmem:[%s9342_s10 + $0x130] sm:$0xff] }
 0x4c8   :  { %3369 = vmatpush.msra.mxu0 %v5015_v54  ;;  %v5004_v54 = vld [vmem:[%s9342_s10 + $0x188] sm:$0xff] }
 0x4c9   :  { %v3125_v55 = vmin.f32 %v8056_v46, 0.0  ;;  %vm3113_vm10 = vcmp.gt.f32.partialorder %v8056_v46, 0.0 }
 0x4ca   :  { %3370 = vmatpush.msra.mxu0 %v5014_v6  ;;  %v5050_v6 = vld [vmem:[%s9342_s10 + $0x2f8] sm:$0xff] }
 0x4cb   :  { %v3142_v0 = vmul.f32 1.442695, %v3125_v55 }
 0x4cc   :  { %v3069_v23 = vpop.f32.mrf.mxu3  ;;  %3371 = vmatpush.msra.mxu0 %v5013_v17  ;;  %v5029_v17 = vld [vmem:[%s9342_s10 + $0x250] sm:$0xff] }
 0x4cd   :  { %v3085_v8 = vadd.f32 %v3069_v23, %v2970_v40  ;;  %v4994_v40 = vld [vmem:[%s9342_s10 + $0x138] sm:$0xff] }
 0x4ce   :  { %3354 = vmatpush.msrb.mxu2 %v4994_v40  ;;  %v5033_v40 = vld [vmem:[%s9342_s10 + $0x270] sm:$0xff] }
 0x4cf   :  { %v8054_v9 = vadd.f32 %v3093_v19, %v3085_v8 }
 0x4d0   :  { %3355 = vmatpush.msrb.mxu2 %v4993_v56  ;;  %v3277_v56 = vld [vmem:[%s9342_s10 + $0x10] sm:$0xff] }
 0x4d1   :  { %v3127_v21 = vmin.f32 %v8054_v9, 0.0  ;;  %vm3115_vm6 = vcmp.gt.f32.partialorder %v8054_v9, 0.0 }
 0x4d2   :  { %3356 = vmatpush.msrb.mxu2 %v4992_v20  ;;  %v5049_v20 = vld [vmem:[%s9342_s10 + $0x2f0] sm:$0xff] }
 0x4d3   :  { %v3146_v25 = vmul.f32 1.442695, %v3127_v21 }
 0x4d4   :  { %v3072_v10 = vpop.f32.mrf.mxu3 }
 0x4d5   :  { %v3087_v38 = vadd.f32 %v3072_v10, %v2972_v2 }
 0x4d7   :  { %v8058_v18 = vadd.f32 %v3093_v19, %v3087_v38 }
 0x4d9   :  { %v3129_v5 = vmin.f32 %v8058_v18, 0.0  ;;  %vm3117_vm5 = vcmp.gt.f32.partialorder %v8058_v18, 0.0 }
 0x4db   :  { %v3150_v33 = vmul.f32 1.442695, %v3129_v5  ;;  %v5012_v5 = vld [vmem:[%s9342_s10 + $0x1c8] sm:$0xff] }
 0x4dc   :  { %v3075_v13 = vpop.f32.mrf.mxu3  ;;  %3372 = vmatpush.msra.mxu0 %v5012_v5  ;;  %v5065_v5 = vld [vmem:[%s9342_s10 + $0x370] sm:$0xff] }
 0x4dd   :  { %v3089_v41 = vadd.f32 %v3075_v13, %v2974_v53  ;;  %5365 = vpow2.f32 %v3150_v33  ;;  %v5011_v33 = vld [vmem:[%s9342_s10 + $0x1c0] sm:$0xff]  ;;  %v5010_v13 = vld [vmem:[%s9342_s10 + $0x1b8] sm:$0xff] }
 0x4de   :  { %5367 = vpow2.f32 %v3146_v25  ;;  %v4988_v25 = vld [vmem:[%s9342_s10 + $0x108] sm:$0xff]  ;;  %3373 = vmatpush.msra.mxu0 %v5011_v33  ;;  %v5026_v33 = vld [vmem:[%s9342_s10 + $0x238] sm:$0xff] }
 0x4df   :  { %v3107_v14 = vadd.f32 %v3093_v19, %v3089_v41  ;;  %5369 = vpow2.f32 %v3142_v0  ;;  %v3306_v0 = vld [vmem:[%s9342_s10 + $0xf8] sm:$0xff] }
 0x4e0   :  { %5371 = vpow2.f32 %v3138_v60  ;;  %3374 = vmatpush.msra.mxu0 %v5010_v13  ;;  %v3289_v60 = vld [vmem:[%s9342_s10 + $0x70] sm:$0xff]  ;;  %v5044_v13 = vld [vmem:[%s9342_s10 + $0x2c8] sm:$0xff] }
 0x4e1   :  { %v3131_v61 = vmin.f32 %v3107_v14, 0.0  ;;  %vm3119_vm3 = vcmp.gt.f32.partialorder %v3107_v14, 0.0 }
 0x4e2   :  { %3375 = vmatpush.msra.mxu0 %v5009_v51  ;;  %v5061_v51 = vld [vmem:[%s9342_s10 + $0x350] sm:$0xff] }
 0x4e3   :  { %v3154_v34 = vmul.f32 1.442695, %v3131_v61  ;;  %v5366_v27 = vpop.eup %5365  ;;  %v3305_v61 = vld [vmem:[%s9342_s10 + $0xf0] sm:$0xff] }
 0x4e4   :  { %v5368_v48 = vpop.eup %5367  ;;  %v4976_v36 = vadd.f32 -1.0, %v5366_v27  ;;  %v5006_v27 = vld [vmem:[%s9342_s10 + $0x198] sm:$0xff] }
 0x4e5   :  { %5373 = vpow2.f32 %v3154_v34  ;;  %v5370_v57 = vpop.eup %5369  ;;  %v4974_v12 = vadd.f32 -1.0, %v5368_v48  ;;  %v3304_v34 = vld [vmem:[%s9342_s10 + $0xe8] sm:$0xff]  ;;  %v3286_v48 = vld [vmem:[%s9342_s10 + $0x58] sm:$0xff] }
 0x4e6   :  { %5375 = vpow2.f32 %v3134_v43  ;;  %v5372_v37 = vpop.eup %5371  ;;  %v3177_v26 = vmul.f32 1.6732632, %v4976_v36  ;;  %v4972_v16 = vadd.f32 -1.0, %v5370_v57  ;;  %v5007_v43 = vld [vmem:[%s9342_s10 + $0x1a0] sm:$0xff]  ;;  %v3302_v36 = vld [vmem:[%s9342_s10 + $0xd8] sm:$0xff]  ;;  %v3301_v57 = vld [vmem:[%s9342_s10 + $0xd0] sm:$0xff] }
 0x4e7   :  { %v4970_v23 = vadd.f32 -1.0, %v5372_v37  ;;  %v3175_v63 = vmul.f32 1.6732632, %v4974_v12  ;;  %v3284_v37 = vld [vmem:[%s9342_s10 + $0x48] sm:$0xff] }
 0x4e8   :  { %v3189_v8 = vsel %vm3117_vm5, %v8058_v18, %v3177_v26  ;;  %v3173_v4 = vmul.f32 1.6732632, %v4972_v16  ;;  %v3300_v12 = vld [vmem:[%s9342_s10 + $0xc8] sm:$0xff] }
 0x4e9   :  { %v3187_v10 = vsel %vm3115_vm6, %v8054_v9, %v3175_v63  ;;  %v3171_v1 = vmul.f32 1.6732632, %v4970_v23  ;;  %v3201_v38 = vmul.f32 1.050701, %v3189_v8  ;;  %v4991_v9 = vld [vmem:[%s9342_s10 + $0x120] sm:$0xff]  ;;  %v3280_v26 = vld [vmem:[%s9342_s10 + $0x28] sm:$0xff] }
 0x4ea   :  { %v3185_v11 = vsel %vm3113_vm10, %v8056_v46, %v3173_v4  ;;  %v3199_v21 = vmul.f32 1.050701, %v3187_v10  ;;  %v4990_v46 = vld [vmem:[%s9342_s10 + $0x118] sm:$0xff]  ;;  %3357 = vmatpush.msrb.mxu2 %v4991_v9  ;;  %v3296_v16 = vld [vmem:[%s9342_s10 + $0xa8] sm:$0xff]  ;;  %v5005_v23 = vld [vmem:[%s9342_s10 + $0x190] sm:$0xff] }
 0x4eb   :  { %v5374_v31 = vpop.eup %5373  ;;  %v3183_v22 = vsel %vm3111_vm11, %v8060_v62, %v3171_v1  ;;  %v3197_v55 = vmul.f32 1.050701, %v3185_v11  ;;  %v4989_v62 = vld [vmem:[%s9342_s10 + $0x110] sm:$0xff]  ;;  %v3292_v63 = vld [vmem:[%s9342_s10 + $0x88] sm:$0xff]  ;;  %v3291_v8 = vld [vmem:[%s9342_s10 + $0x80] sm:$0xff] }
 0x4ec   :  { %v4978_v30 = vadd.f32 -1.0, %v5374_v31  ;;  %v5376_v32 = vpop.eup %5375  ;;  %v3195_v15 = vmul.f32 1.050701, %v3183_v22  ;;  %3358 = vmatpush.msrb.mxu2 %v4990_v46  ;;  %v3298_v31 = vld [vmem:[%s9342_s10 + $0xb8] sm:$0xff]  ;;  %v5032_v4 = vld [vmem:[%s9342_s10 + $0x268] sm:$0xff]  ;;  %v5027_v22 = vld [vmem:[%s9342_s10 + $0x240] sm:$0xff] }
 0x4ed   :  { %v4968_v19 = vadd.f32 -1.0, %v5376_v32  ;;  %v3293_v32 = vld [vmem:[%s9342_s10 + $0x90] sm:$0xff]  ;;  %v3276_v10 = vld [vmem:[%s9342_s10 + $0x8] sm:$0xff]  ;;  %v5030_v1 = vld [vmem:[%s9342_s10 + $0x258] sm:$0xff] }
 0x4ee   :  { %v3179_v29 = vmul.f32 1.6732632, %v4978_v30  ;;  %3359 = vmatpush.msrb.mxu2 %v4989_v62  ;;  %v3297_v30 = vld [vmem:[%s9342_s10 + $0xb0] sm:$0xff]  ;;  %v5048_v11 = vld [vmem:[%s9342_s10 + $0x2e8] sm:$0xff]  ;;  %v5046_v46 = vld [vmem:[%s9342_s10 + $0x2d8] sm:$0xff] }
 0x4ef   :  { %v3169_v18 = vmul.f32 1.6732632, %v4968_v19  ;;  %v5003_v19 = vld [vmem:[%s9342_s10 + $0x180] sm:$0xff]  ;;  %v5028_v9 = vld [vmem:[%s9342_s10 + $0x248] sm:$0xff] }
 0x4f0   :  { %v3191_v42 = vsel %vm3119_vm3, %v3107_v14, %v3179_v29  ;;  %3360 = vmatpush.msrb.mxu2 %v4988_v25  ;;  %v5008_v14 = vld [vmem:[%s9342_s10 + $0x1a8] sm:$0xff]  ;;  %v3279_v29 = vld [vmem:[%s9342_s10 + $0x20] sm:$0xff]  ;;  %v5062_v25 = vld [vmem:[%s9342_s10 + $0x358] sm:$0xff] }
 0x4f1   :  { %v3203_v2 = vmul.f32 1.050701, %v3191_v42  ;;  %v3181_v53 = vsel %vm3109_vm12, %v8064_v49, %v3169_v18  ;;  %v5034_v49 = vld [vmem:[%s9342_s10 + $0x278] sm:$0xff]  ;;  %3376 = vmatpush.msra.mxu0 %v5008_v14  ;;  %v5063_v62 = vld [vmem:[%s9342_s10 + $0x360] sm:$0xff] }
 0x4f2   :  { %v3193_v41 = vmul.f32 1.050701, %v3181_v53  ;;  %3463 = vmatpush.msrb.mxu3 %v5034_v49  ;;  %3361 = vmatpush.msrb.mxu2 %v4987_v45  ;;  %v3278_v42 = vld [vmem:[%s9342_s10 + $0x18] sm:$0xff]  ;;  %v5045_v53 = vld [vmem:[%s9342_s10 + $0x2d0] sm:$0xff]  ;;  %v5024_v49 = vld [vmem:[%s9342_s10 + $0x228] sm:$0xff] }
 0x4f3   :  { %4983 = vmatpush.msk.msrb.mxu1 %vm1117_vm14, %v3203_v2  ;;  %3377 = vmatpush.msra.mxu0 %v5007_v43  ;;  %v5031_v2 = vld [vmem:[%s9342_s10 + $0x260] sm:$0xff]  ;;  %v5066_v18 = vld [vmem:[%s9342_s10 + $0x378] sm:$0xff]  ;;  %v5040_v43 = vld [vmem:[%s9342_s10 + $0x2a8] sm:$0xff] }
 0x4f4   :  { %3406 = vmatpush.msra.mxu2 %v3306_v0  ;;  %3464 = vmatpush.msrb.mxu3 %v5033_v40  ;;  %v5023_v45 = vld [vmem:[%s9342_s10 + $0x220] sm:$0xff]  ;;  %v5060_v0 = vld [vmem:[%s9342_s10 + $0x348] sm:$0xff]  ;;  %v5022_v14 = vld [vmem:[%s9342_s10 + $0x218] sm:$0xff] }
 0x4f5   :  { %3260 = vmatpush.msrb.mxu1 %v3201_v38  ;;  %3378 = vmatpush.msra.mxu0 %v5006_v27  ;;  %v3275_v38 = vld [vmem:[%s9342_s10] sm:$0xff] }
 0x4f6   :  { %3407 = vmatpush.msra.mxu2 %v3305_v61  ;;  %3465 = vmatpush.msrb.mxu3 %v5032_v4  ;;  %v5021_v61 = vld [vmem:[%s9342_s10 + $0x210] sm:$0xff]  ;;  %v5039_v27 = vld [vmem:[%s9342_s10 + $0x2a0] sm:$0xff]  ;;  %v5094_v4 = vld [vmem:[%s9342_s10 + $0x458] sm:$0xff] }
 0x4f7   :  { %3261 = vmatpush.msrb.mxu1 %v3199_v21  ;;  %3379 = vmatpush.msra.mxu0 %v5005_v23  ;;  %v5047_v21 = vld [vmem:[%s9342_s10 + $0x2e0] sm:$0xff]  ;;  %v5054_v23 = vld [vmem:[%s9342_s10 + $0x318] sm:$0xff] }
 0x4f8   :  { %3408 = vmatpush.msra.mxu2 %v3304_v34  ;;  %3466 = vmatpush.msrb.mxu3 %v5031_v2  ;;  %v5020_v34 = vld [vmem:[%s9342_s10 + $0x208] sm:$0xff]  ;;  %v5075_v40 = vld [vmem:[%s9342_s10 + $0x3c0] sm:$0xff]  ;;  %v5093_v2 = vld [vmem:[%s9342_s10 + $0x450] sm:$0xff] }
 0x4f9   :  { %3262 = vmatpush.msrb.mxu1 %v3197_v55  ;;  %3380 = vmatpush.msra.mxu0 %v5004_v54  ;;  %v5064_v55 = vld [vmem:[%s9342_s10 + $0x368] sm:$0xff]  ;;  %v5053_v54 = vld [vmem:[%s9342_s10 + $0x310] sm:$0xff] }
 0x4fa   :  { %3409 = vmatpush.msra.mxu2 %v3303_v35  ;;  %3467 = vmatpush.msrb.mxu3 %v5030_v1  ;;  %v5019_v35 = vld [vmem:[%s9342_s10 + $0x200] sm:$0xff]  ;;  %v5130_v1 = vld [vmem:[%s9342_s10 + $0x578] sm:$0xff] }
 0x4fb   :  { %3263 = vmatpush.msrb.mxu1 %v3195_v15  ;;  %3381 = vmatpush.msra.mxu0 %v5003_v19  ;;  %v5025_v15 = vld [vmem:[%s9342_s10 + $0x230] sm:$0xff]  ;;  %v5074_v19 = vld [vmem:[%s9342_s10 + $0x3b8] sm:$0xff] }
 0x4fc   :  { %3410 = vmatpush.msra.mxu2 %v3302_v36  ;;  %3468 = vmatpush.msrb.mxu3 %v5029_v17  ;;  %v5056_v36 = vld [vmem:[%s9342_s10 + $0x328] sm:$0xff]  ;;  %v5129_v17 = vld [vmem:[%s9342_s10 + $0x570] sm:$0xff] }
 0x4fd   :  { %3264 = vmatpush.msrb.mxu1 %v3193_v41  ;;  %3483 = vmatpush.msrb.mxu0 %v5050_v6  ;;  %v5043_v41 = vld [vmem:[%s9342_s10 + $0x2c0] sm:$0xff] }
 0x4fe   :  { %4984 = vmatmul.msk.f32.vlgmr.msrb.gmra.mxu1 %vm3207_vm2, %v8047_v39  ;;  %v3288_v39 = vld [vmem:[%s9342_s10 + $0x68] sm:$0xff]  ;;  %3411 = vmatpush.msra.mxu2 %v3301_v57  ;;  %v5037_v57 = vld [vmem:[%s9342_s10 + $0x290] sm:$0xff] }
 0x4ff   :  { %3386 = vmatpush.msra.mxu1 %v3290_v47  ;;  %3484 = vmatpush.msrb.mxu0 %v5049_v20  ;;  %v5042_v47 = vld [vmem:[%s9342_s10 + $0x2b8] sm:$0xff]  ;;  %v5092_v20 = vld [vmem:[%s9342_s10 + $0x448] sm:$0xff] }
 0x500   :  { %3412 = vmatpush.msra.mxu2 %v3300_v12  ;;  %3469 = vmatpush.msrb.mxu3 %v5028_v9  ;;  %v5128_v9 = vld [vmem:[%s9342_s10 + $0x568] sm:$0xff] }
 0x501   :  { %3387 = vmatpush.msra.mxu1 %v3289_v60  ;;  %3485 = vmatpush.msrb.mxu0 %v5048_v11  ;;  %v5041_v60 = vld [vmem:[%s9342_s10 + $0x2b0] sm:$0xff]  ;;  %v5091_v11 = vld [vmem:[%s9342_s10 + $0x440] sm:$0xff] }
 0x502   :  { %3413 = vmatpush.msra.mxu2 %v3299_v24  ;;  %3470 = vmatpush.msrb.mxu3 %v5027_v22  ;;  %v5127_v22 = vld [vmem:[%s9342_s10 + $0x560] sm:$0xff] }
 0x503   :  { %3388 = vmatpush.msra.mxu1 %v3288_v39  ;;  %3486 = vmatpush.msrb.mxu0 %v5047_v21  ;;  %v5058_v39 = vld [vmem:[%s9342_s10 + $0x338] sm:$0xff] }
 0x504   :  { %3414 = vmatpush.msra.mxu2 %v3298_v31  ;;  %3471 = vmatpush.msrb.mxu3 %v5026_v33  ;;  %v5082_v31 = vld [vmem:[%s9342_s10 + $0x3f8] sm:$0xff] }
 0x505   :  { %3389 = vmatpush.msra.mxu1 %v3287_v50  ;;  %3487 = vmatpush.msrb.mxu0 %v5046_v46  ;;  %v5057_v50 = vld [vmem:[%s9342_s10 + $0x330] sm:$0xff]  ;;  %v5090_v21 = vld [vmem:[%s9342_s10 + $0x438] sm:$0xff] }
 0x506   :  { %4985 = vmatmul.msk.f32.gmra.mxu1 %vm3207_vm2, %v8078_v7  ;;  %v3283_v7 = vld [vmem:[%s9342_s10 + $0x40] sm:$0xff]  ;;  %3415 = vmatpush.msra.mxu2 %v3297_v30  ;;  %v5080_v30 = vld [vmem:[%s9342_s10 + $0x3e8] sm:$0xff]  ;;  %v5089_v46 = vld [vmem:[%s9342_s10 + $0x430] sm:$0xff] }
 0x507   :  { %3390 = vmatpush.msra.mxu1 %v3286_v48  ;;  %3488 = vmatpush.msrb.mxu0 %v5045_v53  ;;  %v5038_v48 = vld [vmem:[%s9342_s10 + $0x298] sm:$0xff]  ;;  %v5088_v53 = vld [vmem:[%s9342_s10 + $0x428] sm:$0xff] }
 0x508   :  { %3416 = vmatpush.msra.mxu2 %v3296_v16  ;;  %3472 = vmatpush.msrb.mxu3 %v5025_v15  ;;  %v5078_v16 = vld [vmem:[%s9342_s10 + $0x3d8] sm:$0xff]  ;;  %v5125_v15 = vld [vmem:[%s9342_s10 + $0x550] sm:$0xff] }
 0x509   :  { %3391 = vmatpush.msra.mxu1 %v3285_v52  ;;  %3489 = vmatpush.msrb.mxu0 %v5044_v13  ;;  %v5098_v52 = vld [vmem:[%s9342_s10 + $0x478] sm:$0xff]  ;;  %v5087_v13 = vld [vmem:[%s9342_s10 + $0x420] sm:$0xff] }
 0x50a   :  { %3417 = vmatpush.msra.mxu2 %v3295_v44  ;;  %3473 = vmatpush.msrb.mxu3 %v5024_v49  ;;  %v5077_v44 = vld [vmem:[%s9342_s10 + $0x3d0] sm:$0xff]  ;;  %v5126_v33 = vld [vmem:[%s9342_s10 + $0x558] sm:$0xff]  ;;  %v5124_v49 = vld [vmem:[%s9342_s10 + $0x548] sm:$0xff] }
 0x50b   :  { %3392 = vmatpush.msra.mxu1 %v3284_v37  ;;  %3490 = vmatpush.msrb.mxu0 %v5043_v41  ;;  %v5055_v37 = vld [vmem:[%s9342_s10 + $0x320] sm:$0xff]  ;;  %v5086_v41 = vld [vmem:[%s9342_s10 + $0x418] sm:$0xff] }
 0x50c   :  { %3418 = vmatpush.msra.mxu2 %v3294_v59  ;;  %3474 = vmatpush.msrb.mxu3 %v5023_v45  ;;  %v5076_v59 = vld [vmem:[%s9342_s10 + $0x3c8] sm:$0xff]  ;;  %v5085_v45 = vld [vmem:[%s9342_s10 + $0x410] sm:$0xff] }
 0x50d   :  { %3393 = vmatpush.msra.mxu1 %v3283_v7  ;;  %3491 = vmatpush.msrb.mxu0 %v5042_v47  ;;  %v5097_v7 = vld [vmem:[%s9342_s10 + $0x470] sm:$0xff]  ;;  %v5122_v47 = vld [vmem:[%s9342_s10 + $0x538] sm:$0xff] }
 0x50e   :  { %4986 = vmatmul.msk.f32.gmra.mxu1 %vm3207_vm2, %v3206_v28  ;;  %3419 = vmatpush.msra.mxu2 %v3293_v32  ;;  %v5059_v28 = vld [vmem:[%s9342_s10 + $0x340] sm:$0xff]  ;;  %v5036_v32 = vld [vmem:[%s9342_s10 + $0x288] sm:$0xff] }
 0x50f   :  { %3394 = vmatpush.msra.mxu1 %v3282_v3  ;;  %3475 = vmatpush.msrb.mxu3 %v5022_v14  ;;  %v5121_v14 = vld [vmem:[%s9342_s10 + $0x530] sm:$0xff] }
 0x510   :  { %3420 = vmatpush.msra.mxu2 %v3292_v63  ;;  %3492 = vmatpush.msrb.mxu0 %v5041_v60  ;;  %v5035_v63 = vld [vmem:[%s9342_s10 + $0x280] sm:$0xff] }
 0x511   :  { %3395 = vmatpush.msra.mxu1 %v3281_v58  ;;  %3476 = vmatpush.msrb.mxu3 %v5021_v61  ;;  %v5081_v58 = vld [vmem:[%s9342_s10 + $0x3f0] sm:$0xff]  ;;  %v5083_v60 = vld [vmem:[%s9342_s10 + $0x400] sm:$0xff]  ;;  %v5162_v61 = vld [vmem:[%s9342_s10 + $0x678] sm:$0xff] }
 0x512   :  { %3421 = vmatpush.msra.mxu2 %v3291_v8  ;;  %3493 = vmatpush.msrb.mxu0 %v5040_v43  ;;  %v5052_v8 = vld [vmem:[%s9342_s10 + $0x308] sm:$0xff]  ;;  %v5119_v43 = vld [vmem:[%s9342_s10 + $0x520] sm:$0xff] }
 0x513   :  { %3396 = vmatpush.msra.mxu1 %v3280_v26  ;;  %3477 = vmatpush.msrb.mxu3 %v5020_v34  ;;  %v5079_v26 = vld [vmem:[%s9342_s10 + $0x3e0] sm:$0xff]  ;;  %v5146_v34 = vld [vmem:[%s9342_s10 + $0x5f8] sm:$0xff] }
 0x514   :  { %3494 = vmatpush.msrb.mxu0 %v5039_v27 }
 0x515   :  { %3397 = vmatpush.msra.mxu1 %v3279_v29  ;;  %3478 = vmatpush.msrb.mxu3 %v5019_v35  ;;  %v5096_v29 = vld [vmem:[%s9342_s10 + $0x468] sm:$0xff] }
 0x516   :  { %3495 = vmatpush.msrb.mxu0 %v5038_v48  ;;  %v5160_v35 = vld [vmem:[%s9342_s10 + $0x668] sm:$0xff] }
 0x517   :  { %3398 = vmatpush.msra.mxu1 %v3278_v42  ;;  %3615 = vmatpush.msra.mxu3 %v5098_v52  ;;  %v5095_v42 = vld [vmem:[%s9342_s10 + $0x460] sm:$0xff]  ;;  %v5145_v52 = vld [vmem:[%s9342_s10 + $0x5f0] sm:$0xff] }
 0x518   :  { %3496 = vmatpush.msrb.mxu0 %v5037_v57  ;;  %v5117_v57 = vld [vmem:[%s9342_s10 + $0x510] sm:$0xff] }
 0x519   :  { %3399 = vmatpush.msra.mxu1 %v3277_v56  ;;  %3616 = vmatpush.msra.mxu3 %v5097_v7  ;;  %v5051_v56 = vld [vmem:[%s9342_s10 + $0x300] sm:$0xff]  ;;  %v5144_v7 = vld [vmem:[%s9342_s10 + $0x5e8] sm:$0xff] }
 0x51a   :  { %3497 = vmatpush.msrb.mxu0 %v5036_v32 }
 0x51b   :  { %3400 = vmatpush.msra.mxu1 %v3276_v10  ;;  %v3240_v12 = vpop.f32.mrf.mxu0  ;;  %3617 = vmatpush.msra.mxu3 %v5096_v29  ;;  %v5073_v10 = vld [vmem:[%s9342_s10 + $0x3b0] sm:$0xff] }
 0x51c   :  { %v3342_v24 = vrot.slane %v3240_v12, 2  ;;  %v3459_v3 = vrot.slane %v3240_v12, 4  ;;  %3498 = vmatpush.msrb.mxu0 %v5035_v63  ;;  %v3537_v6 = vrot.slane %v3240_v12, 6  ;;  %v5141_v29 = vld [vmem:[%s9342_s10 + $0x5d0] sm:$0xff] }
 0x51d   :  { %3401 = vmatpush.msra.mxu1 %v3275_v38  ;;  %3618 = vmatpush.msra.mxu3 %v5095_v42  ;;  %v5072_v38 = vld [vmem:[%s9342_s10 + $0x3a8] sm:$0xff] }
 0x51e   :  { %3402 = vmatmul.f32.vlgmr.msra.gmra.mxu1 %v3240_v12  ;;  %3362 = vmatmul.f32.vlgmr.msrb.gmra.mxu2 %v3342_v24  ;;  %v5113_v12 = vld [vmem:[%s9342_s10 + $0x4f0] sm:$0xff]  ;;  %v5116_v24 = vld [vmem:[%s9342_s10 + $0x508] sm:$0xff] }
 0x51f   :  { %3541 = vmatpush.msrb.mxu1 %v5066_v18  ;;  %3479 = vmatmul.f32.vlgmr.msrb.gmra.mxu3 %v3459_v3  ;;  %v5071_v18 = vld [vmem:[%s9342_s10 + $0x3a0] sm:$0xff]  ;;  %v5158_v3 = vld [vmem:[%s9342_s10 + $0x658] sm:$0xff]  ;;  %v5140_v42 = vld [vmem:[%s9342_s10 + $0x5c8] sm:$0xff] }
 0x520   :  { %3561 = vmatpush.msrb.mxu2 %v5082_v31  ;;  %3619 = vmatpush.msra.mxu3 %v5094_v4  ;;  %v5112_v31 = vld [vmem:[%s9342_s10 + $0x4e8] sm:$0xff]  ;;  %v5193_v4 = vld [vmem:[%s9342_s10 + $0x770] sm:$0xff] }
 0x521   :  { %3542 = vmatpush.msrb.mxu1 %v5065_v5  ;;  %v5070_v5 = vld [vmem:[%s9342_s10 + $0x398] sm:$0xff] }
 0x522   :  { %3562 = vmatpush.msrb.mxu2 %v5081_v58  ;;  %3620 = vmatpush.msra.mxu3 %v5093_v2  ;;  %v5143_v58 = vld [vmem:[%s9342_s10 + $0x5e0] sm:$0xff] }
 0x523   :  { %3543 = vmatpush.msrb.mxu1 %v5064_v55  ;;  %v5069_v55 = vld [vmem:[%s9342_s10 + $0x390] sm:$0xff]  ;;  %v8627_v63 = vpop.f32.mrf.mxu0  ;;  %v5155_v2 = vld [vmem:[%s9342_s10 + $0x640] sm:$0xff] }
 0x524   :  { %3563 = vmatpush.msrb.mxu2 %v5080_v30  ;;  %3621 = vmatpush.msra.mxu3 %v5092_v20  ;;  %v5115_v30 = vld [vmem:[%s9342_s10 + $0x500] sm:$0xff]  ;;  %v5154_v20 = vld [vmem:[%s9342_s10 + $0x638] sm:$0xff] }
 0x525   :  { %3544 = vmatpush.msrb.mxu1 %v5063_v62  ;;  %v5068_v62 = vld [vmem:[%s9342_s10 + $0x388] sm:$0xff] }
 0x526   :  { %3564 = vmatpush.msrb.mxu2 %v5079_v26  ;;  %3622 = vmatpush.msra.mxu3 %v5091_v11  ;;  %v5137_v11 = vld [vmem:[%s9342_s10 + $0x5b0] sm:$0xff] }
 0x527   :  { %3545 = vmatpush.msrb.mxu1 %v5062_v25  ;;  %v5067_v25 = vld [vmem:[%s9342_s10 + $0x380] sm:$0xff] }
 0x528   :  { %3565 = vmatpush.msrb.mxu2 %v5078_v16  ;;  %3623 = vmatpush.msra.mxu3 %v5090_v21  ;;  %v5111_v16 = vld [vmem:[%s9342_s10 + $0x4e0] sm:$0xff]  ;;  %v5105_v21 = vld [vmem:[%s9342_s10 + $0x4b0] sm:$0xff] }
 0x529   :  { %3546 = vmatpush.msrb.mxu1 %v5061_v51  ;;  %v5123_v51 = vld [vmem:[%s9342_s10 + $0x540] sm:$0xff] }
 0x52a   :  { %3566 = vmatpush.msrb.mxu2 %v5077_v44  ;;  %3624 = vmatpush.msra.mxu3 %v5089_v46  ;;  %v5142_v44 = vld [vmem:[%s9342_s10 + $0x5d8] sm:$0xff]  ;;  %v5152_v46 = vld [vmem:[%s9342_s10 + $0x628] sm:$0xff] }
 0x52b   :  { %3547 = vmatpush.msrb.mxu1 %v5060_v0  ;;  %v5084_v0 = vld [vmem:[%s9342_s10 + $0x408] sm:$0xff] }
 0x52c   :  { %3567 = vmatpush.msrb.mxu2 %v5076_v59  ;;  %3625 = vmatpush.msra.mxu3 %v5088_v53  ;;  %v5157_v59 = vld [vmem:[%s9342_s10 + $0x650] sm:$0xff] }
 0x52d   :  { %3548 = vmatpush.msrb.mxu1 %v5059_v28  ;;  %v5120_v28 = vld [vmem:[%s9342_s10 + $0x528] sm:$0xff]  ;;  %v5189_v53 = vld [vmem:[%s9342_s10 + $0x750] sm:$0xff] }
 0x52e   :  { %3568 = vmatpush.msrb.mxu2 %v5075_v40  ;;  %3626 = vmatpush.msra.mxu3 %v5087_v13  ;;  %v5194_v40 = vld [vmem:[%s9342_s10 + $0x778] sm:$0xff] }
 0x52f   :  { %3549 = vmatpush.msrb.mxu1 %v5058_v39  ;;  %v5161_v39 = vld [vmem:[%s9342_s10 + $0x670] sm:$0xff]  ;;  %v5134_v13 = vld [vmem:[%s9342_s10 + $0x598] sm:$0xff] }
 0x530   :  { %3569 = vmatpush.msrb.mxu2 %v5074_v19  ;;  %3627 = vmatpush.msra.mxu3 %v5086_v41  ;;  %v5108_v19 = vld [vmem:[%s9342_s10 + $0x4c8] sm:$0xff]  ;;  %v5102_v41 = vld [vmem:[%s9342_s10 + $0x498] sm:$0xff] }
 0x531   :  { %3550 = vmatpush.msrb.mxu1 %v5057_v50  ;;  %v5118_v50 = vld [vmem:[%s9342_s10 + $0x518] sm:$0xff] }
 0x532   :  { %3570 = vmatpush.msrb.mxu2 %v5073_v10  ;;  %3628 = vmatpush.msra.mxu3 %v5085_v45  ;;  %v5107_v10 = vld [vmem:[%s9342_s10 + $0x4c0] sm:$0xff] }
 0x533   :  { %3551 = vmatpush.msrb.mxu1 %v5056_v36  ;;  %v5114_v36 = vld [vmem:[%s9342_s10 + $0x4f8] sm:$0xff]  ;;  %v5187_v45 = vld [vmem:[%s9342_s10 + $0x740] sm:$0xff] }
 0x534   :  { %3571 = vmatpush.msrb.mxu2 %v5072_v38  ;;  %3629 = vmatpush.msra.mxu3 %v5084_v0  ;;  %v5191_v38 = vld [vmem:[%s9342_s10 + $0x760] sm:$0xff]  ;;  %v5101_v0 = vld [vmem:[%s9342_s10 + $0x490] sm:$0xff] }
 0x535   :  { %3552 = vmatpush.msrb.mxu1 %v5055_v37  ;;  %v5159_v37 = vld [vmem:[%s9342_s10 + $0x660] sm:$0xff] }
 0x536   :  { %3572 = vmatpush.msrb.mxu2 %v5071_v18  ;;  %3630 = vmatpush.msra.mxu3 %v5083_v60  ;;  %v5153_v18 = vld [vmem:[%s9342_s10 + $0x630] sm:$0xff] }
 0x537   :  { %3553 = vmatpush.msrb.mxu1 %v5054_v23  ;;  %v5110_v23 = vld [vmem:[%s9342_s10 + $0x4d8] sm:$0xff]  ;;  %3631 = vmatmul.f32.vlgmr.msra.gmra.mxu3 %v8627_v63 }
 0x538   :  { %3573 = vmatpush.msrb.mxu2 %v5070_v5  ;;  %3773 = vmatpush.msrb.mxu3 %v5162_v61  ;;  %v5136_v5 = vld [vmem:[%s9342_s10 + $0x5a8] sm:$0xff] }
 0x539   :  { %3554 = vmatpush.msrb.mxu1 %v5053_v54  ;;  %v5109_v54 = vld [vmem:[%s9342_s10 + $0x4d0] sm:$0xff]  ;;  %v5148_v61 = vld [vmem:[%s9342_s10 + $0x608] sm:$0xff] }
 0x53a   :  { %3574 = vmatpush.msrb.mxu2 %v5069_v55  ;;  %3774 = vmatpush.msrb.mxu3 %v5161_v39  ;;  %v5104_v55 = vld [vmem:[%s9342_s10 + $0x4a8] sm:$0xff]  ;;  %v5131_v39 = vld [vmem:[%s9342_s10 + $0x580] sm:$0xff] }
 0x53b   :  { %3555 = vmatpush.msrb.mxu1 %v5052_v8  ;;  %v5156_v8 = vld [vmem:[%s9342_s10 + $0x648] sm:$0xff] }
 0x53c   :  { %3575 = vmatpush.msrb.mxu2 %v5068_v62  ;;  %3775 = vmatpush.msrb.mxu3 %v5160_v35  ;;  %v5151_v62 = vld [vmem:[%s9342_s10 + $0x620] sm:$0xff] }
 0x53d   :  { %3556 = vmatpush.msrb.mxu1 %v5051_v56  ;;  %v5139_v56 = vld [vmem:[%s9342_s10 + $0x5c0] sm:$0xff] }
 0x53e   :  { %3557 = vmatmul.f32.vlgmr.msrb.gmra.mxu1 %v3537_v6  ;;  %3576 = vmatpush.msrb.mxu2 %v5067_v25  ;;  %v5192_v6 = vld [vmem:[%s9342_s10 + $0x768] sm:$0xff]  ;;  %v5099_v35 = vld [vmem:[%s9342_s10 + $0x480] sm:$0xff] }
 0x53f   :  { %3695 = vmatpush.msra.mxu1 %v5130_v1  ;;  %3776 = vmatpush.msrb.mxu3 %v5159_v37  ;;  %v5138_v1 = vld [vmem:[%s9342_s10 + $0x5b8] sm:$0xff]  ;;  %v5188_v25 = vld [vmem:[%s9342_s10 + $0x748] sm:$0xff] }
 0x540   :  { %v5208_v37 = vld [vmem:[%s9342_s10 + $0x7e8] sm:$0xff] }
 0x541   :  { %3696 = vmatpush.msra.mxu1 %v5129_v17  ;;  %3777 = vmatpush.msrb.mxu3 %v5158_v3  ;;  %v5106_v17 = vld [vmem:[%s9342_s10 + $0x4b8] sm:$0xff]  ;;  %v5207_v3 = vld [vmem:[%s9342_s10 + $0x7e0] sm:$0xff] }
 0x543   :  { %3697 = vmatpush.msra.mxu1 %v5128_v9  ;;  %3778 = vmatpush.msrb.mxu3 %v5157_v59  ;;  %v5190_v9 = vld [vmem:[%s9342_s10 + $0x758] sm:$0xff] }
 0x544   :  { %v5174_v59 = vld [vmem:[%s9342_s10 + $0x6d8] sm:$0xff] }
 0x545   :  { %3698 = vmatpush.msra.mxu1 %v5127_v22  ;;  %3779 = vmatpush.msrb.mxu3 %v5156_v8  ;;  %v3691_v22 = vrot.slane %v8627_v63, 2  ;;  %v5180_v8 = vld [vmem:[%s9342_s10 + $0x708] sm:$0xff] }
 0x547   :  { %3699 = vmatpush.msra.mxu1 %v5126_v33  ;;  %3780 = vmatpush.msrb.mxu3 %v5155_v2  ;;  %v5135_v33 = vld [vmem:[%s9342_s10 + $0x5a0] sm:$0xff] }
 0x548   :  { %v5179_v2 = vld [vmem:[%s9342_s10 + $0x700] sm:$0xff] }
 0x549   :  { %3700 = vmatpush.msra.mxu1 %v5125_v15  ;;  %3781 = vmatpush.msrb.mxu3 %v5154_v20  ;;  %v5103_v15 = vld [vmem:[%s9342_s10 + $0x4a0] sm:$0xff]  ;;  %v5221_v20 = vld [vmem:[%s9342_s10 + $0x850] sm:$0xff] }
 0x54b   :  { %3701 = vmatpush.msra.mxu1 %v5124_v49  ;;  %3782 = vmatpush.msrb.mxu3 %v5153_v18  ;;  %v5150_v49 = vld [vmem:[%s9342_s10 + $0x618] sm:$0xff]  ;;  %v5200_v18 = vld [vmem:[%s9342_s10 + $0x7a8] sm:$0xff] }
 0x54d   :  { %3702 = vmatpush.msra.mxu1 %v5123_v51  ;;  %3783 = vmatpush.msrb.mxu3 %v5152_v46  ;;  %v5133_v51 = vld [vmem:[%s9342_s10 + $0x590] sm:$0xff]  ;;  %v5167_v46 = vld [vmem:[%s9342_s10 + $0x6a0] sm:$0xff] }
 0x54f   :  { %3703 = vmatpush.msra.mxu1 %v5122_v47  ;;  %3784 = vmatpush.msrb.mxu3 %v5151_v62  ;;  %v5149_v47 = vld [vmem:[%s9342_s10 + $0x610] sm:$0xff] }
 0x550   :  { %v5197_v62 = vld [vmem:[%s9342_s10 + $0x790] sm:$0xff] }
 0x551   :  { %3704 = vmatpush.msra.mxu1 %v5121_v14  ;;  %v5132_v14 = vld [vmem:[%s9342_s10 + $0x588] sm:$0xff]  ;;  %3785 = vmatpush.msrb.mxu3 %v5150_v49  ;;  %v5215_v49 = vld [vmem:[%s9342_s10 + $0x820] sm:$0xff] }
 0x553   :  { %3705 = vmatpush.msra.mxu1 %v5120_v28  ;;  %v5186_v28 = vld [vmem:[%s9342_s10 + $0x738] sm:$0xff]  ;;  %3786 = vmatpush.msrb.mxu3 %v5149_v47 }
 0x554   :  { %v5214_v47 = vld [vmem:[%s9342_s10 + $0x818] sm:$0xff] }
 0x555   :  { %3706 = vmatpush.msra.mxu1 %v5119_v43  ;;  %v5100_v43 = vld [vmem:[%s9342_s10 + $0x488] sm:$0xff]  ;;  %3787 = vmatpush.msrb.mxu3 %v5148_v61  ;;  %v5242_v61 = vld [vmem:[%s9342_s10 + $0x8f8] sm:$0xff] }
 0x557   :  { %3707 = vmatpush.msra.mxu1 %v5118_v50  ;;  %v5185_v50 = vld [vmem:[%s9342_s10 + $0x730] sm:$0xff] }
 0x559   :  { %3708 = vmatpush.msra.mxu1 %v5117_v57  ;;  %v5177_v57 = vld [vmem:[%s9342_s10 + $0x6f0] sm:$0xff] }
 0x55b   :  { %3709 = vmatpush.msra.mxu1 %v5116_v24  ;;  %v5176_v24 = vld [vmem:[%s9342_s10 + $0x6e8] sm:$0xff] }
 0x55d   :  { %3710 = vmatpush.msra.mxu1 %v5115_v30  ;;  %v5175_v30 = vld [vmem:[%s9342_s10 + $0x6e0] sm:$0xff] }
 0x55e   :  { %3711 = vmatmul.f32.vlgmr.msra.gmra.mxu1 %v3691_v22  ;;  %v5218_v22 = vld [vmem:[%s9342_s10 + $0x838] sm:$0xff] }
 0x55f   :  { %3851 = vmatpush.msrb.mxu1 %v5194_v40  ;;  %v5173_v40 = vld [vmem:[%s9342_s10 + $0x6d0] sm:$0xff] }
 0x561   :  { %3852 = vmatpush.msrb.mxu1 %v5193_v4  ;;  %v5172_v4 = vld [vmem:[%s9342_s10 + $0x6c8] sm:$0xff] }
 0x563   :  { %3853 = vmatpush.msrb.mxu1 %v5192_v6  ;;  %v3847_v6 = vrot.slane %v8627_v63, 6 }
 0x565   :  { %3854 = vmatpush.msrb.mxu1 %v5191_v38  ;;  %v5201_v38 = vld [vmem:[%s9342_s10 + $0x7b0] sm:$0xff] }
 0x567   :  { %3855 = vmatpush.msrb.mxu1 %v5190_v9  ;;  %v5219_v9 = vld [vmem:[%s9342_s10 + $0x840] sm:$0xff] }
 0x569   :  { %3856 = vmatpush.msrb.mxu1 %v5189_v53  ;;  %v5166_v53 = vld [vmem:[%s9342_s10 + $0x698] sm:$0xff] }
 0x56b   :  { %3857 = vmatpush.msrb.mxu1 %v5188_v25  ;;  %v5196_v25 = vld [vmem:[%s9342_s10 + $0x788] sm:$0xff] }
 0x56d   :  { %3858 = vmatpush.msrb.mxu1 %v5187_v45  ;;  %v5195_v45 = vld [vmem:[%s9342_s10 + $0x780] sm:$0xff] }
 0x56f   :  { %3859 = vmatpush.msrb.mxu1 %v5186_v28  ;;  %v5213_v28 = vld [vmem:[%s9342_s10 + $0x810] sm:$0xff] }
 0x571   :  { %3860 = vmatpush.msrb.mxu1 %v5185_v50  ;;  %v5239_v50 = vld [vmem:[%s9342_s10 + $0x8e0] sm:$0xff] }
 0x57b   :  { %v3266_v27 = vpop.f32.mrf.mxu1 }
 0x57c   :  { %v3343_v48 = vrot.slane %v3266_v27, 2  ;;  %3422 = vmatmul.f32.vlgmr.msra.gmra.mxu2 %v3266_v27  ;;  %v3538_v26 = vrot.slane %v3266_v27, 6  ;;  %v3460_v32 = vrot.slane %v3266_v27, 4 }
 0x57d   :  { %3715 = vmatpush.msra.mxu2 %v5146_v34  ;;  %v5210_v34 = vld [vmem:[%s9342_s10 + $0x7f8] sm:$0xff] }
 0x57e   :  { %3382 = vmatmul.f32.vlgmr.msra.gmra.mxu0 %v3343_v48  ;;  %v5178_v48 = vld [vmem:[%s9342_s10 + $0x6f8] sm:$0xff] }
 0x57f   :  { %3635 = vmatpush.msra.mxu0 %v5114_v36  ;;  %3716 = vmatpush.msra.mxu2 %v5145_v52  ;;  %v5209_v36 = vld [vmem:[%s9342_s10 + $0x7f0] sm:$0xff]  ;;  %v5147_v52 = vld [vmem:[%s9342_s10 + $0x600] sm:$0xff] }
 0x580   :  { %3788 = vmatpush.msrb.mxu3 %v5147_v52  ;;  %v5235_v52 = vld [vmem:[%s9342_s10 + $0x8c0] sm:$0xff] }
 0x581   :  { %3636 = vmatpush.msra.mxu0 %v5113_v12  ;;  %3717 = vmatpush.msra.mxu2 %v5144_v7  ;;  %v3769_v12 = vrot.slane %v8627_v63, 4  ;;  %v5184_v7 = vld [vmem:[%s9342_s10 + $0x728] sm:$0xff]  ;;  %v5170_v63 = vld [vmem:[%s9342_s10 + $0x6b8] sm:$0xff] }
 0x582   :  { %3861 = vmatpush.msrb.mxu1 %v5184_v7  ;;  %v5231_v7 = vld [vmem:[%s9342_s10 + $0x8a0] sm:$0xff] }
 0x583   :  { %3637 = vmatpush.msra.mxu0 %v5112_v31  ;;  %3718 = vmatpush.msra.mxu2 %v5143_v58  ;;  %v8733_v60 = vpop.f32.mrf.mxu1  ;;  %v5226_v31 = vld [vmem:[%s9342_s10 + $0x878] sm:$0xff]  ;;  %v5183_v58 = vld [vmem:[%s9342_s10 + $0x720] sm:$0xff] }
 0x584   :  { %3577 = vmatmul.f32.vlgmr.msrb.gmra.mxu2 %v3538_v26  ;;  %v3692_v27 = vrot.slane %v8733_v60, 2  ;;  %v5206_v26 = vld [vmem:[%s9342_s10 + $0x7d8] sm:$0xff]  ;;  %3789 = vmatmul.f32.vlgmr.msrb.gmra.mxu3 %v3769_v12  ;;  %v5232_v12 = vld [vmem:[%s9342_s10 + $0x8a8] sm:$0xff] }
 0x585   :  { %3638 = vmatpush.msra.mxu0 %v5111_v16  ;;  %3719 = vmatpush.msra.mxu2 %v5142_v44  ;;  %v5225_v16 = vld [vmem:[%s9342_s10 + $0x870] sm:$0xff]  ;;  %v5182_v44 = vld [vmem:[%s9342_s10 + $0x718] sm:$0xff] }
 0x586   :  { %3499 = vmatmul.f32.vlgmr.msrb.gmra.mxu0 %v3460_v32  ;;  %v5205_v32 = vld [vmem:[%s9342_s10 + $0x7d0] sm:$0xff]  ;;  %3925 = vmatpush.msra.mxu3 %v5226_v31  ;;  %v5228_v31 = vld [vmem:[%s9342_s10 + $0x888] sm:$0xff] }
 0x587   :  { %3639 = vmatpush.msra.mxu0 %v5110_v23  ;;  %3720 = vmatpush.msra.mxu2 %v5141_v29  ;;  %v5224_v23 = vld [vmem:[%s9342_s10 + $0x868] sm:$0xff]  ;;  %v5181_v29 = vld [vmem:[%s9342_s10 + $0x710] sm:$0xff] }
 0x588   :  { %3862 = vmatpush.msrb.mxu1 %v5183_v58  ;;  %3926 = vmatpush.msra.mxu3 %v5225_v16  ;;  %v5227_v58 = vld [vmem:[%s9342_s10 + $0x880] sm:$0xff] }
 0x589   :  { %3640 = vmatpush.msra.mxu0 %v5109_v54  ;;  %3721 = vmatpush.msra.mxu2 %v5140_v42  ;;  %v5204_v54 = vld [vmem:[%s9342_s10 + $0x7c8] sm:$0xff]  ;;  %v5223_v42 = vld [vmem:[%s9342_s10 + $0x860] sm:$0xff] }
 0x58a   :  { %3863 = vmatpush.msrb.mxu1 %v5182_v44  ;;  %3927 = vmatpush.msra.mxu3 %v5224_v23 }
 0x58b   :  { %3641 = vmatpush.msra.mxu0 %v5108_v19  ;;  %3722 = vmatpush.msra.mxu2 %v5139_v56  ;;  %v5203_v19 = vld [vmem:[%s9342_s10 + $0x7c0] sm:$0xff]  ;;  %v5222_v56 = vld [vmem:[%s9342_s10 + $0x858] sm:$0xff] }
 0x58c   :  { %3864 = vmatpush.msrb.mxu1 %v5181_v29  ;;  %3928 = vmatpush.msra.mxu3 %v5223_v42 }
 0x58d   :  { %3642 = vmatpush.msra.mxu0 %v5107_v10  ;;  %3723 = vmatpush.msra.mxu2 %v5138_v1  ;;  %v5171_v10 = vld [vmem:[%s9342_s10 + $0x6c0] sm:$0xff]  ;;  %v5202_v1 = vld [vmem:[%s9342_s10 + $0x7b8] sm:$0xff] }
 0x58e   :  { %3865 = vmatpush.msrb.mxu1 %v5180_v8  ;;  %3929 = vmatpush.msra.mxu3 %v5222_v56 }
 0x58f   :  { %3643 = vmatpush.msra.mxu0 %v5106_v17  ;;  %3724 = vmatpush.msra.mxu2 %v5137_v11  ;;  %v5220_v17 = vld [vmem:[%s9342_s10 + $0x848] sm:$0xff]  ;;  %v5169_v11 = vld [vmem:[%s9342_s10 + $0x6b0] sm:$0xff] }
 0x590   :  { %3866 = vmatpush.msrb.mxu1 %v5179_v2  ;;  %3930 = vmatpush.msra.mxu3 %v5221_v20 }
 0x591   :  { %3644 = vmatpush.msra.mxu0 %v5105_v21  ;;  %3725 = vmatpush.msra.mxu2 %v5136_v5  ;;  %v5168_v21 = vld [vmem:[%s9342_s10 + $0x6a8] sm:$0xff]  ;;  %v5199_v5 = vld [vmem:[%s9342_s10 + $0x7a0] sm:$0xff] }
 0x592   :  { %3867 = vmatmul.f32.vlgmr.msrb.gmra.mxu1 %v3847_v6  ;;  %3931 = vmatpush.msra.mxu3 %v5220_v17  ;;  %v4003_v17 = vld [vmem:[%s9344_s12 + $0xc0] sm:$0xff] }
 0x593   :  { %3645 = vmatpush.msra.mxu0 %v5104_v55  ;;  %3726 = vmatpush.msra.mxu2 %v5135_v33  ;;  %v5198_v55 = vld [vmem:[%s9342_s10 + $0x798] sm:$0xff]  ;;  %v5217_v33 = vld [vmem:[%s9342_s10 + $0x830] sm:$0xff] }
 0x594   :  { %3932 = vmatpush.msra.mxu3 %v5219_v9  ;;  %v4009_v9 = vld [vmem:[%s9344_s12 + $0xf0] sm:$0xff] }
 0x595   :  { %3646 = vmatpush.msra.mxu0 %v5103_v15  ;;  %3727 = vmatpush.msra.mxu2 %v5134_v13  ;;  %v5216_v15 = vld [vmem:[%s9342_s10 + $0x828] sm:$0xff]  ;;  %v5165_v13 = vld [vmem:[%s9342_s10 + $0x690] sm:$0xff] }
 0x596   :  { %3933 = vmatpush.msra.mxu3 %v5218_v22  ;;  %v3999_v22 = vld [vmem:[%s9344_s12 + $0xa0] sm:$0xff] }
 0x597   :  { %3647 = vmatpush.msra.mxu0 %v5102_v41  ;;  %3728 = vmatpush.msra.mxu2 %v5133_v51  ;;  %v3848_v41 = vrot.slane %v8733_v60, 6  ;;  %v5164_v51 = vld [vmem:[%s9342_s10 + $0x688] sm:$0xff] }
 0x598   :  { %3934 = vmatpush.msra.mxu3 %v5217_v33 }
 0x599   :  { %3648 = vmatpush.msra.mxu0 %v5101_v0  ;;  %3729 = vmatpush.msra.mxu2 %v5132_v14  ;;  %v3770_v0 = vrot.slane %v8733_v60, 4  ;;  %v5163_v14 = vld [vmem:[%s9342_s10 + $0x680] sm:$0xff] }
 0x59a   :  { %3935 = vmatpush.msra.mxu3 %v5216_v15 }
 0x59b   :  { %3649 = vmatpush.msra.mxu0 %v5100_v43  ;;  %3730 = vmatpush.msra.mxu2 %v5131_v39  ;;  %v5241_v43 = vld [vmem:[%s9342_s10 + $0x8f0] sm:$0xff]  ;;  %v5211_v39 = vld [vmem:[%s9342_s10 + $0x800] sm:$0xff] }
 0x59c   :  { %3731 = vmatmul.f32.vlgmr.msra.gmra.mxu2 %v3692_v27  ;;  %3936 = vmatpush.msra.mxu3 %v5215_v49  ;;  %v3246_v27 = vpop.f32.mrf.mxu0 }
 0x59d   :  { %3871 = vmatpush.msrb.mxu2 %v5210_v34  ;;  %3650 = vmatpush.msra.mxu0 %v5099_v35  ;;  %v5240_v34 = vld [vmem:[%s9342_s10 + $0x8e8] sm:$0xff]  ;;  %v5238_v35 = vld [vmem:[%s9342_s10 + $0x8d8] sm:$0xff] }
 0x59e   :  { %3651 = vmatmul.f32.vlgmr.msra.gmra.mxu0 %v8733_v60  ;;  %3937 = vmatpush.msra.mxu3 %v5214_v47  ;;  %v5212_v60 = vld [vmem:[%s9342_s10 + $0x808] sm:$0xff] }
 0x59f   :  { %3793 = vmatpush.msrb.mxu0 %v5178_v48  ;;  %3872 = vmatpush.msrb.mxu2 %v5209_v36  ;;  %v5237_v48 = vld [vmem:[%s9342_s10 + $0x8d0] sm:$0xff]  ;;  %v5236_v36 = vld [vmem:[%s9342_s10 + $0x8c8] sm:$0xff] }
 0x5a0   :  { %3938 = vmatpush.msra.mxu3 %v5213_v28  ;;  %v3992_v28 = vld [vmem:[%s9344_s12 + $0x68] sm:$0xff] }
 0x5a1   :  { %3794 = vmatpush.msrb.mxu0 %v5177_v57  ;;  %3873 = vmatpush.msrb.mxu2 %v5208_v37  ;;  %v5234_v57 = vld [vmem:[%s9342_s10 + $0x8b8] sm:$0xff]  ;;  %v5233_v37 = vld [vmem:[%s9342_s10 + $0x8b0] sm:$0xff] }
 0x5a2   :  { %3939 = vmatpush.msra.mxu3 %v5212_v60 }
 0x5a3   :  { %3795 = vmatpush.msrb.mxu0 %v5176_v24  ;;  %3874 = vmatpush.msrb.mxu2 %v5207_v3  ;;  %v5230_v24 = vld [vmem:[%s9342_s10 + $0x898] sm:$0xff]  ;;  %v5229_v3 = vld [vmem:[%s9342_s10 + $0x890] sm:$0xff] }
 0x5a4   :  { %3940 = vmatpush.msra.mxu3 %v5211_v39 }
 0x5a5   :  { %3796 = vmatpush.msrb.mxu0 %v5175_v30  ;;  %3875 = vmatpush.msrb.mxu2 %v5206_v26  ;;  %v3272_v30 = vpop.f32.mrf.mxu1  ;;  %v3363_v26 = vpop.f32.mrf.mxu2 }
 0x5a6   :  { %3941 = vmatmul.f32.vlgmr.msra.gmra.mxu3 %v3246_v27  ;;  %v3989_v27 = vld [vmem:[%s9344_s12 + $0x50] sm:$0xff] }
 0x5a7   :  { %3797 = vmatpush.msrb.mxu0 %v5174_v59  ;;  %3876 = vmatpush.msrb.mxu2 %v5205_v32  ;;  %v3480_v32 = vpop.f32.mrf.mxu3 }
 0x5a8   :  { %4062 = vmatpush.msrb.mxu3 %v4009_v9 }
 0x5a9   :  { %3798 = vmatpush.msrb.mxu0 %v5173_v40  ;;  %3877 = vmatpush.msrb.mxu2 %v5204_v54 }
 0x5ab   :  { %3799 = vmatpush.msrb.mxu0 %v5172_v4  ;;  %3878 = vmatpush.msrb.mxu2 %v5203_v19 }
 0x5ad   :  { %3800 = vmatpush.msrb.mxu0 %v5171_v10  ;;  %3879 = vmatpush.msrb.mxu2 %v5202_v1  ;;  %v3403_v59 = vpop.f32.mrf.mxu1 }
 0x5af   :  { %3801 = vmatpush.msrb.mxu0 %v5170_v63  ;;  %3880 = vmatpush.msrb.mxu2 %v5201_v38  ;;  %v4007_v38 = vld [vmem:[%s9344_s12 + $0xe0] sm:$0xff] }
 0x5b0   :  { %4022 = vmatpush.msra.mxu1 %v4007_v38  ;;  %v4226_v38 = vld [vmem:[%s9345_s13 + $0xf8] sm:$0xff] }
 0x5b1   :  { %3802 = vmatpush.msrb.mxu0 %v5169_v11  ;;  %3881 = vmatpush.msrb.mxu2 %v5200_v18  ;;  %v4008_v18 = vld [vmem:[%s9344_s12 + $0xe8] sm:$0xff] }
 0x5b2   :  { %4023 = vmatpush.msra.mxu1 %v4003_v17  ;;  %v4204_v17 = vld [vmem:[%s9345_s13 + $0x48] sm:$0xff] }
 0x5b3   :  { %3803 = vmatpush.msrb.mxu0 %v5168_v21  ;;  %3882 = vmatpush.msrb.mxu2 %v5199_v5 }
 0x5b4   :  { %4024 = vmatpush.msra.mxu1 %v3999_v22  ;;  %v4258_v22 = vld [vmem:[%s9345_s13 + $0x1f8] sm:$0xff] }
 0x5b5   :  { %3804 = vmatpush.msrb.mxu0 %v5167_v46  ;;  %3883 = vmatpush.msrb.mxu2 %v5198_v55  ;;  %v4004_v46 = vld [vmem:[%s9344_s12 + $0xc8] sm:$0xff]  ;;  %v4005_v55 = vld [vmem:[%s9344_s12 + $0xd0] sm:$0xff] }
 0x5b6   :  { %4063 = vmatpush.msrb.mxu3 %v4005_v55  ;;  %v4224_v55 = vld [vmem:[%s9345_s13 + $0xe8] sm:$0xff] }
 0x5b7   :  { %3805 = vmatpush.msrb.mxu0 %v5166_v53  ;;  %3884 = vmatpush.msrb.mxu2 %v5197_v62  ;;  %v4000_v53 = vld [vmem:[%s9344_s12 + $0xa8] sm:$0xff]  ;;  %v4001_v62 = vld [vmem:[%s9344_s12 + $0xb0] sm:$0xff] }
 0x5b8   :  { %4064 = vmatpush.msrb.mxu3 %v4001_v62  ;;  %v4223_v62 = vld [vmem:[%s9345_s13 + $0xe0] sm:$0xff] }
 0x5b9   :  { %3806 = vmatpush.msrb.mxu0 %v5165_v13  ;;  %3885 = vmatpush.msrb.mxu2 %v5196_v25  ;;  %v3995_v25 = vld [vmem:[%s9344_s12 + $0x80] sm:$0xff] }
 0x5ba   :  { %v3632_v42 = vpop.f32.mrf.mxu3  ;;  %4025 = vmatpush.msra.mxu1 %v3995_v25  ;;  %v4222_v25 = vld [vmem:[%s9345_s13 + $0xd8] sm:$0xff] }
 0x5bb   :  { %3807 = vmatpush.msrb.mxu0 %v5164_v51  ;;  %3886 = vmatpush.msrb.mxu2 %v5195_v45  ;;  %v3558_v40 = vpop.f32.mrf.mxu1  ;;  %v3997_v51 = vld [vmem:[%s9344_s12 + $0x90] sm:$0xff] }
 0x5bc   :  { %3887 = vmatmul.f32.vlgmr.msrb.gmra.mxu2 %v3848_v41  ;;  %v3996_v41 = vld [vmem:[%s9344_s12 + $0x88] sm:$0xff]  ;;  %4065 = vmatpush.msrb.mxu3 %v3997_v51  ;;  %v4221_v51 = vld [vmem:[%s9345_s13 + $0xd0] sm:$0xff] }
 0x5bd   :  { %3808 = vmatpush.msrb.mxu0 %v5163_v14  ;;  %4042 = vmatpush.msra.mxu2 %v4008_v18 }
 0x5be   :  { %3809 = vmatmul.f32.vlgmr.msrb.gmra.mxu0 %v3770_v0  ;;  %v3991_v0 = vld [vmem:[%s9344_s12 + $0x60] sm:$0xff] }
 0x5bf   :  { %3945 = vmatpush.msra.mxu0 %v5242_v61  ;;  %4043 = vmatpush.msra.mxu2 %v4004_v46  ;;  %v3993_v61 = vld [vmem:[%s9344_s12 + $0x70] sm:$0xff] }
 0x5c0   :  { %4026 = vmatpush.msra.mxu1 %v3991_v0  ;;  %4066 = vmatpush.msrb.mxu3 %v3993_v61  ;;  %v4241_v46 = vld [vmem:[%s9345_s13 + $0x170] sm:$0xff]  ;;  %v4220_v0 = vld [vmem:[%s9345_s13 + $0xc8] sm:$0xff]  ;;  %v4235_v61 = vld [vmem:[%s9345_s13 + $0x140] sm:$0xff] }
 0x5c1   :  { %3946 = vmatpush.msra.mxu0 %v5241_v43  ;;  %4044 = vmatpush.msra.mxu2 %v4000_v53  ;;  %v3987_v43 = vld [vmem:[%s9344_s12 + $0x40] sm:$0xff]  ;;  %v4240_v53 = vld [vmem:[%s9345_s13 + $0x168] sm:$0xff] }
 0x5c2   :  { %4027 = vmatpush.msra.mxu1 %v3987_v43  ;;  %4067 = vmatpush.msrb.mxu3 %v3989_v27  ;;  %v4234_v43 = vld [vmem:[%s9345_s13 + $0x138] sm:$0xff]  ;;  %v4232_v27 = vld [vmem:[%s9345_s13 + $0x128] sm:$0xff] }
 0x5c3   :  { %3947 = vmatpush.msra.mxu0 %v5240_v34  ;;  %4045 = vmatpush.msra.mxu2 %v3996_v41  ;;  %v3988_v34 = vld [vmem:[%s9344_s12 + $0x48] sm:$0xff]  ;;  %v4238_v41 = vld [vmem:[%s9345_s13 + $0x158] sm:$0xff] }
 0x5c5   :  { %3948 = vmatpush.msra.mxu0 %v5239_v50  ;;  %4046 = vmatpush.msra.mxu2 %v3992_v28  ;;  %v4219_v28 = vld [vmem:[%s9345_s13 + $0xc0] sm:$0xff] }
 0x5c7   :  { %3949 = vmatpush.msra.mxu0 %v5238_v35  ;;  %4047 = vmatpush.msra.mxu2 %v3988_v34  ;;  %v4233_v34 = vld [vmem:[%s9345_s13 + $0x130] sm:$0xff] }
 0x5c9   :  { %3950 = vmatpush.msra.mxu0 %v5237_v48  ;;  %v5263_v48 = vld [vmem:[%s9343_s11] ss:$0 sm:$0xff] }
 0x5cb   :  { %3951 = vmatpush.msra.mxu0 %v5236_v36  ;;  %v3983_v36 = vld [vmem:[%s9344_s12 + $0x20] sm:$0xff] }
 0x5cc   :  { %4028 = vmatpush.msra.mxu1 %v3983_v36  ;;  %v4228_v36 = vld [vmem:[%s9345_s13 + $0x108] sm:$0xff] }
 0x5cd   :  { %3952 = vmatpush.msra.mxu0 %v5235_v52  ;;  %v3984_v52 = vld [vmem:[%s9344_s12 + $0x28] sm:$0xff] }
 0x5ce   :  { %4048 = vmatpush.msra.mxu2 %v3984_v52  ;;  %v4203_v52 = vld [vmem:[%s9345_s13 + $0x40] sm:$0xff] }
 0x5cf   :  { %3953 = vmatpush.msra.mxu0 %v5234_v57  ;;  %v3985_v57 = vld [vmem:[%s9344_s12 + $0x30] sm:$0xff] }
 0x5d0   :  { %4068 = vmatpush.msrb.mxu3 %v3985_v57  ;;  %v4216_v57 = vld [vmem:[%s9345_s13 + $0xa8] sm:$0xff] }
 0x5d1   :  { %3954 = vmatpush.msra.mxu0 %v5233_v37 }
 0x5d3   :  { %3955 = vmatpush.msra.mxu0 %v5232_v12  ;;  %v3979_v12 = vld [vmem:[%s9344_s12] sm:$0xff] }
 0x5d4   :  { %4029 = vmatpush.msra.mxu1 %v3979_v12  ;;  %v4227_v12 = vld [vmem:[%s9345_s13 + $0x100] sm:$0xff] }
 0x5d5   :  { %3956 = vmatpush.msra.mxu0 %v5231_v7  ;;  %v4010_v7 = vld [vmem:[%s9344_s12 + $0xf8] sm:$0xff] }
 0x5d6   :  { %4082 = vmatpush.msrb.mxu1 %v4010_v7  ;;  %v4202_v7 = vld [vmem:[%s9345_s13 + $0x38] sm:$0xff] }
 0x5d7   :  { %3957 = vmatpush.msra.mxu0 %v5230_v24  ;;  %v3980_v24 = vld [vmem:[%s9344_s12 + $0x8] sm:$0xff] }
 0x5d8   :  { %4049 = vmatpush.msra.mxu2 %v3980_v24  ;;  %v4215_v24 = vld [vmem:[%s9345_s13 + $0xa0] sm:$0xff] }
 0x5d9   :  { %3958 = vmatpush.msra.mxu0 %v5229_v3 }
 0x5db   :  { %3959 = vmatpush.msra.mxu0 %v5228_v31  ;;  %v3712_v2 = vpop.f32.mrf.mxu1  ;;  %v3981_v31 = vld [vmem:[%s9344_s12 + $0x10] sm:$0xff] }
 0x5dc   :  { %4069 = vmatpush.msrb.mxu3 %v3981_v31  ;;  %v4378_v31 = vld [vmem:[%s9347_s16 + $0x38] sm:$0xff] }
 0x5dd   :  { %3960 = vmatpush.msra.mxu0 %v5227_v58  ;;  %v4006_v58 = vld [vmem:[%s9344_s12 + $0xd8] sm:$0xff] }
 0x5de   :  { %3961 = vmatmul.f32.vlgmr.msra.gmra.mxu0 %v3272_v30  ;;  %4083 = vmatpush.msrb.mxu1 %v4006_v58  ;;  %v4201_v58 = vld [vmem:[%s9345_s13 + $0x30] sm:$0xff] }
 0x5fb   :  { %v3383_v16 = vpop.f32.mrf.mxu0 }
 0x5fc   :  { %v3384_v54 = vadd.f32 %v3383_v16, %v3363_v26  ;;  %v4002_v26 = vld [vmem:[%s9344_s12 + $0xb8] sm:$0xff] }
 0x5fd   :  { %4084 = vmatpush.msrb.mxu1 %v4002_v26  ;;  %v4251_v26 = vld [vmem:[%s9345_s13 + $0x1c0] sm:$0xff] }
 0x5fe   :  { %v3404_v4 = vadd.f32 %v3403_v59, %v3384_v54  ;;  %v3994_v59 = vld [vmem:[%s9344_s12 + $0x78] sm:$0xff] }
 0x5ff   :  { %v3423_v44 = vpop.f32.mrf.mxu2  ;;  %v3982_v54 = vld [vmem:[%s9344_s12 + $0x18] sm:$0xff] }
 0x600   :  { %v3424_v6 = vadd.f32 %v3423_v44, %v3404_v4  ;;  %v3998_v44 = vld [vmem:[%s9344_s12 + $0x98] sm:$0xff] }
 0x601   :  { %4085 = vmatpush.msrb.mxu1 %v3998_v44  ;;  %v4200_v44 = vld [vmem:[%s9345_s13 + $0x28] sm:$0xff] }
 0x603   :  { %v3500_v23 = vpop.f32.mrf.mxu0  ;;  %4086 = vmatpush.msrb.mxu1 %v3994_v59  ;;  %v4213_v59 = vld [vmem:[%s9345_s13 + $0x90] sm:$0xff] }
 0x604   :  { %v3501_v56 = vadd.f32 %v3500_v23, %v3480_v32  ;;  %v3990_v32 = vld [vmem:[%s9344_s12 + $0x58] sm:$0xff] }
 0x605   :  { %v3986_v23 = vld [vmem:[%s9344_s12 + $0x38] sm:$0xff]  ;;  %4087 = vmatpush.msrb.mxu1 %v3990_v32 }
 0x606   :  { %v3503_v20 = vadd.f32 %v3501_v56, %v3424_v6  ;;  %v4209_v56 = vld [vmem:[%s9345_s13 + $0x70] sm:$0xff]  ;;  %v4094_v6 = vld [vmem:[%s9346_s14] sm:$0xf]  ;;  %v4250_v32 = vld [vmem:[%s9345_s13 + $0x1b8] sm:$0xff] }
 0x607   :  { %v3578_v29 = vpop.f32.mrf.mxu2  ;;  %v3790_v1 = vpop.f32.mrf.mxu3  ;;  %4088 = vmatpush.msrb.mxu1 %v3986_v23  ;;  %v4376_v23 = vld [vmem:[%s9347_s16 + $0x28] sm:$0xff] }
 0x608   :  { %v3579_v10 = vadd.f32 %v3578_v29, %v3558_v40 }
 0x609   :  { %4089 = vmatpush.msrb.mxu1 %v3982_v54  ;;  %v4249_v54 = vld [vmem:[%s9345_s13 + $0x1b0] sm:$0xff] }
 0x60a   :  { %v3581_v21 = vadd.f32 %v3579_v10, %v3503_v20  ;;  %v4207_v10 = vld [vmem:[%s9345_s13 + $0x60] sm:$0xff]  ;;  %v4206_v20 = vld [vmem:[%s9345_s13 + $0x58] sm:$0xff] }
 0x60f   :  { %v3868_v49 = vpop.f32.mrf.mxu1 }
 0x61b   :  { %v3652_v8 = vpop.f32.mrf.mxu0 }
 0x61c   :  { %v3653_v63 = vadd.f32 %v3652_v8, %v3632_v42 }
 0x61e   :  { %v3655_v15 = vadd.f32 %v3653_v63, %v3581_v21  ;;  %v4205_v63 = vld [vmem:[%s9345_s13 + $0x50] sm:$0xff]  ;;  %v4242_v21 = vld [vmem:[%s9345_s13 + $0x178] sm:$0xff] }
 0x61f   :  { %v3732_v19 = vpop.f32.mrf.mxu2 }
 0x620   :  { %v3733_v5 = vadd.f32 %v3732_v19, %v3712_v2  ;;  %v4210_v19 = vld [vmem:[%s9345_s13 + $0x78] sm:$0xff]  ;;  %v4208_v2 = vld [vmem:[%s9345_s13 + $0x68] sm:$0xff] }
 0x622   :  { %v3735_v45 = vadd.f32 %v3733_v5, %v3655_v15  ;;  %v4225_v5 = vld [vmem:[%s9345_s13 + $0xf0] sm:$0xff]  ;;  %v4256_v15 = vld [vmem:[%s9345_s13 + $0x1e8] sm:$0xff] }
 0x629   :  { %v3942_v14 = vpop.f32.mrf.mxu3 }
 0x63b   :  { %v3810_v11 = vpop.f32.mrf.mxu0 }
 0x63c   :  { %v3811_v13 = vadd.f32 %v3810_v11, %v3790_v1 }
 0x63e   :  { %v3813_v60 = vadd.f32 %v3811_v13, %v3735_v45  ;;  %v4239_v13 = vld [vmem:[%s9345_s13 + $0x160] sm:$0xff]  ;;  %v4254_v45 = vld [vmem:[%s9345_s13 + $0x1d8] sm:$0xff] }
 0x63f   :  { %v3888_v33 = vpop.f32.mrf.mxu2 }
 0x640   :  { %v3889_v47 = vadd.f32 %v3888_v33, %v3868_v49  ;;  %v4257_v33 = vld [vmem:[%s9345_s13 + $0x1f0] sm:$0xff]  ;;  %v4255_v49 = vld [vmem:[%s9345_s13 + $0x1e0] sm:$0xff] }
 0x642   :  { %v3891_v50 = vadd.f32 %v3889_v47, %v3813_v60  ;;  %v4237_v47 = vld [vmem:[%s9345_s13 + $0x150] sm:$0xff]  ;;  %v4218_v60 = vld [vmem:[%s9345_s13 + $0xb8] sm:$0xff] }
 0x65b   :  { %v3962_v39 = vpop.f32.mrf.mxu0 }
 0x65c   :  { %v3963_v35 = vadd.f32 %v3962_v39, %v3942_v14  ;;  %v4236_v14 = vld [vmem:[%s9345_s13 + $0x148] sm:$0xff]  ;;  %v4217_v39 = vld [vmem:[%s9345_s13 + $0xb0] sm:$0xff] }
 0x65e   :  { %v3965_v37 = vadd.f32 %v3963_v35, %v3891_v50  ;;  %v4231_v50 = vld [vmem:[%s9345_s13 + $0x120] sm:$0xff]  ;;  %v4230_v35 = vld [vmem:[%s9345_s13 + $0x118] sm:$0xff] }
 0x660   :  { %v3970_v3 = vadd.f32 %v5263_v48, %v3965_v37  ;;  %v4229_v48 = vld [vmem:[%s9345_s13 + $0x110] sm:$0xff] }
 0x661   :  { %v4253_v37 = vld [vmem:[%s9345_s13 + $0x1d0] sm:$0xff] }
 0x662   :  { %v3972_v30 = vmin.f32 %v3970_v3, 0.0  ;;  %vm3971_vm0 = vcmp.gt.f32.partialorder %v3970_v3, 0.0 }
 0x664   :  { %v3973_v16 = vmul.f32 1.442695, %v3972_v30  ;;  %v4214_v30 = vld [vmem:[%s9345_s13 + $0x98] sm:$0xff] }
 0x666   :  { %5377 = vpow2.f32 %v3973_v16  ;;  %v4377_v16 = vld [vmem:[%s9347_s16 + $0x30] sm:$0xff] }
 0x66c   :  { %v5378_v29 = vpop.eup %5377 }
 0x66d   :  { %v5243_v40 = vadd.f32 -1.0, %v5378_v29  ;;  %v4199_v29 = vld [vmem:[%s9345_s13 + $0x20] sm:$0xff] }
 0x66f   :  { %v3976_v42 = vmul.f32 1.6732632, %v5243_v40  ;;  %v4212_v40 = vld [vmem:[%s9345_s13 + $0x88] sm:$0xff] }
 0x671   :  { %v3977_v8 = vsel %vm3971_vm0, %v3970_v3, %v3976_v42  ;;  %v4252_v3 = vld [vmem:[%s9345_s13 + $0x1c8] sm:$0xff]  ;;  %v4375_v42 = vld [vmem:[%s9347_s16 + $0x20] sm:$0xff] }
 0x672   :  { %v9071_v4 = vmul.f32 1.050701, %v3977_v8  ;;  %v4198_v8 = vld [vmem:[%s9345_s13 + $0x18] sm:$0xff] }
 0x674   :  { %5244 = vmatmul.msk.f32.vlgmr.msra.gmra.mxu1 %vm653_vm4, %v9071_v4  ;;  %5245 = vmatmul.msk.f32.vlgmr.msra.gmra.mxu2 %vm653_vm4, %v9071_v4 }
 0x675   :  { %5246 = vmatmul.msk.f32.vlgmr.msrb.gmra.mxu3 %vm653_vm4, %v9071_v4  ;;  %4259 = vmatpush.msra.mxu1 %v4210_v19  ;;  %v4211_v19 = vld [vmem:[%s9345_s13 + $0x80] sm:$0xff] }
 0x677   :  { %4260 = vmatpush.msra.mxu1 %v4209_v56  ;;  %v4248_v56 = vld [vmem:[%s9345_s13 + $0x1a8] sm:$0xff] }
 0x679   :  { %4261 = vmatpush.msra.mxu1 %v4208_v2  ;;  %v4374_v2 = vld [vmem:[%s9347_s16 + $0x18] sm:$0xff] }
 0x67b   :  { %4262 = vmatpush.msra.mxu1 %v4207_v10  ;;  %v4247_v10 = vld [vmem:[%s9345_s13 + $0x1a0] sm:$0xff] }
 0x67c   :  { %5247 = vmatmul.msk.f32.vlgmr.msrb.gmra.mxu1 %vm653_vm4, %v9071_v4 }
 0x67d   :  { %4263 = vmatpush.msra.mxu1 %v4206_v20  ;;  %v4196_v20 = vld [vmem:[%s9345_s13 + $0x8] sm:$0xff] }
 0x67f   :  { %4264 = vmatpush.msra.mxu1 %v4205_v63  ;;  %v4246_v63 = vld [vmem:[%s9345_s13 + $0x198] sm:$0xff] }
 0x681   :  { %4265 = vmatpush.msra.mxu1 %v4204_v17  ;;  %v4195_v17 = vld [vmem:[%s9345_s13] sm:$0xff] }
 0x683   :  { %4266 = vmatpush.msra.mxu1 %v4203_v52 }
 0x685   :  { %4267 = vmatpush.msra.mxu1 %v4202_v7 }
 0x687   :  { %4268 = vmatpush.msra.mxu1 %v4201_v58 }
 0x689   :  { %4269 = vmatpush.msra.mxu1 %v4200_v44 }
 0x68b   :  { %4270 = vmatpush.msra.mxu1 %v4199_v29 }
 0x68d   :  { %4271 = vmatpush.msra.mxu1 %v4198_v8 }
 0x6f1   :  { %v4031_v1 = vpop.f32.mrf.mxu1 }
 0x6f2   :  { %5248 = vmatpush.msk.msrb.mxu2 %vm1396_vm15, %v4031_v1  ;;  %v4373_v1 = vld [vmem:[%s9347_s16 + $0x10] sm:$0xff] }
 0x6f3   :  { %5249 = vmatmul.msk.f32.vlgmr.msrb.gmra.mxu2 %vm4095_vm7, %v4094_v6 }
 0x6f7   :  { %v4051_v11 = vpop.f32.mrf.mxu2 }
 0x6f8   :  { %v4071_v18 = vpop.f32.mrf.mxu3  ;;  %5250 = vmatpush.msk.msra.mxu2 %vm1396_vm15, %v4051_v11  ;;  %v4245_v11 = vld [vmem:[%s9345_s13 + $0x190] sm:$0xff] }
 0x6f9   :  { %5252 = vmatpush.msk.msra.mxu3 %vm1396_vm15, %v4071_v18  ;;  %v4091_v9 = vpop.f32.mrf.mxu1  ;;  %v4371_v18 = vld [vmem:[%s9347_s16] sm:$0xff] }
 0x6fa   :  { %4279 = vmatpush.msrb.mxu2 %v4226_v38  ;;  %5253 = vmatmul.msk.f32.vlgmr.msra.gmra.mxu3 %vm4095_vm7, %v4094_v6  ;;  %v4372_v38 = vld [vmem:[%s9347_s16 + $0x8] sm:$0xff] }
 0x6fb   :  { %5254 = vmatpush.msk.msrb.mxu0 %vm1396_vm15, %v4091_v9  ;;  %5251 = vmatmul.msk.f32.vlgmr.msra.gmra.mxu2 %vm4095_vm7, %v4094_v6  ;;  %v4244_v9 = vld [vmem:[%s9345_s13 + $0x188] sm:$0xff]  ;;  %vm4383_vm15 = vcmask 261120  }
 0x6fc   :  { %5255 = vmatmul.msk.f32.vlgmr.msrb.gmra.mxu0 %vm4095_vm7, %v4094_v6  ;;  %4299 = vmatpush.msrb.mxu3 %v4242_v21  ;;  %v4197_v6 = vld [vmem:[%s9345_s13 + $0x10] sm:$0xff]  ;;  %v4243_v21 = vld [vmem:[%s9345_s13 + $0x180] sm:$0xff] }
 0x6fd   :  { %4280 = vmatpush.msrb.mxu2 %v4225_v5  ;;  %4319 = vmatpush.msra.mxu0 %v4258_v22 }
 0x6fe   :  { %4300 = vmatpush.msrb.mxu3 %v4241_v46  ;;  %4272 = vmatpush.msra.mxu1 %v4197_v6 }
 0x6ff   :  { %4281 = vmatpush.msrb.mxu2 %v4224_v55  ;;  %4320 = vmatpush.msra.mxu0 %v4257_v33 }
 0x700   :  { %4301 = vmatpush.msrb.mxu3 %v4240_v53  ;;  %4273 = vmatpush.msra.mxu1 %v4196_v20 }
 0x701   :  { %4282 = vmatpush.msrb.mxu2 %v4223_v62  ;;  %4321 = vmatpush.msra.mxu0 %v4256_v15 }
 0x702   :  { %4302 = vmatpush.msrb.mxu3 %v4239_v13  ;;  %4274 = vmatpush.msra.mxu1 %v4195_v17  ;;  %v4382_v13 = vld [vmem:[%s9348_s17 + $0x18] sm:$0xff] }
 0x703   :  { %4283 = vmatpush.msrb.mxu2 %v4222_v25  ;;  %4322 = vmatpush.msra.mxu0 %v4255_v49  ;;  %v4381_v25 = vld [vmem:[%s9348_s17 + $0x10] sm:$0xff] }
 0x704   :  { %4303 = vmatpush.msrb.mxu3 %v4238_v41 }
 0x705   :  { %4284 = vmatpush.msrb.mxu2 %v4221_v51  ;;  %4323 = vmatpush.msra.mxu0 %v4254_v45 }
 0x706   :  { %4304 = vmatpush.msrb.mxu3 %v4237_v47 }
 0x707   :  { %4285 = vmatpush.msrb.mxu2 %v4220_v0  ;;  %4324 = vmatpush.msra.mxu0 %v4253_v37 }
 0x708   :  { %4305 = vmatpush.msrb.mxu3 %v4236_v14 }
 0x709   :  { %4286 = vmatpush.msrb.mxu2 %v4219_v28  ;;  %4325 = vmatpush.msra.mxu0 %v4252_v3 }
 0x70a   :  { %4306 = vmatpush.msrb.mxu3 %v4235_v61 }
 0x70b   :  { %4287 = vmatpush.msrb.mxu2 %v4218_v60  ;;  %4326 = vmatpush.msra.mxu0 %v4251_v26 }
 0x70c   :  { %4307 = vmatpush.msrb.mxu3 %v4234_v43  ;;  %v4380_v43 = vld [vmem:[%s9348_s17 + $0x8] sm:$0xff] }
 0x70d   :  { %4288 = vmatpush.msrb.mxu2 %v4217_v39  ;;  %4327 = vmatpush.msra.mxu0 %v4250_v32  ;;  %v4379_v39 = vld [vmem:[%s9348_s17] sm:$0xff] }
 0x70e   :  { %4308 = vmatpush.msrb.mxu3 %v4233_v34  ;;  %v24_v34 = vstv %s9350_s18 }
 0x70f   :  { %4289 = vmatpush.msrb.mxu2 %v4216_v57  ;;  %4328 = vmatpush.msra.mxu0 %v4249_v54  ;;  %25 = vst [vmem:[#allocation2] sm:$0x1] %v24_v34 }
 0x710   :  { %4309 = vmatpush.msrb.mxu3 %v4232_v27 }
 0x711   :  { %4290 = vmatpush.msrb.mxu2 %v4215_v24  ;;  %4329 = vmatpush.msra.mxu0 %v4248_v56 }
 0x712   :  { %4310 = vmatpush.msrb.mxu3 %v4231_v50 }
 0x713   :  { %4291 = vmatpush.msrb.mxu2 %v4214_v30  ;;  %4330 = vmatpush.msra.mxu0 %v4247_v10 }
 0x714   :  { %4311 = vmatpush.msrb.mxu3 %v4230_v35 }
 0x715   :  { %4292 = vmatpush.msrb.mxu2 %v4213_v59  ;;  %4331 = vmatpush.msra.mxu0 %v4246_v63 }
 0x716   :  { %4312 = vmatpush.msrb.mxu3 %v4229_v48  ;;  %v5264_v35 = vld [vmem:[#allocation2] ss:$0 sm:$0xff] }
 0x717   :  { %4293 = vmatpush.msrb.mxu2 %v4212_v40  ;;  %4332 = vmatpush.msra.mxu0 %v4245_v11 }
 0x718   :  { %4313 = vmatpush.msrb.mxu3 %v4228_v36 }
 0x719   :  { %4294 = vmatpush.msrb.mxu2 %v4211_v19  ;;  %4333 = vmatpush.msra.mxu0 %v4244_v9 }
 0x71a   :  { %4314 = vmatpush.msrb.mxu3 %v4227_v12 }
 0x71b   :  { %4334 = vmatpush.msra.mxu0 %v4243_v21  ;;  %4399 = vmatpush.msra.mxu2 %v4382_v13 }
 0x71c   :  { %4415 = vmatpush.msra.mxu3 %v4378_v31 }
 0x71d   :  { %4400 = vmatpush.msra.mxu2 %v4381_v25 }
 0x71e   :  { %4416 = vmatpush.msra.mxu3 %v4377_v16 }
 0x71f   :  { %4401 = vmatpush.msra.mxu2 %v4380_v43 }
 0x720   :  { %4417 = vmatpush.msra.mxu3 %v4376_v23 }
 0x721   :  { %4402 = vmatpush.msra.mxu2 %v4379_v39 }
 0x722   :  { %4418 = vmatpush.msra.mxu3 %v4375_v42 }
 0x724   :  { %4419 = vmatpush.msra.mxu3 %v4374_v2 }
 0x726   :  { %4420 = vmatpush.msra.mxu3 %v4373_v1 }
 0x728   :  { %4421 = vmatpush.msra.mxu3 %v4372_v38 }
 0x72a   :  { %4422 = vmatpush.msra.mxu3 %v4371_v18 }
 0x776   :  { %v4128_v5 = vpop.f32.mrf.mxu2 }
 0x777   :  { %v4191_v22 = vand.u32 2147483647, %v4128_v5 }
 0x779   :  { %v4188_v46 = vpop.f32.mrf.mxu0  ;;  %4275 = vmatmul.f32.vlgmr.msra.gmra.mxu1 %v4191_v22 }
 0x77a   :  { %v4194_v55 = vand.u32 2147483647, %v4188_v46 }
 0x77c   :  { %4335 = vmatmul.f32.vlgmr.msra.gmra.mxu0 %v4194_v55 }
 0x77d   :  { %v4168_v33 = vpop.f32.mrf.mxu3 }
 0x77e   :  { %v4193_v53 = vand.u32 2147483647, %v4168_v33  ;;  %v4148_v62 = vpop.f32.mrf.mxu2 }
 0x77f   :  { %v4192_v15 = vand.u32 2147483647, %v4148_v62 }
 0x780   :  { %4315 = vmatmul.f32.vlgmr.msrb.gmra.mxu3 %v4193_v53 }
 0x781   :  { %4295 = vmatmul.f32.vlgmr.msrb.gmra.mxu2 %v4192_v15 }
 0x788   :  { %5260 = vmatmul.msk.f32.vlgmr.msra.gmra.mxu3 %vm653_vm4, %v9071_v4  ;;  %v4342_v4 = vld [vmem:[%s9349_s15] sm:$0x3]  ;;  %vm4343_vm4 = vcmask 31744  }
 0x7f6   :  { %v4276_v49 = vpop.f32.mrf.mxu1 }
 0x7f9   :  { %v4336_v47 = vpop.f32.mrf.mxu0 }
 0x803   :  { %v4316_v45 = vpop.f32.mrf.mxu3 }
 0x804   :  { %v4296_v41 = vpop.f32.mrf.mxu2 }
 0x805   :  { %v4297_v51 = vadd.f32 %v4296_v41, %v4276_v49 }
 0x807   :  { %v4317_v0 = vadd.f32 %v4316_v45, %v4297_v51 }
 0x809   :  { %v4337_v14 = vadd.f32 %v4336_v47, %v4317_v0 }
 0x80b   :  { %v4339_v28 = vsub.f32 0.0, %v4337_v14  ;;  %v4424_v48 = vpop.f32.mrf.mxu3 }
 0x80d   :  { %v4340_v61 = vmul.f32 1.442695, %v4339_v28 }
 0x80f   :  { %5379 = vpow2.f32 %v4340_v61 }
 0x815   :  { %v5380_v60 = vpop.eup %5379 }
 0x816   :  { %5256 = vmatpush.msk.msrb.mxu1 %vm1117_vm14, %v5380_v60  ;;  %vm4432_vm14 = vcmask 1024  }
 0x817   :  { %5257 = vmatmul.msk.f32.vlgmr.msrb.gmra.mxu1 %vm4343_vm4, %v4342_v4 }
 0x894   :  { %v4367_v27 = vpop.f32.mrf.mxu1 }
 0x895   :  { %v5258_v50 = vadd.f32 -1.0, %v4367_v27 }
 0x897   :  { %5259 = vmatmul.msk.f32.vlgmr.msra.gmra.mxu2 %vm4383_vm15, %v5258_v50 }
 0x91a   :  { %v4404_v36 = vpop.f32.mrf.mxu2 }
 0x91b   :  { %v4425_v52 = vadd.f32 %v4424_v48, %v4404_v36 }
 0x91d   :  { %v4431_v57 = vadd.f32 %v5264_v35, %v4425_v52 }
 0x91f   :  { %4433 = vst.msk [vmem:[%s9351_s19] sm:$0x3] %vm4432_vm14, %v4431_v57 }

</bundles_post_ra>
